<compile_context>
chip_gen: v6e
topology: v6e:2x2x1
jax: 0.10.0
libtpu: 0.0.40
codegen_flags: <defaults>
</compile_context>

<pallas_src>
import jax
import jax.numpy as jnp
from jax.experimental import pallas as pl
from jax.experimental.pallas import tpu as pltpu


def _round_up(x, m):
    return ((x + m - 1) // m) * m


def _pick_block(n, target=512):
    """Largest 128-multiple block (<= target) that keeps row padding small."""
    n128 = _round_up(max(n, 1), 128)
    if n128 <= target:
        return n128
    best, best_pad = 128, _round_up(n, 128) - n
    b = 256
    while b <= target:
        pad = _round_up(n, b) - n
        if pad <= best_pad:
            best, best_pad = b, pad
        b += 128
    return best


_RESIDENT_E_BUDGET = 40 * 1024 * 1024       # conservative vs v7x's 64 MiB VMEM


def _prop_vmem_bytes(block_m, block_k, k_pad, d_pad, resident_e, with_acc):
    a = 2 * block_m * block_k * 2                         # bf16 A tiles, x2 buf
    e = 2 * (k_pad if resident_e else block_k) * d_pad * 2
    e_out = 2 * block_m * d_pad * 2
    acc_io = 2 * (2 * block_m * d_pad * 4) if with_acc else 0
    scratch = block_m * d_pad * 4
    return a + e + e_out + acc_io + scratch


# ----------------------------------------------------------------------------
# Kernel 1: one LightGCN propagation step (tiled MXU matmul + fused layer sum)
#   e_next  = A @ e_prev          A: (M_pad, K_pad) bf16 bipartite SNM block
#   acc_out = acc_in + e_next     running sum for the 'avg' layer combination
# grid = (M_pad // block_m, K_pad // block_k); rows 'parallel', K 'arbitrary'.
# ----------------------------------------------------------------------------
def _make_prop_kernel(block_k, resident_e, with_acc):
    def kernel(*refs):
        if with_acc:
            a_ref, e_ref, acc_in_ref, e_out_ref, acc_out_ref, acc_sc = refs
        else:
            a_ref, e_ref, e_out_ref, acc_sc = refs
            acc_in_ref = acc_out_ref = None
        k = pl.program_id(1)

        @pl.when(k == 0)
        def _():
            acc_sc[...] = jnp.zeros_like(acc_sc)

        if resident_e:
            start = pl.multiple_of(k * block_k, block_k)
            e_blk = e_ref[pl.ds(start, block_k), :]
        else:
            e_blk = e_ref[...]

        # bf16 x bf16 MXU matmul, f32 accumulation in VMEM scratch.
        acc_sc[...] += jnp.dot(a_ref[...], e_blk,
                               preferred_element_type=jnp.float32)

        @pl.when(k == pl.num_programs(1) - 1)
        def _():
            e_new = acc_sc[...]
            e_out_ref[...] = e_new.astype(e_out_ref.dtype)    # bf16 writeback
            if with_acc:
                acc_out_ref[...] = acc_in_ref[...] + e_new    # f32 layer sum

    return kernel


def _prop_step(a_bf16, e_prev_bf16, acc_prev, *, block_m, block_k):
    m_pad, k_pad = a_bf16.shape
    d_pad = e_prev_bf16.shape[1]
    with_acc = acc_prev is not None

    resident_e = (_prop_vmem_bytes(block_m, block_k, k_pad, d_pad, True,
                                   with_acc) <= _RESIDENT_E_BUDGET)
    vmem_bytes = _prop_vmem_bytes(block_m, block_k, k_pad, d_pad, resident_e,
                                  with_acc)
    vmem_limit = min(int(vmem_bytes * 1.25) + (4 << 20), 56 << 20)

    if resident_e:
        # Whole E_prev slab is VMEM-resident: constant block index => one DMA
        # per pallas_call instead of one per (i, k) grid step.
        e_spec = pl.BlockSpec((k_pad, d_pad), lambda i, k: (0, 0))
    else:
        # TODO(synk): on v5e add pipeline_mode=pl.Buffered(3) on the A tile if
        # profiling still shows exposed DMA at this block size.
        e_spec = pl.BlockSpec((block_k, d_pad), lambda i, k: (k, 0))

    in_specs = [pl.BlockSpec((block_m, block_k), lambda i, k: (i, k)), e_spec]
    out_shapes = [jax.ShapeDtypeStruct((m_pad, d_pad), jnp.bfloat16)]
    out_specs = [pl.BlockSpec((block_m, d_pad), lambda i, k: (i, 0))]
    operands = [a_bf16, e_prev_bf16]
    io_aliases = {}
    if with_acc:
        in_specs.append(pl.BlockSpec((block_m, d_pad), lambda i, k: (i, 0)))
        out_shapes.append(jax.ShapeDtypeStruct((m_pad, d_pad), jnp.float32))
        out_specs.append(pl.BlockSpec((block_m, d_pad), lambda i, k: (i, 0)))
        operands.append(acc_prev)
        io_aliases = {2: 1}            # running sum updated in place

    result = pl.pallas_call(
        _make_prop_kernel(block_k, resident_e, with_acc),
        out_shape=tuple(out_shapes),
        grid=(m_pad // block_m, k_pad // block_k),
        in_specs=in_specs,
        out_specs=tuple(out_specs),
        scratch_shapes=[pltpu.VMEM((block_m, d_pad), jnp.float32)],
        input_output_aliases=io_aliases,
        compiler_params=pltpu.CompilerParams(
            dimension_semantics=("parallel", "arbitrary"),
            vmem_limit_bytes=vmem_limit),
    )(*operands)

    if with_acc:
        return result[0], result[1]
    return result[0], None


# ----------------------------------------------------------------------------
# Constant-graph preprocessing (do once, cache across training steps).
# LightGCN's SNM is bipartite: only the user-item / item-user blocks are
# nonzero, so we only keep (and stream) those, in bf16.
# ----------------------------------------------------------------------------
def prepare_lightgcn_graph(snm, user_count, item_count, *, block_target=512):
    block_u = _pick_block(user_count, block_target)
    block_i = _pick_block(item_count, block_target)
    u_rows = _round_up(user_count, block_u)
    i_rows = _round_up(item_count, block_i)
    # TODO(synk): fp8 (v7x) / int8 (v5e-v6e) SNM with per-tile scales would
    # halve A traffic again; needs an accuracy sign-off first.
    a_ui = jnp.zeros((u_rows, i_rows), jnp.float32).at[
        :user_count, :item_count].set(snm[:user_count, user_count:])
    a_iu = jnp.zeros((i_rows, u_rows), jnp.float32).at[
        :item_count, :user_count].set(snm[user_count:, :user_count])
    return {"a_ui": a_ui.astype(jnp.bfloat16),
            "a_iu": a_iu.astype(jnp.bfloat16)}


# ----------------------------------------------------------------------------
# get_embedding (matches PyTorch semantics for 'first' / 'avg' / 'last')
# ----------------------------------------------------------------------------
def lightgcn_get_embedding(user_emb_w, item_emb_w, graph, num_layer,
                           layer_index, *, block_target=512):
    user_count, dim = user_emb_w.shape
    item_count = item_emb_w.shape[0]
    d_pad = _round_up(dim, 128)
    block_u = _pick_block(user_count, block_target)
    block_i = _pick_block(item_count, block_target)
    u_rows = _round_up(user_count, block_u)
    i_rows = _round_up(item_count, block_i)

    a_ui, a_iu = graph["a_ui"], graph["a_iu"]
    assert a_ui.shape == (u_rows, i_rows) and a_iu.shape == (i_rows, u_rows), \
        "graph was prepared with different counts / block_target"

    # Zero-pad embeddings to (rows_pad, 128-lane dim); padded rows/lanes stay
    # zero through propagation, so gathers and scores are unaffected.
    u0 = jnp.zeros((u_rows, d_pad), jnp.float32).at[
        :user_count, :dim].set(user_emb_w.astype(jnp.float32))
    i0 = jnp.zeros((i_rows, d_pad), jnp.float32).at[
        :item_count, :dim].set(item_emb_w.astype(jnp.float32))

    if layer_index == 0:                           # 'first'
        return u0, i0

    with_acc = (layer_index == -1)                 # 'avg'
    steps = num_layer if with_acc else layer_index # 'last' -> num_layer-1 hops
    if not with_acc and steps == 0:
        return u0, i0

    u_prev, i_prev = u0.astype(jnp.bfloat16), i0.astype(jnp.bfloat16)
    u_acc = u0 if with_acc else None
    i_acc = i0 if with_acc else None

    for _ in range(steps):                         # static Python unroll
        u_next, u_acc = _prop_step(a_ui, i_prev, u_acc,
                                   block_m=block_u, block_k=block_i)
        i_next, i_acc = _prop_step(a_iu, u_prev, i_acc,
                                   block_m=block_i, block_k=block_u)
        u_prev, i_prev = u_next, i_next            # keep only previous layer

    if with_acc:                                   # 'avg'
        scale = 1.0 / float(num_layer + 1)
        return u_acc * scale, i_acc * scale
    return u_prev.astype(jnp.float32), i_prev.astype(jnp.float32)   # 'last'


# ----------------------------------------------------------------------------
# Kernel 2: BPR scoring, batch-tiled with lane-dense outputs.
#   pos = sum(u * i, axis=1); neg = sum(u * j, axis=1)
# ----------------------------------------------------------------------------
def _score_kernel(u_ref, pi_ref, ni_ref, pos_ref, neg_ref):
    u = u_ref[...]                                 # (TB, d_pad) f32
    pos_ref[...] = jnp.sum(u * pi_ref[...], axis=1)[None, :]
    neg_ref[...] = jnp.sum(u * ni_ref[...], axis=1)[None, :]


def lightgcn_score(user_emb_p, item_emb_p, user_idx, pos_idx, neg_idx, *,
                   batch_tile=128):
    b = user_idx.shape[0]
    d_pad = user_emb_p.shape[1]
    b_pad = _round_up(b, batch_tile)

    # One XLA gather per operand; rows are then streamed tile-by-tile.
    u = jnp.take(user_emb_p, user_idx.astype(jnp.int32), axis=0)
    pi = jnp.take(item_emb_p, pos_idx.astype(jnp.int32), axis=0)
    ni = jnp.take(item_emb_p, neg_idx.astype(jnp.int32), axis=0)
    if b_pad != b:
        pad = ((0, b_pad - b), (0, 0))
        u, pi, ni = jnp.pad(u, pad), jnp.pad(pi, pad), jnp.pad(ni, pad)

    n_tiles = b_pad // batch_tile
    pos, neg = pl.pallas_call(
        _score_kernel,
        out_shape=(jax.ShapeDtypeStruct((1, b_pad), jnp.float32),
                   jax.ShapeDtypeStruct((1, b_pad), jnp.float32)),
        grid=(n_tiles,),
        in_specs=[pl.BlockSpec((batch_tile, d_pad), lambda t: (t, 0))] * 3,
        out_specs=(pl.BlockSpec((1, batch_tile), lambda t: (0, t)),
                   pl.BlockSpec((1, batch_tile), lambda t: (0, t))),
        compiler_params=pltpu.CompilerParams(
            dimension_semantics=("parallel",)),
    )(u, pi, ni)
    return pos[0, :b].reshape(b, 1), neg[0, :b].reshape(b, 1)


# ----------------------------------------------------------------------------
# Full forward (matches LightGCN.forward)
# ----------------------------------------------------------------------------
def lightgcn_forward(user_emb_w, item_emb_w, graph, num_layer, layer_index,
                     user_idx, pos_idx, neg_idx, *, block_target=512):
    u_emb, i_emb = lightgcn_get_embedding(
        user_emb_w, item_emb_w, graph, num_layer, layer_index,
        block_target=block_target)
    return lightgcn_score(u_emb, i_emb, user_idx, pos_idx, neg_idx)


def build_snm(key, user_count, item_count):
    """Dense symmetric-normalized adjacency D^-1/2 A D^-1/2 of a random
    bipartite user-item interaction graph (LightGCN's SNM)."""
    n = user_count + item_count
    r = (jax.random.uniform(key, (user_count, item_count)) < 0.2).astype(jnp.float32)
    a = jnp.zeros((n, n), jnp.float32)
    a = a.at[:user_count, user_count:].set(r)
    a = a.at[user_count:, :user_count].set(r.T)
    deg = a.sum(axis=1)
    d_inv_sqrt = jnp.where(deg > 0, 1.0 / jnp.sqrt(jnp.maximum(deg, 1e-12)), 0.0)
    return a * d_inv_sqrt[:, None] * d_inv_sqrt[None, :]


if __name__ == "__main__":
    user_count, item_count, dim = 200, 300, 32
    num_layer = 2
    layer_index = -1          # using_layer_index = 'avg'
    batch = 16
    block_target = 512        # clamped per side to the padded row count

    key = jax.random.PRNGKey(0)
    k_u, k_i, k_snm, k_b = jax.random.split(key, 4)

    # nn.init.normal_(..., mean=0.0, std=0.01)
    user_emb_w = 0.01 * jax.random.normal(k_u, (user_count, dim), jnp.float32)
    item_emb_w = 0.01 * jax.random.normal(k_i, (item_count, dim), jnp.float32)
    snm = build_snm(k_snm, user_count, item_count)

    kb1, kb2, kb3 = jax.random.split(k_b, 3)
    user_idx = jax.random.randint(kb1, (batch,), 0, user_count)
    pos_idx = jax.random.randint(kb2, (batch,), 0, item_count)
    neg_idx = jax.random.randint(kb3, (batch,), 0, item_count)

    # Constant-graph preprocessing hoisted out of the per-step path.
    graph = jax.block_until_ready(
        prepare_lightgcn_graph(snm, user_count, item_count,
                               block_target=block_target))

    @jax.jit
    def fwd(user_emb_w, item_emb_w, graph, user_idx, pos_idx, neg_idx):
        return lightgcn_forward(user_emb_w, item_emb_w, graph, num_layer,
                                layer_index, user_idx, pos_idx, neg_idx,
                                block_target=block_target)

    pos_score, neg_score = fwd(user_emb_w, item_emb_w, graph,
                               user_idx, pos_idx, neg_idx)
    jax.block_until_ready((pos_score, neg_score))

    # Pure-f32 JAX reference of the forward semantics (kernel streams SNM and
    # layer embeddings in bf16, so compare with a score-scaled tolerance).
    e = jnp.concatenate([user_emb_w, item_emb_w], axis=0)
    embs = [e]
    for _ in range(num_layer):
        embs.append(snm @ embs[-1])
    ui_ref = jnp.mean(jnp.stack(embs), axis=0)
    u_ref = ui_ref[:user_count][user_idx]
    i_ref = ui_ref[user_count:][pos_idx]
    j_ref = ui_ref[user_count:][neg_idx]
    pos_ref = jnp.sum(u_ref * i_ref, axis=1, keepdims=True)
    neg_ref = jnp.sum(u_ref * j_ref, axis=1, keepdims=True)

    def _close(got, want):
        tol = 1e-6 + 5e-2 * float(jnp.max(jnp.abs(want)))
        return float(jnp.max(jnp.abs(got - want))) <= tol

    assert pos_score.shape == (batch, 1) and neg_score.shape == (batch, 1)
    assert _close(pos_score, pos_ref)
    assert _close(neg_score, neg_ref)

    print("KERNEL_OK")
</pallas_src>

<mosaic_0001>
module attributes {stable_mosaic.version = 11 : i64} {
  func.func @kernel(%arg0: i32, %arg1: i32, %arg2: memref<256x384xbf16, #tpu.memory_space<vmem>>, %arg3: memref<384x128xbf16, #tpu.memory_space<vmem>>, %arg4: memref<256x128xf32, #tpu.memory_space<vmem>>, %arg5: memref<256x128xbf16, #tpu.memory_space<vmem>>, %arg6: memref<256x128xf32, #tpu.memory_space<vmem>>, %arg7: memref<256x128xf32, #tpu.memory_space<vmem>>) attributes {dimension_semantics = [#tpu.dimension_semantics<parallel>, #tpu.dimension_semantics<arbitrary>], iteration_bounds = array<i64: 1, 1>, scalar_prefetch = 0 : i64, scratch_operands = 1 : i64, tpu.core_type = #tpu.core_type<tc>, window_params = [{transform_indices = @transform_0, window_bounds = array<i64: 256, 384>}, {pipeline_mode = #tpu.pipeline_mode<synchronous>, transform_indices = @transform_1, window_bounds = array<i64: 384, 128>}, {transform_indices = @transform_2, window_bounds = array<i64: 256, 128>}, {transform_indices = @transform_3, window_bounds = array<i64: 256, 128>}, {transform_indices = @transform_4, window_bounds = array<i64: 256, 128>}]} {
    %c0_i32 = arith.constant 0 : i32
    %0 = arith.cmpi eq, %arg1, %c0_i32 : i32
    %1 = arith.extui %0 : i1 to i32
    %c0_i32_0 = arith.constant 0 : i32
    %2 = arith.cmpi ne, %1, %c0_i32_0 : i32
    scf.if %2 {
      %cst_9 = arith.constant 0.000000e+00 : f32
      %15 = vector.broadcast %cst_9 : f32 to vector<256x128xf32>
      %c0_10 = arith.constant 0 : index
      %c0_11 = arith.constant 0 : index
      %16 = vector.load %arg7[%c0_10, %c0_11] : memref<256x128xf32, #tpu.memory_space<vmem>>, vector<256x128xf32>
      tpu.vector_store %arg7[%c0_10, %c0_11], %15 {strides = array<i32>} : memref<256x128xf32, #tpu.memory_space<vmem>>, vector<256x128xf32>,
    } else {
    }
    %c384_i32 = arith.constant 384 : i32
    %3 = arith.muli %arg1, %c384_i32 : i32
    %4 = tpu.assume_multiple %3, 384 : i32
    %5 = arith.index_cast %4 : i32 to index
    %c0 = arith.constant 0 : index
    %6 = vector.load %arg3[%5, %c0] : memref<384x128xbf16, #tpu.memory_space<vmem>>, vector<384x128xbf16>
    %c0_1 = arith.constant 0 : index
    %c0_2 = arith.constant 0 : index
    %7 = vector.load %arg7[%c0_1, %c0_2] : memref<256x128xf32, #tpu.memory_space<vmem>>, vector<256x128xf32>
    %c0_3 = arith.constant 0 : index
    %c0_4 = arith.constant 0 : index
    %8 = vector.load %arg2[%c0_3, %c0_4] : memref<256x384xbf16, #tpu.memory_space<vmem>>, vector<256x384xbf16>
    %cst = arith.constant dense<0.000000e+00> : vector<256x128xf32>
    %9 = tpu.matmul %8, %6, %cst {dimension_numbers = #tpu.dot_dimension_numbers<[1], [0], [0], [1], [0, 0, 1, 1], [], []>} : vector<256x384xbf16>, vector<384x128xbf16>, vector<256x128xf32> -> vector<256x128xf32>
    %10 = arith.addf %7, %9 : vector<256x128xf32>
    %c0_5 = arith.constant 0 : index
    %c0_6 = arith.constant 0 : index
    %11 = vector.load %arg7[%c0_5, %c0_6] : memref<256x128xf32, #tpu.memory_space<vmem>>, vector<256x128xf32>
    tpu.vector_store %arg7[%c0_5, %c0_6], %10 {strides = array<i32>} : memref<256x128xf32, #tpu.memory_space<vmem>>, vector<256x128xf32>,
    %c0_i32_7 = arith.constant 0 : i32
    %12 = arith.cmpi eq, %arg1, %c0_i32_7 : i32
    %13 = arith.extui %12 : i1 to i32
    %c0_i32_8 = arith.constant 0 : i32
    %14 = arith.cmpi ne, %13, %c0_i32_8 : i32
    scf.if %14 {
      %c0_9 = arith.constant 0 : index
      %c0_10 = arith.constant 0 : index
      %15 = vector.load %arg7[%c0_9, %c0_10] : memref<256x128xf32, #tpu.memory_space<vmem>>, vector<256x128xf32>
      %16 = arith.truncf %15 : vector<256x128xf32> to vector<256x128xbf16>
      %c0_11 = arith.constant 0 : index
      %c0_12 = arith.constant 0 : index
      %17 = vector.load %arg5[%c0_11, %c0_12] : memref<256x128xbf16, #tpu.memory_space<vmem>>, vector<256x128xbf16>
      tpu.vector_store %arg5[%c0_11, %c0_12], %16 {strides = array<i32>} : memref<256x128xbf16, #tpu.memory_space<vmem>>, vector<256x128xbf16>,
      %c0_13 = arith.constant 0 : index
      %c0_14 = arith.constant 0 : index
      %18 = vector.load %arg4[%c0_13, %c0_14] : memref<256x128xf32, #tpu.memory_space<vmem>>, vector<256x128xf32>
      %19 = arith.addf %18, %15 : vector<256x128xf32>
      %c0_15 = arith.constant 0 : index
      %c0_16 = arith.constant 0 : index
      %20 = vector.load %arg6[%c0_15, %c0_16] : memref<256x128xf32, #tpu.memory_space<vmem>>, vector<256x128xf32>
      tpu.vector_store %arg6[%c0_15, %c0_16], %19 {strides = array<i32>} : memref<256x128xf32, #tpu.memory_space<vmem>>, vector<256x128xf32>,
    } else {
    }
    return
  }
  func.func @transform_0(%arg0: i32, %arg1: i32) -> (i32, i32) {
    %c0_i32 = arith.constant 0 : i32
    return %arg0, %arg1 : i32, i32
  }
  func.func @transform_1(%arg0: i32, %arg1: i32) -> (i32, i32) {
    %c0_i32 = arith.constant 0 : i32
    %c0_i32_0 = arith.constant 0 : i32
    %c0_i32_1 = arith.constant 0 : i32
    return %c0_i32, %c0_i32_0 : i32, i32
  }
  func.func @transform_2(%arg0: i32, %arg1: i32) -> (i32, i32) {
    %c0_i32 = arith.constant 0 : i32
    %c0_i32_0 = arith.constant 0 : i32
    return %arg0, %c0_i32 : i32, i32
  }
  func.func @transform_3(%arg0: i32, %arg1: i32) -> (i32, i32) {
    %c0_i32 = arith.constant 0 : i32
    %c0_i32_0 = arith.constant 0 : i32
    return %arg0, %c0_i32 : i32, i32
  }
  func.func @transform_4(%arg0: i32, %arg1: i32) -> (i32, i32) {
    %c0_i32 = arith.constant 0 : i32
    %c0_i32_0 = arith.constant 0 : i32
    return %arg0, %c0_i32 : i32, i32
  }
}

module attributes {stable_mosaic.version = 11 : i64} {
  func.func @kernel(%arg0: i32, %arg1: i32, %arg2: memref<384x256xbf16, #tpu.memory_space<vmem>>, %arg3: memref<256x128xbf16, #tpu.memory_space<vmem>>, %arg4: memref<384x128xf32, #tpu.memory_space<vmem>>, %arg5: memref<384x128xbf16, #tpu.memory_space<vmem>>, %arg6: memref<384x128xf32, #tpu.memory_space<vmem>>, %arg7: memref<384x128xf32, #tpu.memory_space<vmem>>) attributes {dimension_semantics = [#tpu.dimension_semantics<parallel>, #tpu.dimension_semantics<arbitrary>], iteration_bounds = array<i64: 1, 1>, scalar_prefetch = 0 : i64, scratch_operands = 1 : i64, tpu.core_type = #tpu.core_type<tc>, window_params = [{transform_indices = @transform_0, window_bounds = array<i64: 384, 256>}, {pipeline_mode = #tpu.pipeline_mode<synchronous>, transform_indices = @transform_1, window_bounds = array<i64: 256, 128>}, {transform_indices = @transform_2, window_bounds = array<i64: 384, 128>}, {transform_indices = @transform_3, window_bounds = array<i64: 384, 128>}, {transform_indices = @transform_4, window_bounds = array<i64: 384, 128>}]} {
    %c0_i32 = arith.constant 0 : i32
    %0 = arith.cmpi eq, %arg1, %c0_i32 : i32
    %1 = arith.extui %0 : i1 to i32
    %c0_i32_0 = arith.constant 0 : i32
    %2 = arith.cmpi ne, %1, %c0_i32_0 : i32
    scf.if %2 {
      %cst_9 = arith.constant 0.000000e+00 : f32
      %15 = vector.broadcast %cst_9 : f32 to vector<384x128xf32>
      %c0_10 = arith.constant 0 : index
      %c0_11 = arith.constant 0 : index
      %16 = vector.load %arg7[%c0_10, %c0_11] : memref<384x128xf32, #tpu.memory_space<vmem>>, vector<384x128xf32>
      tpu.vector_store %arg7[%c0_10, %c0_11], %15 {strides = array<i32>} : memref<384x128xf32, #tpu.memory_space<vmem>>, vector<384x128xf32>,
    } else {
    }
    %c256_i32 = arith.constant 256 : i32
    %3 = arith.muli %arg1, %c256_i32 : i32
    %4 = tpu.assume_multiple %3, 256 : i32
    %5 = arith.index_cast %4 : i32 to index
    %c0 = arith.constant 0 : index
    %6 = vector.load %arg3[%5, %c0] : memref<256x128xbf16, #tpu.memory_space<vmem>>, vector<256x128xbf16>
    %c0_1 = arith.constant 0 : index
    %c0_2 = arith.constant 0 : index
    %7 = vector.load %arg7[%c0_1, %c0_2] : memref<384x128xf32, #tpu.memory_space<vmem>>, vector<384x128xf32>
    %c0_3 = arith.constant 0 : index
    %c0_4 = arith.constant 0 : index
    %8 = vector.load %arg2[%c0_3, %c0_4] : memref<384x256xbf16, #tpu.memory_space<vmem>>, vector<384x256xbf16>
    %cst = arith.constant dense<0.000000e+00> : vector<384x128xf32>
    %9 = tpu.matmul %8, %6, %cst {dimension_numbers = #tpu.dot_dimension_numbers<[1], [0], [0], [1], [0, 0, 1, 1], [], []>} : vector<384x256xbf16>, vector<256x128xbf16>, vector<384x128xf32> -> vector<384x128xf32>
    %10 = arith.addf %7, %9 : vector<384x128xf32>
    %c0_5 = arith.constant 0 : index
    %c0_6 = arith.constant 0 : index
    %11 = vector.load %arg7[%c0_5, %c0_6] : memref<384x128xf32, #tpu.memory_space<vmem>>, vector<384x128xf32>
    tpu.vector_store %arg7[%c0_5, %c0_6], %10 {strides = array<i32>} : memref<384x128xf32, #tpu.memory_space<vmem>>, vector<384x128xf32>,
    %c0_i32_7 = arith.constant 0 : i32
    %12 = arith.cmpi eq, %arg1, %c0_i32_7 : i32
    %13 = arith.extui %12 : i1 to i32
    %c0_i32_8 = arith.constant 0 : i32
    %14 = arith.cmpi ne, %13, %c0_i32_8 : i32
    scf.if %14 {
      %c0_9 = arith.constant 0 : index
      %c0_10 = arith.constant 0 : index
      %15 = vector.load %arg7[%c0_9, %c0_10] : memref<384x128xf32, #tpu.memory_space<vmem>>, vector<384x128xf32>
      %16 = arith.truncf %15 : vector<384x128xf32> to vector<384x128xbf16>
      %c0_11 = arith.constant 0 : index
      %c0_12 = arith.constant 0 : index
      %17 = vector.load %arg5[%c0_11, %c0_12] : memref<384x128xbf16, #tpu.memory_space<vmem>>, vector<384x128xbf16>
      tpu.vector_store %arg5[%c0_11, %c0_12], %16 {strides = array<i32>} : memref<384x128xbf16, #tpu.memory_space<vmem>>, vector<384x128xbf16>,
      %c0_13 = arith.constant 0 : index
      %c0_14 = arith.constant 0 : index
      %18 = vector.load %arg4[%c0_13, %c0_14] : memref<384x128xf32, #tpu.memory_space<vmem>>, vector<384x128xf32>
      %19 = arith.addf %18, %15 : vector<384x128xf32>
      %c0_15 = arith.constant 0 : index
      %c0_16 = arith.constant 0 : index
      %20 = vector.load %arg6[%c0_15, %c0_16] : memref<384x128xf32, #tpu.memory_space<vmem>>, vector<384x128xf32>
      tpu.vector_store %arg6[%c0_15, %c0_16], %19 {strides = array<i32>} : memref<384x128xf32, #tpu.memory_space<vmem>>, vector<384x128xf32>,
    } else {
    }
    return
  }
  func.func @transform_0(%arg0: i32, %arg1: i32) -> (i32, i32) {
    %c0_i32 = arith.constant 0 : i32
    return %arg0, %arg1 : i32, i32
  }
  func.func @transform_1(%arg0: i32, %arg1: i32) -> (i32, i32) {
    %c0_i32 = arith.constant 0 : i32
    %c0_i32_0 = arith.constant 0 : i32
    %c0_i32_1 = arith.constant 0 : i32
    return %c0_i32, %c0_i32_0 : i32, i32
  }
  func.func @transform_2(%arg0: i32, %arg1: i32) -> (i32, i32) {
    %c0_i32 = arith.constant 0 : i32
    %c0_i32_0 = arith.constant 0 : i32
    return %arg0, %c0_i32 : i32, i32
  }
  func.func @transform_3(%arg0: i32, %arg1: i32) -> (i32, i32) {
    %c0_i32 = arith.constant 0 : i32
    %c0_i32_0 = arith.constant 0 : i32
    return %arg0, %c0_i32 : i32, i32
  }
  func.func @transform_4(%arg0: i32, %arg1: i32) -> (i32, i32) {
    %c0_i32 = arith.constant 0 : i32
    %c0_i32_0 = arith.constant 0 : i32
    return %arg0, %c0_i32 : i32, i32
  }
}

module attributes {stable_mosaic.version = 11 : i64} {
  func.func @kernel(%arg0: i32, %arg1: i32, %arg2: memref<256x384xbf16, #tpu.memory_space<vmem>>, %arg3: memref<384x128xbf16, #tpu.memory_space<vmem>>, %arg4: memref<256x128xf32, #tpu.memory_space<vmem>>, %arg5: memref<256x128xbf16, #tpu.memory_space<vmem>>, %arg6: memref<256x128xf32, #tpu.memory_space<vmem>>, %arg7: memref<256x128xf32, #tpu.memory_space<vmem>>) attributes {dimension_semantics = [#tpu.dimension_semantics<parallel>, #tpu.dimension_semantics<arbitrary>], iteration_bounds = array<i64: 1, 1>, scalar_prefetch = 0 : i64, scratch_operands = 1 : i64, tpu.core_type = #tpu.core_type<tc>, window_params = [{transform_indices = @transform_0, window_bounds = array<i64: 256, 384>}, {pipeline_mode = #tpu.pipeline_mode<synchronous>, transform_indices = @transform_1, window_bounds = array<i64: 384, 128>}, {transform_indices = @transform_2, window_bounds = array<i64: 256, 128>}, {transform_indices = @transform_3, window_bounds = array<i64: 256, 128>}, {transform_indices = @transform_4, window_bounds = array<i64: 256, 128>}]} {
    %c0_i32 = arith.constant 0 : i32
    %0 = arith.cmpi eq, %arg1, %c0_i32 : i32
    %1 = arith.extui %0 : i1 to i32
    %c0_i32_0 = arith.constant 0 : i32
    %2 = arith.cmpi ne, %1, %c0_i32_0 : i32
    scf.if %2 {
      %cst_9 = arith.constant 0.000000e+00 : f32
      %15 = vector.broadcast %cst_9 : f32 to vector<256x128xf32>
      %c0_10 = arith.constant 0 : index
      %c0_11 = arith.constant 0 : index
      %16 = vector.load %arg7[%c0_10, %c0_11] : memref<256x128xf32, #tpu.memory_space<vmem>>, vector<256x128xf32>
      tpu.vector_store %arg7[%c0_10, %c0_11], %15 {strides = array<i32>} : memref<256x128xf32, #tpu.memory_space<vmem>>, vector<256x128xf32>,
    } else {
    }
    %c384_i32 = arith.constant 384 : i32
    %3 = arith.muli %arg1, %c384_i32 : i32
    %4 = tpu.assume_multiple %3, 384 : i32
    %5 = arith.index_cast %4 : i32 to index
    %c0 = arith.constant 0 : index
    %6 = vector.load %arg3[%5, %c0] : memref<384x128xbf16, #tpu.memory_space<vmem>>, vector<384x128xbf16>
    %c0_1 = arith.constant 0 : index
    %c0_2 = arith.constant 0 : index
    %7 = vector.load %arg7[%c0_1, %c0_2] : memref<256x128xf32, #tpu.memory_space<vmem>>, vector<256x128xf32>
    %c0_3 = arith.constant 0 : index
    %c0_4 = arith.constant 0 : index
    %8 = vector.load %arg2[%c0_3, %c0_4] : memref<256x384xbf16, #tpu.memory_space<vmem>>, vector<256x384xbf16>
    %cst = arith.constant dense<0.000000e+00> : vector<256x128xf32>
    %9 = tpu.matmul %8, %6, %cst {dimension_numbers = #tpu.dot_dimension_numbers<[1], [0], [0], [1], [0, 0, 1, 1], [], []>} : vector<256x384xbf16>, vector<384x128xbf16>, vector<256x128xf32> -> vector<256x128xf32>
    %10 = arith.addf %7, %9 : vector<256x128xf32>
    %c0_5 = arith.constant 0 : index
    %c0_6 = arith.constant 0 : index
    %11 = vector.load %arg7[%c0_5, %c0_6] : memref<256x128xf32, #tpu.memory_space<vmem>>, vector<256x128xf32>
    tpu.vector_store %arg7[%c0_5, %c0_6], %10 {strides = array<i32>} : memref<256x128xf32, #tpu.memory_space<vmem>>, vector<256x128xf32>,
    %c0_i32_7 = arith.constant 0 : i32
    %12 = arith.cmpi eq, %arg1, %c0_i32_7 : i32
    %13 = arith.extui %12 : i1 to i32
    %c0_i32_8 = arith.constant 0 : i32
    %14 = arith.cmpi ne, %13, %c0_i32_8 : i32
    scf.if %14 {
      %c0_9 = arith.constant 0 : index
      %c0_10 = arith.constant 0 : index
      %15 = vector.load %arg7[%c0_9, %c0_10] : memref<256x128xf32, #tpu.memory_space<vmem>>, vector<256x128xf32>
      %16 = arith.truncf %15 : vector<256x128xf32> to vector<256x128xbf16>
      %c0_11 = arith.constant 0 : index
      %c0_12 = arith.constant 0 : index
      %17 = vector.load %arg5[%c0_11, %c0_12] : memref<256x128xbf16, #tpu.memory_space<vmem>>, vector<256x128xbf16>
      tpu.vector_store %arg5[%c0_11, %c0_12], %16 {strides = array<i32>} : memref<256x128xbf16, #tpu.memory_space<vmem>>, vector<256x128xbf16>,
      %c0_13 = arith.constant 0 : index
      %c0_14 = arith.constant 0 : index
      %18 = vector.load %arg4[%c0_13, %c0_14] : memref<256x128xf32, #tpu.memory_space<vmem>>, vector<256x128xf32>
      %19 = arith.addf %18, %15 : vector<256x128xf32>
      %c0_15 = arith.constant 0 : index
      %c0_16 = arith.constant 0 : index
      %20 = vector.load %arg6[%c0_15, %c0_16] : memref<256x128xf32, #tpu.memory_space<vmem>>, vector<256x128xf32>
      tpu.vector_store %arg6[%c0_15, %c0_16], %19 {strides = array<i32>} : memref<256x128xf32, #tpu.memory_space<vmem>>, vector<256x128xf32>,
    } else {
    }
    return
  }
  func.func @transform_0(%arg0: i32, %arg1: i32) -> (i32, i32) {
    %c0_i32 = arith.constant 0 : i32
    return %arg0, %arg1 : i32, i32
  }
  func.func @transform_1(%arg0: i32, %arg1: i32) -> (i32, i32) {
    %c0_i32 = arith.constant 0 : i32
    %c0_i32_0 = arith.constant 0 : i32
    %c0_i32_1 = arith.constant 0 : i32
    return %c0_i32, %c0_i32_0 : i32, i32
  }
  func.func @transform_2(%arg0: i32, %arg1: i32) -> (i32, i32) {
    %c0_i32 = arith.constant 0 : i32
    %c0_i32_0 = arith.constant 0 : i32
    return %arg0, %c0_i32 : i32, i32
  }
  func.func @transform_3(%arg0: i32, %arg1: i32) -> (i32, i32) {
    %c0_i32 = arith.constant 0 : i32
    %c0_i32_0 = arith.constant 0 : i32
    return %arg0, %c0_i32 : i32, i32
  }
  func.func @transform_4(%arg0: i32, %arg1: i32) -> (i32, i32) {
    %c0_i32 = arith.constant 0 : i32
    %c0_i32_0 = arith.constant 0 : i32
    return %arg0, %c0_i32 : i32, i32
  }
}

module attributes {stable_mosaic.version = 11 : i64} {
  func.func @kernel(%arg0: i32, %arg1: i32, %arg2: memref<384x256xbf16, #tpu.memory_space<vmem>>, %arg3: memref<256x128xbf16, #tpu.memory_space<vmem>>, %arg4: memref<384x128xf32, #tpu.memory_space<vmem>>, %arg5: memref<384x128xbf16, #tpu.memory_space<vmem>>, %arg6: memref<384x128xf32, #tpu.memory_space<vmem>>, %arg7: memref<384x128xf32, #tpu.memory_space<vmem>>) attributes {dimension_semantics = [#tpu.dimension_semantics<parallel>, #tpu.dimension_semantics<arbitrary>], iteration_bounds = array<i64: 1, 1>, scalar_prefetch = 0 : i64, scratch_operands = 1 : i64, tpu.core_type = #tpu.core_type<tc>, window_params = [{transform_indices = @transform_0, window_bounds = array<i64: 384, 256>}, {pipeline_mode = #tpu.pipeline_mode<synchronous>, transform_indices = @transform_1, window_bounds = array<i64: 256, 128>}, {transform_indices = @transform_2, window_bounds = array<i64: 384, 128>}, {transform_indices = @transform_3, window_bounds = array<i64: 384, 128>}, {transform_indices = @transform_4, window_bounds = array<i64: 384, 128>}]} {
    %c0_i32 = arith.constant 0 : i32
    %0 = arith.cmpi eq, %arg1, %c0_i32 : i32
    %1 = arith.extui %0 : i1 to i32
    %c0_i32_0 = arith.constant 0 : i32
    %2 = arith.cmpi ne, %1, %c0_i32_0 : i32
    scf.if %2 {
      %cst_9 = arith.constant 0.000000e+00 : f32
      %15 = vector.broadcast %cst_9 : f32 to vector<384x128xf32>
      %c0_10 = arith.constant 0 : index
      %c0_11 = arith.constant 0 : index
      %16 = vector.load %arg7[%c0_10, %c0_11] : memref<384x128xf32, #tpu.memory_space<vmem>>, vector<384x128xf32>
      tpu.vector_store %arg7[%c0_10, %c0_11], %15 {strides = array<i32>} : memref<384x128xf32, #tpu.memory_space<vmem>>, vector<384x128xf32>,
    } else {
    }
    %c256_i32 = arith.constant 256 : i32
    %3 = arith.muli %arg1, %c256_i32 : i32
    %4 = tpu.assume_multiple %3, 256 : i32
    %5 = arith.index_cast %4 : i32 to index
    %c0 = arith.constant 0 : index
    %6 = vector.load %arg3[%5, %c0] : memref<256x128xbf16, #tpu.memory_space<vmem>>, vector<256x128xbf16>
    %c0_1 = arith.constant 0 : index
    %c0_2 = arith.constant 0 : index
    %7 = vector.load %arg7[%c0_1, %c0_2] : memref<384x128xf32, #tpu.memory_space<vmem>>, vector<384x128xf32>
    %c0_3 = arith.constant 0 : index
    %c0_4 = arith.constant 0 : index
    %8 = vector.load %arg2[%c0_3, %c0_4] : memref<384x256xbf16, #tpu.memory_space<vmem>>, vector<384x256xbf16>
    %cst = arith.constant dense<0.000000e+00> : vector<384x128xf32>
    %9 = tpu.matmul %8, %6, %cst {dimension_numbers = #tpu.dot_dimension_numbers<[1], [0], [0], [1], [0, 0, 1, 1], [], []>} : vector<384x256xbf16>, vector<256x128xbf16>, vector<384x128xf32> -> vector<384x128xf32>
    %10 = arith.addf %7, %9 : vector<384x128xf32>
    %c0_5 = arith.constant 0 : index
    %c0_6 = arith.constant 0 : index
    %11 = vector.load %arg7[%c0_5, %c0_6] : memref<384x128xf32, #tpu.memory_space<vmem>>, vector<384x128xf32>
    tpu.vector_store %arg7[%c0_5, %c0_6], %10 {strides = array<i32>} : memref<384x128xf32, #tpu.memory_space<vmem>>, vector<384x128xf32>,
    %c0_i32_7 = arith.constant 0 : i32
    %12 = arith.cmpi eq, %arg1, %c0_i32_7 : i32
    %13 = arith.extui %12 : i1 to i32
    %c0_i32_8 = arith.constant 0 : i32
    %14 = arith.cmpi ne, %13, %c0_i32_8 : i32
    scf.if %14 {
      %c0_9 = arith.constant 0 : index
      %c0_10 = arith.constant 0 : index
      %15 = vector.load %arg7[%c0_9, %c0_10] : memref<384x128xf32, #tpu.memory_space<vmem>>, vector<384x128xf32>
      %16 = arith.truncf %15 : vector<384x128xf32> to vector<384x128xbf16>
      %c0_11 = arith.constant 0 : index
      %c0_12 = arith.constant 0 : index
      %17 = vector.load %arg5[%c0_11, %c0_12] : memref<384x128xbf16, #tpu.memory_space<vmem>>, vector<384x128xbf16>
      tpu.vector_store %arg5[%c0_11, %c0_12], %16 {strides = array<i32>} : memref<384x128xbf16, #tpu.memory_space<vmem>>, vector<384x128xbf16>,
      %c0_13 = arith.constant 0 : index
      %c0_14 = arith.constant 0 : index
      %18 = vector.load %arg4[%c0_13, %c0_14] : memref<384x128xf32, #tpu.memory_space<vmem>>, vector<384x128xf32>
      %19 = arith.addf %18, %15 : vector<384x128xf32>
      %c0_15 = arith.constant 0 : index
      %c0_16 = arith.constant 0 : index
      %20 = vector.load %arg6[%c0_15, %c0_16] : memref<384x128xf32, #tpu.memory_space<vmem>>, vector<384x128xf32>
      tpu.vector_store %arg6[%c0_15, %c0_16], %19 {strides = array<i32>} : memref<384x128xf32, #tpu.memory_space<vmem>>, vector<384x128xf32>,
    } else {
    }
    return
  }
  func.func @transform_0(%arg0: i32, %arg1: i32) -> (i32, i32) {
    %c0_i32 = arith.constant 0 : i32
    return %arg0, %arg1 : i32, i32
  }
  func.func @transform_1(%arg0: i32, %arg1: i32) -> (i32, i32) {
    %c0_i32 = arith.constant 0 : i32
    %c0_i32_0 = arith.constant 0 : i32
    %c0_i32_1 = arith.constant 0 : i32
    return %c0_i32, %c0_i32_0 : i32, i32
  }
  func.func @transform_2(%arg0: i32, %arg1: i32) -> (i32, i32) {
    %c0_i32 = arith.constant 0 : i32
    %c0_i32_0 = arith.constant 0 : i32
    return %arg0, %c0_i32 : i32, i32
  }
  func.func @transform_3(%arg0: i32, %arg1: i32) -> (i32, i32) {
    %c0_i32 = arith.constant 0 : i32
    %c0_i32_0 = arith.constant 0 : i32
    return %arg0, %c0_i32 : i32, i32
  }
  func.func @transform_4(%arg0: i32, %arg1: i32) -> (i32, i32) {
    %c0_i32 = arith.constant 0 : i32
    %c0_i32_0 = arith.constant 0 : i32
    return %arg0, %c0_i32 : i32, i32
  }
}

module attributes {stable_mosaic.version = 11 : i64} {
  func.func @_score_kernel(%arg0: i32, %arg1: memref<128x128xf32, #tpu.memory_space<vmem>>, %arg2: memref<128x128xf32, #tpu.memory_space<vmem>>, %arg3: memref<128x128xf32, #tpu.memory_space<vmem>>, %arg4: memref<1x128xf32, #tpu.memory_space<vmem>>, %arg5: memref<1x128xf32, #tpu.memory_space<vmem>>) attributes {dimension_semantics = [#tpu.dimension_semantics<parallel>], iteration_bounds = array<i64: 1>, scalar_prefetch = 0 : i64, scratch_operands = 0 : i64, tpu.core_type = #tpu.core_type<tc>, window_params = [{transform_indices = @transform_0, window_bounds = array<i64: 128, 128>}, {transform_indices = @transform_1, window_bounds = array<i64: 128, 128>}, {transform_indices = @transform_2, window_bounds = array<i64: 128, 128>}, {transform_indices = @transform_3, window_bounds = array<i64: 1, 128>}, {transform_indices = @transform_4, window_bounds = array<i64: 1, 128>}]} {
    %c0 = arith.constant 0 : index
    %c0_0 = arith.constant 0 : index
    %0 = vector.load %arg1[%c0, %c0_0] : memref<128x128xf32, #tpu.memory_space<vmem>>, vector<128x128xf32>
    %c0_1 = arith.constant 0 : index
    %c0_2 = arith.constant 0 : index
    %1 = vector.load %arg2[%c0_1, %c0_2] : memref<128x128xf32, #tpu.memory_space<vmem>>, vector<128x128xf32>
    %2 = arith.mulf %0, %1 : vector<128x128xf32>
    %cst = arith.constant dense<0.000000e+00> : vector<128xf32>
    %3 = vector.multi_reduction <add>, %2, %cst [1] : vector<128x128xf32> to vector<128xf32>
    %4 = vector.shape_cast %3 : vector<128xf32> to vector<1x128xf32>
    %c0_3 = arith.constant 0 : index
    %c0_4 = arith.constant 0 : index
    %5 = vector.load %arg4[%c0_3, %c0_4] : memref<1x128xf32, #tpu.memory_space<vmem>>, vector<1x128xf32>
    tpu.vector_store %arg4[%c0_3, %c0_4], %4 {strides = array<i32>} : memref<1x128xf32, #tpu.memory_space<vmem>>, vector<1x128xf32>,
    %c0_5 = arith.constant 0 : index
    %c0_6 = arith.constant 0 : index
    %6 = vector.load %arg3[%c0_5, %c0_6] : memref<128x128xf32, #tpu.memory_space<vmem>>, vector<128x128xf32>
    %7 = arith.mulf %0, %6 : vector<128x128xf32>
    %cst_7 = arith.constant dense<0.000000e+00> : vector<128xf32>
    %8 = vector.multi_reduction <add>, %7, %cst_7 [1] : vector<128x128xf32> to vector<128xf32>
    %9 = vector.shape_cast %8 : vector<128xf32> to vector<1x128xf32>
    %c0_8 = arith.constant 0 : index
    %c0_9 = arith.constant 0 : index
    %10 = vector.load %arg5[%c0_8, %c0_9] : memref<1x128xf32, #tpu.memory_space<vmem>>, vector<1x128xf32>
    tpu.vector_store %arg5[%c0_8, %c0_9], %9 {strides = array<i32>} : memref<1x128xf32, #tpu.memory_space<vmem>>, vector<1x128xf32>,
    return
  }
  func.func @transform_0(%arg0: i32) -> (i32, i32) {
    %c0_i32 = arith.constant 0 : i32
    %c0_i32_0 = arith.constant 0 : i32
    return %arg0, %c0_i32 : i32, i32
  }
  func.func @transform_1(%arg0: i32) -> (i32, i32) {
    %c0_i32 = arith.constant 0 : i32
    %c0_i32_0 = arith.constant 0 : i32
    return %arg0, %c0_i32 : i32, i32
  }
  func.func @transform_2(%arg0: i32) -> (i32, i32) {
    %c0_i32 = arith.constant 0 : i32
    %c0_i32_0 = arith.constant 0 : i32
    return %arg0, %c0_i32 : i32, i32
  }
  func.func @transform_3(%arg0: i32) -> (i32, i32) {
    %c0_i32 = arith.constant 0 : i32
    %c0_i32_0 = arith.constant 0 : i32
    return %c0_i32, %arg0 : i32, i32
  }
  func.func @transform_4(%arg0: i32) -> (i32, i32) {
    %c0_i32 = arith.constant 0 : i32
    %c0_i32_0 = arith.constant 0 : i32
    return %c0_i32, %arg0 : i32, i32
  }
}

</mosaic_0001>

<bundles_post_ra>
// kernel: fwd.7
= control target key start
LH: loop header
LB: loop body
LE: loop exit
PB: predicated region body
PF: predicated region fallthrough
CT: control target
= control target key end

     0   :  { %s2324_s0 = inlined_call_operand.vmem [shape: bf16[256,384], index: 0, kind: input, shape index: {}]   ;;  %s2325_s1 = inlined_call_operand.vmem [shape: bf16[384,128], index: 1, kind: input, shape index: {}]   ;;  %s2326_s2 = inlined_call_operand.vmem [shape: f32[256,128], index: 2, kind: input, shape index: {}, may-alias: {2,4}]   ;;  %s2327_s3 = inlined_call_operand.hbm [shape: bf16[256,128], index: 3, kind: output, shape index: {0}]   ;;  %s2328_s4 = inlined_call_operand.vmem [shape: f32[256,128], index: 4, kind: output, shape index: {1}, may-alias: {2,4}]  }
   0x1   :  { %v1736_v0 = vld [vmem:[%s2325_s1 + $0x78] sm:$0xff]   ;;  %v1738_v2 = vld [vmem:[%s2325_s1 + $0x70] sm:$0xff]   ;;  %v1740_v4 = vld [vmem:[%s2325_s1 + $0x68] sm:$0xff]  }
   0x2   :  { %v1737_v1 = vld [vmem:[%s2325_s1 + $0x38] sm:$0xff]   ;;  %1533 = vmatprep.subr.bf16.mxu0 %v1736_v0  ;;  %1717 = vmatprep.subr.bf16.mxu1 %v1736_v0  ;;  %v1739_v3 = vld [vmem:[%s2325_s1 + $0x30] sm:$0xff]   ;;  %v1741_v5 = vld [vmem:[%s2325_s1 + $0x28] sm:$0xff]  }
   0x3   :  { %1534 = vmatpush3.bf16.msra.mxu0 %v1737_v1  ;;  %1725 = vmatpush3.bf16.msra.mxu1 %v1737_v1  ;;  %v1742_v6 = vld [vmem:[%s2325_s1 + $0x60] sm:$0xff]   ;;  %v1744_v8 = vld [vmem:[%s2325_s1 + $0x58] sm:$0xff]   ;;  %v1746_v10 = vld [vmem:[%s2325_s1 + $0x50] sm:$0xff]  }
   0x4   :  { %1535 = vmatprep.subr.bf16.mxu0 %v1738_v2  ;;  %1718 = vmatprep.subr.bf16.mxu1 %v1738_v2  ;;  %v1743_v7 = vld [vmem:[%s2325_s1 + $0x20] sm:$0xff]   ;;  %v1745_v9 = vld [vmem:[%s2325_s1 + $0x18] sm:$0xff]   ;;  %v1747_v13 = vld [vmem:[%s2325_s1 + $0x10] sm:$0xff]  }
   0x5   :  { %v1754_v11 = vld [vmem:[%s2324_s0 + $0x4] ss:$12 sps:$4 sm:$0xff]   ;;  %v1748_v14 = vld [vmem:[%s2325_s1 + $0x48] sm:$0xff]   ;;  %v1758_v18 = vld [vmem:[%s2325_s1 + $0xb8] sm:$0xff]  }
   0x6   :  { %v1757_v12 = vld [vmem:[%s2324_s0 + $0x124] ss:$12 sps:$4 sm:$0xff]   ;;  %635 = vmatprep.mubr.bf16.mxu0 %v1754_v11  ;;  %v1749_v15 = vld [vmem:[%s2325_s1 + $0x8] sm:$0xff]   ;;  %v1768_v28 = vld [vmem:[%s2324_s0 + $0x34] ss:$12 sps:$4 sm:$0xff]  }
   0x7   :  { %1536 = vmatpush3.bf16.msra.mxu0 %v1739_v3  ;;  %1726 = vmatpush3.bf16.msra.mxu1 %v1739_v3  ;;  %v1750_v16 = vld [vmem:[%s2325_s1 + $0x40] sm:$0xff]   ;;  %v1760_v21 = vld [vmem:[%s2324_s0 + $0x1c] ss:$12 sps:$4 sm:$0xff]   ;;  %v1759_v22 = vld [vmem:[%s2325_s1 + $0xb0] sm:$0xff]  }
   0x8   :  { %1537 = vmatprep.subr.bf16.mxu0 %v1740_v4  ;;  %1719 = vmatprep.subr.bf16.mxu1 %v1740_v4  ;;  %v1751_v17 = vld [vmem:[%s2325_s1] sm:$0xff]   ;;  %v1762_v23 = vld [vmem:[%s2324_s0 + $0x13c] ss:$12 sps:$4 sm:$0xff]   ;;  %v1775_v33 = vld [vmem:[%s2325_s1 + $0x90] sm:$0xff]  }
   0x9   :  { %731 = vmatprep.mubr.bf16.mxu1 %v1757_v12  ;;  %v1752_v19 = vld [vmem:[%s2324_s0] ss:$12 sps:$4 sm:$0xff]   ;;  %v1764_v24 = vld [vmem:[%s2324_s0 + $0x18] ss:$12 sps:$4 sm:$0xff]   ;;  %v1772_v31 = vld [vmem:[%s2324_s0 + $0x30] ss:$12 sps:$4 sm:$0xff]  }
   0xa   :  { %v1755_v20 = vld [vmem:[%s2324_s0 + $0x120] ss:$12 sps:$4 sm:$0xff]   ;;  %v1765_v26 = vld [vmem:[%s2324_s0 + $0x138] ss:$12 sps:$4 sm:$0xff]   ;;  %v1773_v32 = vld [vmem:[%s2324_s0 + $0x150] ss:$12 sps:$4 sm:$0xff]  }
   0xb   :  { %1538 = vmatpush3.bf16.msra.mxu0 %v1741_v5  ;;  %1727 = vmatpush3.bf16.msra.mxu1 %v1741_v5  ;;  %v1766_v25 = vld [vmem:[%s2325_s1 + $0xa8] sm:$0xff]   ;;  %v1767_v27 = vld [vmem:[%s2325_s1 + $0xa0] sm:$0xff]   ;;  %v1774_v30 = vld [vmem:[%s2325_s1 + $0x98] sm:$0xff]  }
   0xc   :  { %1539 = vmatprep.subr.bf16.mxu0 %v1742_v6  ;;  %1720 = vmatprep.subr.bf16.mxu1 %v1742_v6  ;;  %v1770_v29 = vld [vmem:[%s2324_s0 + $0x154] ss:$12 sps:$4 sm:$0xff]   ;;  %v1776_v34 = vld [vmem:[%s2324_s0 + $0x4c] ss:$12 sps:$4 sm:$0xff]   ;;  %v1784_v39 = vld [vmem:[%s2324_s0 + $0x64] ss:$12 sps:$4 sm:$0xff]  }
   0xd   :  { %v1778_v35 = vld [vmem:[%s2324_s0 + $0x16c] ss:$12 sps:$4 sm:$0xff]   ;;  %v1780_v37 = vld [vmem:[%s2324_s0 + $0x48] ss:$12 sps:$4 sm:$0xff]   ;;  %v1783_v40 = vld [vmem:[%s2325_s1 + $0x80] sm:$0xff]  }
   0xe   :  { %v1782_v36 = vld [vmem:[%s2325_s1 + $0x88] sm:$0xff]  }
   0xf   :  { %1540 = vmatpush3.bf16.msra.mxu0 %v1743_v7  ;;  %1728 = vmatpush3.bf16.msra.mxu1 %v1743_v7  ;;  %v1781_v38 = vld [vmem:[%s2324_s0 + $0x168] ss:$12 sps:$4 sm:$0xff]  }
  0x10   :  { %1541 = vmatprep.subr.bf16.mxu0 %v1744_v8  ;;  %1721 = vmatprep.subr.bf16.mxu1 %v1744_v8  ;;  %v1786_v41 = vld [vmem:[%s2324_s0 + $0x8] ss:$12 sps:$4 sm:$0xff]  }
  0x13   :  { %1542 = vmatpush3.bf16.msra.mxu0 %v1745_v9  ;;  %1729 = vmatpush3.bf16.msra.mxu1 %v1745_v9 }
  0x14   :  { %1543 = vmatprep.subr.bf16.mxu0 %v1746_v10  ;;  %1722 = vmatprep.subr.bf16.mxu1 %v1746_v10 }
  0x17   :  { %1544 = vmatpush3.bf16.msra.mxu0 %v1747_v13  ;;  %1730 = vmatpush3.bf16.msra.mxu1 %v1747_v13 }
  0x18   :  { %1545 = vmatprep.subr.bf16.mxu0 %v1748_v14  ;;  %1723 = vmatprep.subr.bf16.mxu1 %v1748_v14 }
  0x1b   :  { %1546 = vmatpush3.bf16.msra.mxu0 %v1749_v15  ;;  %1731 = vmatpush3.bf16.msra.mxu1 %v1749_v15 }
  0x1c   :  { %1547 = vmatprep.subr.bf16.mxu0 %v1750_v16  ;;  %1724 = vmatprep.subr.bf16.mxu1 %v1750_v16 }
  0x1f   :  { %1548 = vmatpush3.bf16.msra.mxu0 %v1751_v17  ;;  %1732 = vmatpush3.bf16.msra.mxu1 %v1751_v17 }
  0x20   :  { %1669 = vmatprep.subr.bf16.mxu1 %v1758_v18 }
  0x22   :  { %636 = vmatmul.mubr.bf16.vlgmr.msra.gmra.mxu0 %v1752_v19  ;;  %732 = vmatmul.mubr.bf16.vlgmr.msra.gmra.mxu1 %v1755_v20 }
  0x23   :  { %1670 = vmatpush3.bf16.msra.mxu1 %v1758_v18  ;;  %643 = vmatprep.mubr.bf16.mxu0 %v1760_v21 }
  0x24   :  { %1671 = vmatprep.subr.bf16.mxu1 %v1759_v22  ;;  %739 = vmatprep.mubr.bf16.mxu1 %v1762_v23 }
  0x27   :  { %1672 = vmatpush3.bf16.msra.mxu1 %v1759_v22 }
  0x28   :  { %1673 = vmatprep.subr.bf16.mxu1 %v1766_v25 }
  0x2a   :  { %644 = vmatmul.mubr.bf16.gmra.mxu0 %v1764_v24  ;;  %740 = vmatmul.mubr.bf16.gmra.mxu1 %v1765_v26 }
  0x2b   :  { %1674 = vmatpush3.bf16.msra.mxu1 %v1766_v25  ;;  %651 = vmatprep.mubr.bf16.mxu0 %v1768_v28 }
  0x2c   :  { %1675 = vmatprep.subr.bf16.mxu1 %v1767_v27  ;;  %747 = vmatprep.mubr.bf16.mxu1 %v1770_v29 }
  0x2f   :  { %1676 = vmatpush3.bf16.msra.mxu1 %v1767_v27 }
  0x30   :  { %1677 = vmatprep.subr.bf16.mxu1 %v1774_v30 }
  0x32   :  { %652 = vmatmul.mubr.bf16.gmra.mxu0 %v1772_v31  ;;  %748 = vmatmul.mubr.bf16.gmra.mxu1 %v1773_v32 }
  0x33   :  { %1678 = vmatpush3.bf16.msra.mxu1 %v1774_v30  ;;  %659 = vmatprep.mubr.bf16.mxu0 %v1776_v34 }
  0x34   :  { %1679 = vmatprep.subr.bf16.mxu1 %v1775_v33  ;;  %755 = vmatprep.mubr.bf16.mxu1 %v1778_v35 }
  0x37   :  { %1680 = vmatpush3.bf16.msra.mxu1 %v1775_v33 }
  0x38   :  { %1681 = vmatprep.subr.bf16.mxu1 %v1782_v36 }
  0x3a   :  { %660 = vmatmul.mubr.bf16.gmra.mxu0 %v1780_v37  ;;  %756 = vmatmul.mubr.bf16.gmra.mxu1 %v1781_v38 }
  0x3b   :  { %1682 = vmatpush3.bf16.msra.mxu1 %v1782_v36  ;;  %667 = vmatprep.mubr.bf16.mxu0 %v1784_v39 }
  0x3c   :  { %1683 = vmatprep.subr.bf16.mxu1 %v1783_v40  ;;  %1685 = vmatprep.mubr.bf16.mxu1 %v1786_v41 }
  0x3d   :  { %10 = vsyncpa [#allocation4], 0  ;;  %v1787_v42 = vld [vmem:[%s2324_s0 + $0x60] ss:$12 sps:$4 sm:$0xff]   ;;  %v1789_v44 = vld [vmem:[%s2324_s0 + $0x7c] ss:$12 sps:$4 sm:$0xff]  }
  0x3e   :  { %v1788_v43 = vld [vmem:[%s2324_s0 + $0x20] ss:$12 sps:$4 sm:$0xff]   ;;  %v1791_v45 = vld [vmem:[%s2324_s0 + $0x38] ss:$12 sps:$4 sm:$0xff]   ;;  %v1793_v47 = vld [vmem:[%s2324_s0 + $0x50] ss:$12 sps:$4 sm:$0xff]  }
  0x3f   :  { %1684 = vmatpush3.bf16.msra.mxu1 %v1783_v40  ;;  %v1792_v46 = vld [vmem:[%s2324_s0 + $0x78] ss:$12 sps:$4 sm:$0xff]   ;;  %v1794_v48 = vld [vmem:[%s2324_s0 + $0x94] ss:$12 sps:$4 sm:$0xff]   ;;  %v1797_v50 = vld [vmem:[%s2324_s0 + $0x90] ss:$12 sps:$4 sm:$0xff]  }
  0x40   :  { %v1796_v49 = vld [vmem:[%s2324_s0 + $0x68] ss:$12 sps:$4 sm:$0xff]   ;;  %v1798_v51 = vld [vmem:[%s2324_s0 + $0x80] ss:$12 sps:$4 sm:$0xff]   ;;  %v1801_v53 = vld [vmem:[%s2324_s0 + $0x98] ss:$12 sps:$4 sm:$0xff]  }
  0x41   :  { %v1799_v52 = vld [vmem:[%s2324_s0 + $0xac] ss:$12 sps:$4 sm:$0xff]   ;;  %v1802_v54 = vld [vmem:[%s2324_s0 + $0xa8] ss:$12 sps:$4 sm:$0xff]   ;;  %v1803_v55 = vld [vmem:[%s2324_s0 + $0xb0] ss:$12 sps:$4 sm:$0xff]  }
  0x42   :  { %668 = vmatmul.mubr.bf16.gmra.mxu0 %v1787_v42  ;;  %1686 = vmatmul.mubr.bf16.vlgmr.msra.gmra.mxu1 %v1788_v43  ;;  %v1804_v56 = vld [vmem:[%s2324_s0 + $0xc4] ss:$12 sps:$4 sm:$0xff]   ;;  %v1806_v57 = vld [vmem:[%s2324_s0 + $0xc8] ss:$12 sps:$4 sm:$0xff]   ;;  %v1807_v58 = vld [vmem:[%s2324_s0 + $0xc0] ss:$12 sps:$4 sm:$0xff]  }
  0x43   :  { %675 = vmatprep.mubr.bf16.mxu0 %v1789_v44  ;;  %1689 = vmatprep.mubr.bf16.mxu1 %v1791_v45  ;;  %v1808_v59 = vld [vmem:[%s2324_s0 + $0xe0] ss:$12 sps:$4 sm:$0xff]   ;;  %v1809_v60 = vld [vmem:[%s2324_s0 + $0xdc] ss:$12 sps:$4 sm:$0xff]   ;;  %v1811_v61 = vld [vmem:[%s2324_s0 + $0xf8] ss:$12 sps:$4 sm:$0xff]  }
  0x44   :  { %v1812_v62 = vld [vmem:[%s2324_s0 + $0xd8] ss:$12 sps:$4 sm:$0xff]   ;;  %v1813_v63 = vld [vmem:[%s2324_s0 + $0x110] ss:$12 sps:$4 sm:$0xff]   ;;  %v1814_v0 = vld [vmem:[%s2324_s0 + $0xf4] ss:$12 sps:$4 sm:$0xff]  }
  0x45   :  { %v1816_v1 = vld [vmem:[%s2324_s0 + $0x128] ss:$12 sps:$4 sm:$0xff]   ;;  %v1817_v2 = vld [vmem:[%s2324_s0 + $0xf0] ss:$12 sps:$4 sm:$0xff]   ;;  %v1818_v3 = vld [vmem:[%s2324_s0 + $0x140] ss:$12 sps:$4 sm:$0xff]  }
  0x46   :  { %v1819_v4 = vld [vmem:[%s2324_s0 + $0x10c] ss:$12 sps:$4 sm:$0xff]   ;;  %v1822_v6 = vld [vmem:[%s2324_s0 + $0x108] ss:$12 sps:$4 sm:$0xff]   ;;  %v1823_v7 = vld [vmem:[%s2324_s0 + $0x170] ss:$12 sps:$4 sm:$0xff]  }
  0x47   :  { %v1821_v5 = vld [vmem:[%s2324_s0 + $0x158] ss:$12 sps:$4 sm:$0xff]   ;;  %s1846_s7 = smov [#allocation3]  }
  0x48   :  { %s1285_s8 = sshll.u32 %s1846_s7, 4  ;;  %s1286_s8 = int_to_ptr.vmem [resolvable:$true] %s1285_s8 }
  0x49   :  { %s1824_s16 = scalar_lea.vmem %s1286_s8, 2048  ;;  %p1829_p1 = scmp.lt.s32.totalorder %s1286_s8, %s1286_s8 }
  0x4a   :  { %676 = vmatmul.mubr.bf16.gmra.mxu0 %v1792_v46  ;;  %1690 = vmatmul.mubr.bf16.gmra.mxu1 %v1793_v47  ;;  %p1825_p0 = scmp.ne.s32.totalorder %s1286_s8, %s1824_s16  ;;  %p1830_p2 = scmp.lt.s32.totalorder %s1824_s16, %s1824_s16 }
  0x4b   :  { %683 = vmatprep.mubr.bf16.mxu0 %v1794_v48  ;;  %1693 = vmatprep.mubr.bf16.mxu1 %v1796_v49  ;;  %v1186_v49 = vld [vmem:[%s2326_s2 + $0x10] sm:$0xff] }
  0x4c   :  { %p1831_p3 = por %p1830_p2, %p1829_p1 }
  0x4e   :  { %p1832_p4 = pnand %p1831_p3, %p1825_p0 }
  0x52   :  { %684 = vmatmul.mubr.bf16.gmra.mxu0 %v1797_v50  ;;  %1694 = vmatmul.mubr.bf16.gmra.mxu1 %v1798_v51 }
  0x53   :  { %691 = vmatprep.mubr.bf16.mxu0 %v1799_v52  ;;  %1697 = vmatprep.mubr.bf16.mxu1 %v1801_v53 }
  0x5a   :  { %692 = vmatmul.mubr.bf16.gmra.mxu0 %v1802_v54  ;;  %1698 = vmatmul.mubr.bf16.gmra.mxu1 %v1803_v55  ;;  %v1184_v54 = vld [vmem:[%s2326_s2] sm:$0xff] }
  0x5b   :  { %699 = vmatprep.mubr.bf16.mxu0 %v1804_v56  ;;  %1701 = vmatprep.mubr.bf16.mxu1 %v1806_v57 }
  0x62   :  { %700 = vmatmul.mubr.bf16.gmra.mxu0 %v1807_v58  ;;  %1702 = vmatmul.mubr.bf16.gmra.mxu1 %v1808_v59 }
  0x63   :  { %707 = vmatprep.mubr.bf16.mxu0 %v1809_v60  ;;  %1705 = vmatprep.mubr.bf16.mxu1 %v1811_v61  ;;  %v1187_v60 = vld [vmem:[%s2326_s2 + $0x18] sm:$0xff] }
  0x6a   :  { %708 = vmatmul.mubr.bf16.gmra.mxu0 %v1812_v62  ;;  %1706 = vmatmul.mubr.bf16.gmra.mxu1 %v1813_v63 }
  0x6b   :  { %715 = vmatprep.mubr.bf16.mxu0 %v1814_v0  ;;  %1709 = vmatprep.mubr.bf16.mxu1 %v1816_v1 }
  0x72   :  { %716 = vmatmul.mubr.bf16.gmra.mxu0 %v1817_v2  ;;  %1710 = vmatmul.mubr.bf16.gmra.mxu1 %v1818_v3 }
  0x73   :  { %723 = vmatprep.mubr.bf16.mxu0 %v1819_v4  ;;  %1713 = vmatprep.mubr.bf16.mxu1 %v1821_v5 }
  0x7a   :  { %724 = vmatmul.mubr.bf16.gmra.mxu0 %v1822_v6  ;;  %1714 = vmatmul.mubr.bf16.gmra.mxu1 %v1823_v7 }
  0xe2   :  { %v1549_v8 = vpop.f32.mrf.mxu0  ;;  %v1621_v9 = vpop.f32.mrf.mxu1 }
  0xe4   :  { %v1550_v10 = vpop.f32.mrf.mxu0  ;;  %v1622_v11 = vpop.f32.mrf.mxu1 }
  0xe5   :  { %v2090_v12 = vadd.f32 %v1622_v11, %v1621_v9  ;;  %v1551_v50 = vadd.f32 %v1550_v10, %v1549_v8 }
  0xe6   :  { %v1552_v13 = vpop.f32.mrf.mxu0  ;;  %v1624_v14 = vpop.f32.mrf.mxu1 }
  0xe8   :  { %v1553_v15 = vpop.f32.mrf.mxu0  ;;  %v1625_v16 = vpop.f32.mrf.mxu1 }
  0xe9   :  { %v2092_v17 = vadd.f32 %v1625_v16, %v1624_v14  ;;  %v1554_v61 = vadd.f32 %v1553_v15, %v1552_v13 }
  0xea   :  { %v1555_v18 = vpop.f32.mrf.mxu0  ;;  %v1627_v19 = vpop.f32.mrf.mxu1 }
  0xec   :  { %v1556_v20 = vpop.f32.mrf.mxu0  ;;  %v1628_v21 = vpop.f32.mrf.mxu1 }
  0xed   :  { %v2094_v22 = vadd.f32 %v1628_v21, %v1627_v19  ;;  %v1557_v46 = vadd.f32 %v1556_v20, %v1555_v18 }
  0xee   :  { %v1558_v23 = vpop.f32.mrf.mxu0  ;;  %v1630_v24 = vpop.f32.mrf.mxu1 }
  0xf0   :  { %v1559_v25 = vpop.f32.mrf.mxu0  ;;  %v1631_v26 = vpop.f32.mrf.mxu1 }
  0xf1   :  { %v2096_v27 = vadd.f32 %v1631_v26, %v1630_v24  ;;  %v1560_v55 = vadd.f32 %v1559_v25, %v1558_v23 }
  0xf2   :  { %v1561_v28 = vpop.f32.mrf.mxu0  ;;  %v1633_v29 = vpop.f32.mrf.mxu1 }
  0xf4   :  { %v1562_v30 = vpop.f32.mrf.mxu0  ;;  %v1634_v31 = vpop.f32.mrf.mxu1 }
  0xf5   :  { %v2098_v32 = vadd.f32 %v1634_v31, %v1633_v29  ;;  %v1563_v10 = vadd.f32 %v1562_v30, %v1561_v28 }
  0xf6   :  { %v1564_v33 = vpop.f32.mrf.mxu0  ;;  %v1636_v34 = vpop.f32.mrf.mxu1 }
  0xf8   :  { %v1565_v35 = vpop.f32.mrf.mxu0  ;;  %v1637_v36 = vpop.f32.mrf.mxu1 }
  0xf9   :  { %v2100_v37 = vadd.f32 %v1637_v36, %v1636_v34  ;;  %v1566_v26 = vadd.f32 %v1565_v35, %v1564_v33 }
  0xfa   :  { %v1567_v38 = vpop.f32.mrf.mxu0  ;;  %v2102_v39 = vpop.f32.mrf.mxu1 }
  0xfc   :  { %v1568_v40 = vpop.f32.mrf.mxu0  ;;  %v2104_v41 = vpop.f32.mrf.mxu1 }
  0xfd   :  { %v1569_v3 = vadd.f32 %v1568_v40, %v1567_v38 }
  0xfe   :  { %v1570_v42 = vpop.f32.mrf.mxu0  ;;  %v2106_v43 = vpop.f32.mrf.mxu1 }
 0x100   :  { %v1571_v44 = vpop.f32.mrf.mxu0  ;;  %v2108_v45 = vpop.f32.mrf.mxu1 }
 0x101   :  { %v1572_v19 = vadd.f32 %v1571_v44, %v1570_v42 }
 0x102   :  { %v1573_v47 = vpop.f32.mrf.mxu0  ;;  %v1687_v48 = vpop.f32.mrf.mxu1 }
 0x103   :  { %v807_v51 = vadd.f32 %v1687_v48, %v1557_v46 }
 0x104   :  { %v1574_v52 = vpop.f32.mrf.mxu0  ;;  %v798_v53 = vpop.f32.mrf.mxu1 }
 0x105   :  { %v1218_v56 = vadd.f32 %v1186_v49, %v807_v51  ;;  %v799_v57 = vadd.f32 %v1551_v50, %v798_v53  ;;  %v1575_v46 = vadd.f32 %v1574_v52, %v1573_v47 }
 0x106   :  { %v2116_v58 = vpop.f32.mrf.mxu0  ;;  %v1688_v59 = vpop.f32.mrf.mxu1 }
 0x107   :  { %1250 = vst [vmem:[%s2328_s4 + $0x10] sm:$0xff] %v1218_v56  ;;  %v1216_v62 = vadd.f32 %v1184_v54, %v799_v57  ;;  %v810_v63 = vadd.f32 %v1688_v59, %v1560_v55 }
 0x108   :  { %v1577_v0 = vpop.f32.mrf.mxu0  ;;  %v801_v1 = vpop.f32.mrf.mxu1 }
 0x109   :  { %v1446_v4 = vpack.c.bf16 %v810_v63, %v807_v51  ;;  %v1219_v5 = vadd.f32 %v1187_v60, %v810_v63  ;;  %v802_v6 = vadd.f32 %v1554_v61, %v801_v1  ;;  %v1578_v60 = vadd.f32 %v1577_v0, %v2116_v58 }
 0x10a   :  { %v1579_v7 = vpop.f32.mrf.mxu0  ;;  %v1691_v8 = vpop.f32.mrf.mxu1 }
 0x10b   :  { %1518 = vst [vmem:[#allocation3 + $0x8] sm:$0xff] %v1446_v4   ;;  %v1441_v11 = vpack.c.bf16 %v802_v6, %v799_v57  ;;  %v823_v14 = vadd.f32 %v1691_v8, %v1569_v3 }
 0x10c   :  { %v1580_v15 = vpop.f32.mrf.mxu0  ;;  %v814_v16 = vpop.f32.mrf.mxu1 }
 0x10d   :  { %1442 = vst [vmem:[#allocation3] sm:$0xff] %v1441_v11   ;;  %v815_v21 = vadd.f32 %v1563_v10, %v814_v16  ;;  %v1581_v36 = vadd.f32 %v1580_v15, %v1579_v7 }
 0x10e   :  { %v1185_v2 = vld [vmem:[%s2326_s2 + $0x8] sm:$0xff]  ;;  %v1582_v23 = vpop.f32.mrf.mxu0  ;;  %v1692_v24 = vpop.f32.mrf.mxu1 }
 0x10f   :  { %1248 = vst [vmem:[%s2328_s4] sm:$0xff] %v1216_v62  ;;  %v1217_v13 = vadd.f32 %v1185_v2, %v802_v6  ;;  %v826_v29 = vadd.f32 %v1692_v24, %v1572_v19 }
 0x110   :  { %v1583_v30 = vpop.f32.mrf.mxu0  ;;  %v817_v31 = vpop.f32.mrf.mxu1 }
 0x111   :  { %v1456_v38 = vpack.c.bf16 %v826_v29, %v823_v14  ;;  %v818_v33 = vadd.f32 %v1566_v26, %v817_v31  ;;  %v1584_v55 = vadd.f32 %v1583_v30, %v1582_v23 }
 0x112   :  { %v1585_v35 = vpop.f32.mrf.mxu0  ;;  %v1695_v42 = vpop.f32.mrf.mxu1 }
 0x113   :  { %1520 = vst [vmem:[#allocation3 + $0x18] sm:$0xff] %v1456_v38   ;;  %v1451_v48 = vpack.c.bf16 %v818_v33, %v815_v21  ;;  %v839_v50 = vadd.f32 %v1695_v42, %v1581_v36 }
 0x114   :  { %v1586_v51 = vpop.f32.mrf.mxu0  ;;  %v830_v53 = vpop.f32.mrf.mxu1 }
 0x115   :  { %1519 = vst [vmem:[#allocation3 + $0x10] sm:$0xff] %v1451_v48   ;;  %v831_v52 = vadd.f32 %v1575_v46, %v830_v53  ;;  %v1587_v6 = vadd.f32 %v1586_v51, %v1585_v35 }
 0x116   :  { %v1190_v9 = vld [vmem:[%s2326_s2 + $0x30] sm:$0xff]  ;;  %v1588_v56 = vpop.f32.mrf.mxu0  ;;  %v1696_v57 = vpop.f32.mrf.mxu1 }
 0x117   :  { %1251 = vst [vmem:[%s2328_s4 + $0x18] sm:$0xff] %v1219_v5  ;;  %v1222_v20 = vadd.f32 %v1190_v9, %v823_v14  ;;  %v842_v62 = vadd.f32 %v1696_v57, %v1584_v55 }
 0x118   :  { %v1589_v63 = vpop.f32.mrf.mxu0  ;;  %v833_v1 = vpop.f32.mrf.mxu1 }
 0x119   :  { %v1466_v3 = vpack.c.bf16 %v842_v62, %v839_v50  ;;  %v834_v5 = vadd.f32 %v1578_v60, %v833_v1  ;;  %v1590_v19 = vadd.f32 %v1589_v63, %v1588_v56 }
 0x11a   :  { %v1591_v58 = vpop.f32.mrf.mxu0  ;;  %v1699_v0 = vpop.f32.mrf.mxu1 }
 0x11b   :  { %1522 = vst [vmem:[#allocation3 + $0x28] sm:$0xff] %v1466_v3   ;;  %v1461_v7 = vpack.c.bf16 %v834_v5, %v831_v52 }
 0x11c   :  { %v1592_v9 = vpop.f32.mrf.mxu0  ;;  %v846_v10 = vpop.f32.mrf.mxu1 }
 0x11d   :  { %1521 = vst [vmem:[#allocation3 + $0x20] sm:$0xff] %v1461_v7   ;;  %v847_v14 = vadd.f32 %v1587_v6, %v846_v10 }
 0x11e   :  { %v1188_v18 = vld [vmem:[%s2326_s2 + $0x20] sm:$0xff]  ;;  %v1594_v16 = vpop.f32.mrf.mxu0 }
 0x11f   :  { %1249 = vst [vmem:[%s2328_s4 + $0x8] sm:$0xff] %v1217_v13  ;;  %v1220_v28 = vadd.f32 %v1188_v18, %v815_v21  ;;  %v1593_v13 = vadd.f32 %v1592_v9, %v1591_v58  ;;  %v1700_v18 = vpop.f32.mrf.mxu1 }
 0x120   :  { %v1595_v23 = vpop.f32.mrf.mxu0 }
 0x121   :  { %v849_v24 = vpop.f32.mrf.mxu1 }
 0x122   :  { %v1597_v31 = vpop.f32.mrf.mxu0 }
 0x126   :  { %v1191_v25 = vld [vmem:[%s2326_s2 + $0x38] sm:$0xff] }
 0x127   :  { %1254 = vst [vmem:[%s2328_s4 + $0x30] sm:$0xff] %v1222_v20  ;;  %v1223_v40 = vadd.f32 %v1191_v25, %v826_v29  ;;  %v855_v20 = vadd.f32 %v1699_v0, %v1593_v13  ;;  %v850_v29 = vadd.f32 %v1590_v19, %v849_v24 }
 0x129   :  { %v1471_v38 = vpack.c.bf16 %v850_v29, %v847_v14 }
 0x12b   :  { %1523 = vst [vmem:[#allocation3 + $0x30] sm:$0xff] %v1471_v38  }
 0x12e   :  { %v1189_v34 = vld [vmem:[%s2326_s2 + $0x28] sm:$0xff] }
 0x12f   :  { %1252 = vst [vmem:[%s2328_s4 + $0x20] sm:$0xff] %v1220_v28  ;;  %v1221_v49 = vadd.f32 %v1189_v34, %v818_v33  ;;  %v1596_v28 = vadd.f32 %v1595_v23, %v1594_v16  ;;  %v1703_v34 = vpop.f32.mrf.mxu1  ;;  %v1598_v33 = vpop.f32.mrf.mxu0 }
 0x130   :  { %v1599_v46 = vadd.f32 %v1598_v33, %v1597_v31 }
 0x131   :  { %v858_v36 = vadd.f32 %v1700_v18, %v1596_v28  ;;  %v862_v35 = vpop.f32.mrf.mxu1 }
 0x132   :  { %v863_v51 = vadd.f32 %v1599_v46, %v862_v35 }
 0x133   :  { %v1476_v42 = vpack.c.bf16 %v858_v36, %v855_v20 }
 0x135   :  { %1524 = vst [vmem:[#allocation3 + $0x38] sm:$0xff] %v1476_v42  }
 0x136   :  { %v1194_v44 = vld [vmem:[%s2326_s2 + $0x50] sm:$0xff] }
 0x137   :  { %1255 = vst [vmem:[%s2328_s4 + $0x38] sm:$0xff] %v1223_v40  ;;  %v1226_v47 = vadd.f32 %v1194_v44, %v839_v50  ;;  %v1704_v50 = vpop.f32.mrf.mxu1 }
 0x13e   :  { %v1192_v54 = vld [vmem:[%s2326_s2 + $0x40] sm:$0xff] }
 0x13f   :  { %1253 = vst [vmem:[%s2328_s4 + $0x28] sm:$0xff] %v1221_v49  ;;  %v1224_v61 = vadd.f32 %v1192_v54, %v831_v52  ;;  %v1600_v49 = vpop.f32.mrf.mxu0  ;;  %v865_v54 = vpop.f32.mrf.mxu1 }
 0x141   :  { %v1601_v53 = vpop.f32.mrf.mxu0  ;;  %v2215_v57 = vpop.f32.mrf.mxu1 }
 0x143   :  { %v1603_v56 = vpop.f32.mrf.mxu0 }
 0x145   :  { %v1604_v60 = vpop.f32.mrf.mxu0 }
 0x146   :  { %v1195_v59 = vld [vmem:[%s2326_s2 + $0x58] sm:$0xff]  ;;  %v1605_v1 = vadd.f32 %v1604_v60, %v1603_v56 }
 0x147   :  { %1258 = vst [vmem:[%s2328_s4 + $0x50] sm:$0xff] %v1226_v47  ;;  %v1227_v4 = vadd.f32 %v1195_v59, %v842_v62  ;;  %v1602_v47 = vadd.f32 %v1601_v53, %v1600_v49  ;;  %v1606_v3 = vpop.f32.mrf.mxu0 }
 0x149   :  { %v866_v59 = vadd.f32 %v1602_v47, %v865_v54  ;;  %v1607_v58 = vpop.f32.mrf.mxu0 }
 0x14a   :  { %v1608_v7 = vadd.f32 %v1607_v58, %v1606_v3 }
 0x14b   :  { %v1481_v62 = vpack.c.bf16 %v866_v59, %v863_v51  ;;  %v1609_v9 = vpop.f32.mrf.mxu0 }
 0x14c   :  { %v874_v13 = vadd.f32 %v1704_v50, %v1608_v7 }
 0x14d   :  { %1525 = vst [vmem:[#allocation3 + $0x40] sm:$0xff] %v1481_v62  }
 0x14e   :  { %v1193_v2 = vld [vmem:[%s2326_s2 + $0x48] sm:$0xff] }
 0x14f   :  { %1256 = vst [vmem:[%s2328_s4 + $0x40] sm:$0xff] %v1224_v61  ;;  %1259 = vst [vmem:[%s2328_s4 + $0x58] sm:$0xff] %v1227_v4  ;;  %v1225_v8 = vadd.f32 %v1193_v2, %v834_v5  ;;  %v878_v61 = vpop.f32.mrf.mxu1  ;;  %v871_v5 = vadd.f32 %v1703_v34, %v1605_v1 }
 0x151   :  { %v2223_v4 = vpop.f32.mrf.mxu1  ;;  %v1486_v18 = vpack.c.bf16 %v874_v13, %v871_v5 }
 0x153   :  { %v881_v0 = vpop.f32.mrf.mxu1  ;;  %1526 = vst [vmem:[#allocation3 + $0x48] sm:$0xff] %v1486_v18  }
 0x155   :  { %v1711_v10 = vpop.f32.mrf.mxu1 }
 0x156   :  { %v1196_v11 = vld [vmem:[%s2326_s2 + $0x60] sm:$0xff] }
 0x157   :  { %1257 = vst [vmem:[%s2328_s4 + $0x48] sm:$0xff] %v1225_v8  ;;  %v1228_v21 = vadd.f32 %v1196_v11, %v847_v14  ;;  %v903_v14 = vadd.f32 %v1711_v10, %v2094_v22  ;;  %v894_v16 = vpop.f32.mrf.mxu1 }
 0x159   :  { %v1712_v28 = vpop.f32.mrf.mxu1 }
 0x15e   :  { %v1198_v15 = vld [vmem:[%s2326_s2 + $0x70] sm:$0xff]  ;;  %v1197_v25 = vld [vmem:[%s2326_s2 + $0x68] sm:$0xff] }
 0x15f   :  { %v1230_v26 = vadd.f32 %v1198_v15, %v855_v20  ;;  %1260 = vst [vmem:[%s2328_s4 + $0x60] sm:$0xff] %v1228_v21  ;;  %v1229_v40 = vadd.f32 %v1197_v25, %v850_v29  ;;  %v1610_v15 = vpop.f32.mrf.mxu0  ;;  %v895_v25 = vadd.f32 %v2090_v12, %v894_v16  ;;  %v1641_v12 = vadd.f32 %v2104_v41, %v2102_v39 }
 0x160   :  { %v1611_v21 = vadd.f32 %v1610_v15, %v1609_v9 }
 0x162   :  { %v879_v29 = vadd.f32 %v1611_v21, %v878_v61 }
 0x166   :  { %v1199_v30 = vld [vmem:[%s2326_s2 + $0x78] sm:$0xff] }
 0x167   :  { %1262 = vst [vmem:[%s2328_s4 + $0x70] sm:$0xff] %v1230_v26  ;;  %v1231_v44 = vadd.f32 %v1199_v30, %v858_v36  ;;  %1261 = vst [vmem:[%s2328_s4 + $0x68] sm:$0xff] %v1229_v40  ;;  %v1612_v26 = vpop.f32.mrf.mxu0  ;;  %v906_v30 = vadd.f32 %v1712_v28, %v2096_v27  ;;  %v897_v36 = vpop.f32.mrf.mxu1 }
 0x168   :  { %v898_v39 = vadd.f32 %v2092_v17, %v897_v36  ;;  %v1644_v17 = vadd.f32 %v2108_v45, %v2106_v43 }
 0x169   :  { %v1613_v34 = vpop.f32.mrf.mxu0  ;;  %v1506_v40 = vpack.c.bf16 %v906_v30, %v903_v14 }
 0x16a   :  { %v1614_v35 = vadd.f32 %v1613_v34, %v1612_v26  ;;  %v1501_v50 = vpack.c.bf16 %v898_v39, %v895_v25 }
 0x16b   :  { %v1615_v41 = vpop.f32.mrf.mxu0  ;;  %1530 = vst [vmem:[#allocation3 + $0x68] sm:$0xff] %v1506_v40  }
 0x16c   :  { %1529 = vst [vmem:[#allocation3 + $0x60] sm:$0xff] %v1501_v50  }
 0x16d   :  { %v1616_v53 = vpop.f32.mrf.mxu0 }
 0x16e   :  { %v1200_v48 = vld [vmem:[%s2326_s2 + $0x80] sm:$0xff]  ;;  %v1617_v56 = vadd.f32 %v1616_v53, %v1615_v41 }
 0x16f   :  { %1263 = vst [vmem:[%s2328_s4 + $0x78] sm:$0xff] %v1231_v44  ;;  %v1232_v55 = vadd.f32 %v1200_v48, %v863_v51  ;;  %v1715_v44 = vpop.f32.mrf.mxu1  ;;  %v882_v48 = vadd.f32 %v1614_v35, %v881_v0  ;;  %v1618_v60 = vpop.f32.mrf.mxu0 }
 0x170   :  { %v919_v49 = vadd.f32 %v1715_v44, %v1641_v12 }
 0x171   :  { %v910_v54 = vpop.f32.mrf.mxu1 }
 0x172   :  { %v911_v45 = vadd.f32 %v2098_v32, %v910_v54  ;;  %v1619_v32 = vpop.f32.mrf.mxu0 }
 0x173   :  { %v1716_v61 = vpop.f32.mrf.mxu1 }
 0x174   :  { %v922_v1 = vadd.f32 %v1716_v61, %v1644_v17 }
 0x175   :  { %v913_v3 = vpop.f32.mrf.mxu1 }
 0x176   :  { %v1201_v52 = vld [vmem:[%s2326_s2 + $0x88] sm:$0xff]  ;;  %v1516_v58 = vpack.c.bf16 %v922_v1, %v919_v49 }
 0x177   :  { %1264 = vst [vmem:[%s2328_s4 + $0x80] sm:$0xff] %v1232_v55  ;;  %v1233_v63 = vadd.f32 %v1201_v52, %v866_v59  ;;  %v1491_v55 = vpack.c.bf16 %v882_v48, %v879_v29 }
 0x178   :  { %1532 = vst [vmem:[#allocation3 + $0x78] sm:$0xff] %v1516_v58  }
 0x179   :  { %1527 = vst [vmem:[#allocation3 + $0x50] sm:$0xff] %v1491_v55  }
 0x17e   :  { %v1202_v2 = vld [vmem:[%s2326_s2 + $0x90] sm:$0xff] }
 0x17f   :  { %1265 = vst [vmem:[%s2328_s4 + $0x88] sm:$0xff] %v1233_v63  ;;  %v1234_v6 = vadd.f32 %v1202_v2, %v871_v5  ;;  %v887_v63 = vadd.f32 %v2215_v57, %v1617_v56 }
 0x186   :  { %v1203_v8 = vld [vmem:[%s2326_s2 + $0x98] sm:$0xff]  ;;  %v1210_v11 = vld [vmem:[%s2326_s2 + $0xd0] sm:$0xff] }
 0x187   :  { %1266 = vst [vmem:[%s2328_s4 + $0x90] sm:$0xff] %v1234_v6  ;;  %v1235_v19 = vadd.f32 %v1203_v8, %v874_v13  ;;  %v1242_v20 = vadd.f32 %v1210_v11, %v903_v14  ;;  %v1620_v6 = vadd.f32 %v1619_v32, %v1618_v60  ;;  %v914_v8 = vadd.f32 %v2100_v37, %v913_v3 }
 0x189   :  { %v890_v9 = vadd.f32 %v2223_v4, %v1620_v6  ;;  %v1511_v10 = vpack.c.bf16 %v914_v8, %v911_v45 }
 0x18b   :  { %v1496_v13 = vpack.c.bf16 %v890_v9, %v887_v63  ;;  %1531 = vst [vmem:[#allocation3 + $0x70] sm:$0xff] %v1511_v10  }
 0x18d   :  { %1528 = vst [vmem:[#allocation3 + $0x58] sm:$0xff] %v1496_v13  }
 0x18e   :  { %v1208_v23 = vld [vmem:[%s2326_s2 + $0xc0] sm:$0xff]  ;;  %v1211_v22 = vld [vmem:[%s2326_s2 + $0xd8] sm:$0xff] }
 0x18f   :  { %v1204_v24 = vld [vmem:[%s2326_s2 + $0xa0] sm:$0xff]  ;;  %v1240_v31 = vadd.f32 %v1208_v23, %v895_v25  ;;  %v1243_v33 = vadd.f32 %v1211_v22, %v906_v30 }
 0x190   :  { %1267 = vst [vmem:[%s2328_s4 + $0x98] sm:$0xff] %v1235_v19  ;;  %1274 = vst [vmem:[%s2328_s4 + $0xd0] sm:$0xff] %v1242_v20  ;;  %v1236_v38 = vadd.f32 %v1204_v24, %v879_v29 }
 0x197   :  { %v1209_v42 = vld [vmem:[%s2326_s2 + $0xc8] sm:$0xff] }
 0x198   :  { %1272 = vst [vmem:[%s2328_s4 + $0xc0] sm:$0xff] %v1240_v31  ;;  %v1241_v51 = vadd.f32 %v1209_v42, %v898_v39 }
 0x19f   :  { %v1205_v27 = vld [vmem:[%s2326_s2 + $0xa8] sm:$0xff]  ;;  %v1214_v46 = vld [vmem:[%s2326_s2 + $0xf0] sm:$0xff] }
 0x1a0   :  { %1268 = vst [vmem:[%s2328_s4 + $0xa0] sm:$0xff] %v1236_v38  ;;  %1275 = vst [vmem:[%s2328_s4 + $0xd8] sm:$0xff] %v1243_v33  ;;  %v1237_v47 = vadd.f32 %v1205_v27, %v882_v48  ;;  %v1246_v52 = vadd.f32 %v1214_v46, %v919_v49 }
 0x1a7   :  { %v1212_v59 = vld [vmem:[%s2326_s2 + $0xe0] sm:$0xff] }
 0x1a8   :  { %1273 = vst [vmem:[%s2328_s4 + $0xc8] sm:$0xff] %v1241_v51  ;;  %v1244_v2 = vadd.f32 %v1212_v59, %v911_v45 }
 0x1af   :  { %v1206_v43 = vld [vmem:[%s2326_s2 + $0xb0] sm:$0xff]  ;;  %v1215_v62 = vld [vmem:[%s2326_s2 + $0xf8] sm:$0xff] }
 0x1b0   :  { %1269 = vst [vmem:[%s2328_s4 + $0xa8] sm:$0xff] %v1237_v47  ;;  %1278 = vst [vmem:[%s2328_s4 + $0xf0] sm:$0xff] %v1246_v52  ;;  %v1238_v5 = vadd.f32 %v1206_v43, %v887_v63  ;;  %v1247_v0 = vadd.f32 %v1215_v62, %v922_v1 }
 0x1b7   :  { %v1213_v7 = vld [vmem:[%s2326_s2 + $0xe8] sm:$0xff] }
 0x1b8   :  { %1276 = vst [vmem:[%s2328_s4 + $0xe0] sm:$0xff] %v1244_v2  ;;  %v1245_v11 = vadd.f32 %v1213_v7, %v914_v8 }
 0x1bf   :  { %v1207_v57 = vld [vmem:[%s2326_s2 + $0xb8] sm:$0xff] }
 0x1c0   :  { %1270 = vst [vmem:[%s2328_s4 + $0xb0] sm:$0xff] %v1238_v5  ;;  %1279 = vst [vmem:[%s2328_s4 + $0xf8] sm:$0xff] %v1247_v0  ;;  %v1239_v14 = vadd.f32 %v1207_v57, %v890_v9 }
 0x1c1   :  { %1277 = vst [vmem:[%s2328_s4 + $0xe8] sm:$0xff] %v1245_v11 }
 0x1c2   :  { %1271 = vst [vmem:[%s2328_s4 + $0xb8] sm:$0xff] %v1239_v14 }
 0x1c3   :  { %1835 = shalt.err (!%p1832_p4)
}
 0x1c4   :  { %s1847_s17 = smov 64   ;;  %s1848_s18 = smov 4  }
 0x1c5   :  { %1291 = dma.vmem_to_hbm [thread:$0]  %s1286_s8, 2048, %s2327_s3, [#allocation4], %s1847_s17, %s1847_s17, %s1848_s18  }
 0x1c6   :  { %1844 = dma.done.wait [#allocation4], 2048  }
 0x1c7   :  { %1845 = vsyncadd [#allocation4], 4294965248 }
 0x1c8   :  { %1299 = vsyncpa [#allocation4], 1 }

// kernel: fwd.8
= control target key start
LH: loop header
LB: loop body
LE: loop exit
PB: predicated region body
PF: predicated region fallthrough
CT: control target
= control target key end

     0   :  { %v1766_v1 = vmov 0   ;;  %s2310_s0 = inlined_call_operand.vmem [shape: bf16[384,256], index: 0, kind: input, shape index: {}]   ;;  %s2311_s1 = inlined_call_operand.vmem [shape: bf16[256,128], index: 1, kind: input, shape index: {}]   ;;  %s2312_s2 = inlined_call_operand.vmem [shape: f32[384,128], index: 2, kind: input, shape index: {}, may-alias: {2,4}]   ;;  %s2313_s3 = inlined_call_operand.hbm [shape: bf16[384,128], index: 3, kind: output, shape index: {0}]   ;;  %s2314_s4 = inlined_call_operand.vmem [shape: f32[384,128], index: 4, kind: output, shape index: {1}, may-alias: {2,4}]  }
   0x1   :  { %v1656_v0 = vld [vmem:[%s2311_s1 + $0x38] sm:$0xff]   ;;  %539 = vmatprep.subr.bf16.mxu0 %v1766_v1  ;;  %1620 = vmatprep.subr.bf16.mxu1 %v1766_v1  ;;  %v1657_v2 = vld [vmem:[%s2311_s1 + $0x30] sm:$0xff]   ;;  %v1658_v3 = vld [vmem:[%s2311_s1 + $0x28] sm:$0xff]  }
   0x2   :  { %540 = vmatpush1.bf16.msra.mxu0 %v1656_v0  ;;  %1636 = vmatpush1.bf16.msra.mxu1 %v1656_v0  ;;  %v1659_v4 = vld [vmem:[%s2311_s1 + $0x20] sm:$0xff]   ;;  %v1660_v5 = vld [vmem:[%s2311_s1 + $0x18] sm:$0xff]   ;;  %v1661_v7 = vld [vmem:[%s2311_s1 + $0x10] sm:$0xff]  }
   0x3   :  { %541 = vmatprep.subr.bf16.mxu0 %v1766_v1  ;;  %1621 = vmatprep.subr.bf16.mxu1 %v1766_v1  ;;  %v1674_v6 = vld [vmem:[%s2310_s0 + $0x4] ss:$8 sps:$4 sm:$0xff]   ;;  %v1664_v11 = vld [vmem:[%s2311_s1 + $0x78] sm:$0xff]   ;;  %v1665_v12 = vld [vmem:[%s2311_s1 + $0x70] sm:$0xff]  }
   0x4   :  { %v1677_v8 = vld [vmem:[%s2310_s0 + $0xc4] ss:$8 sps:$4 sm:$0xff]   ;;  %571 = vmatprep.mubr.bf16.mxu0 %v1674_v6  ;;  %v1668_v15 = vld [vmem:[%s2311_s1 + $0x58] sm:$0xff]  }
   0x5   :  { %667 = vmatprep.mubr.bf16.mxu1 %v1677_v8  ;;  %v1662_v9 = vld [vmem:[%s2311_s1 + $0x8] sm:$0xff]   ;;  %v1663_v10 = vld [vmem:[%s2311_s1] sm:$0xff]  }
   0x6   :  { %542 = vmatpush1.bf16.msra.mxu0 %v1657_v2  ;;  %1637 = vmatpush1.bf16.msra.mxu1 %v1657_v2  ;;  %v1666_v13 = vld [vmem:[%s2311_s1 + $0x68] sm:$0xff]   ;;  %v1667_v14 = vld [vmem:[%s2311_s1 + $0x60] sm:$0xff]  }
   0x7   :  { %543 = vmatprep.subr.bf16.mxu0 %v1766_v1  ;;  %1622 = vmatprep.subr.bf16.mxu1 %v1766_v1 }
   0xa   :  { %544 = vmatpush1.bf16.msra.mxu0 %v1658_v3  ;;  %1638 = vmatpush1.bf16.msra.mxu1 %v1658_v3 }
   0xb   :  { %545 = vmatprep.subr.bf16.mxu0 %v1766_v1  ;;  %1623 = vmatprep.subr.bf16.mxu1 %v1766_v1 }
   0xe   :  { %546 = vmatpush1.bf16.msra.mxu0 %v1659_v4  ;;  %1639 = vmatpush1.bf16.msra.mxu1 %v1659_v4 }
   0xf   :  { %547 = vmatprep.subr.bf16.mxu0 %v1766_v1  ;;  %1624 = vmatprep.subr.bf16.mxu1 %v1766_v1 }
  0x12   :  { %548 = vmatpush1.bf16.msra.mxu0 %v1660_v5  ;;  %1640 = vmatpush1.bf16.msra.mxu1 %v1660_v5 }
  0x13   :  { %549 = vmatprep.subr.bf16.mxu0 %v1766_v1  ;;  %1625 = vmatprep.subr.bf16.mxu1 %v1766_v1 }
  0x16   :  { %550 = vmatpush1.bf16.msra.mxu0 %v1661_v7  ;;  %1641 = vmatpush1.bf16.msra.mxu1 %v1661_v7 }
  0x17   :  { %551 = vmatprep.subr.bf16.mxu0 %v1766_v1  ;;  %1626 = vmatprep.subr.bf16.mxu1 %v1766_v1 }
  0x1a   :  { %552 = vmatpush1.bf16.msra.mxu0 %v1662_v9  ;;  %1642 = vmatpush1.bf16.msra.mxu1 %v1662_v9 }
  0x1b   :  { %553 = vmatprep.subr.bf16.mxu0 %v1766_v1  ;;  %1627 = vmatprep.subr.bf16.mxu1 %v1766_v1 }
  0x1e   :  { %554 = vmatpush1.bf16.msra.mxu0 %v1663_v10  ;;  %1643 = vmatpush1.bf16.msra.mxu1 %v1663_v10 }
  0x1f   :  { %555 = vmatprep.subr.bf16.mxu0 %v1766_v1  ;;  %1628 = vmatprep.subr.bf16.mxu1 %v1766_v1 }
  0x22   :  { %556 = vmatpush2.bf16.msra.mxu0 %v1664_v11  ;;  %1644 = vmatpush2.bf16.msra.mxu1 %v1664_v11 }
  0x23   :  { %557 = vmatprep.subr.bf16.mxu0 %v1766_v1  ;;  %1629 = vmatprep.subr.bf16.mxu1 %v1766_v1 }
  0x26   :  { %558 = vmatpush2.bf16.msra.mxu0 %v1665_v12  ;;  %1645 = vmatpush2.bf16.msra.mxu1 %v1665_v12 }
  0x27   :  { %559 = vmatprep.subr.bf16.mxu0 %v1766_v1  ;;  %1630 = vmatprep.subr.bf16.mxu1 %v1766_v1 }
  0x2a   :  { %560 = vmatpush2.bf16.msra.mxu0 %v1666_v13  ;;  %1646 = vmatpush2.bf16.msra.mxu1 %v1666_v13 }
  0x2b   :  { %561 = vmatprep.subr.bf16.mxu0 %v1766_v1  ;;  %1631 = vmatprep.subr.bf16.mxu1 %v1766_v1 }
  0x2e   :  { %562 = vmatpush2.bf16.msra.mxu0 %v1667_v14  ;;  %1647 = vmatpush2.bf16.msra.mxu1 %v1667_v14 }
  0x2f   :  { %563 = vmatprep.subr.bf16.mxu0 %v1766_v1  ;;  %1632 = vmatprep.subr.bf16.mxu1 %v1766_v1 }
  0x30   :  { %10 = vsyncpa [#allocation4], 0  ;;  %v1669_v16 = vld [vmem:[%s2311_s1 + $0x50] sm:$0xff]   ;;  %v1670_v17 = vld [vmem:[%s2311_s1 + $0x48] sm:$0xff]   ;;  %s1767_s20 = smov [#allocation3]  }
  0x31   :  { %v1671_v18 = vld [vmem:[%s2311_s1 + $0x40] sm:$0xff]   ;;  %v1678_v21 = vld [vmem:[%s2310_s0 + $0x14] ss:$8 sps:$4 sm:$0xff]   ;;  %v1682_v23 = vld [vmem:[%s2310_s0 + $0x10] ss:$8 sps:$4 sm:$0xff]   ;;  %s1300_s21 = sshll.u32 %s1767_s20, 4  ;;  %s1301_s21 = int_to_ptr.vmem [resolvable:$true] %s1300_s21 }
  0x32   :  { %564 = vmatpush2.bf16.msra.mxu0 %v1668_v15  ;;  %1648 = vmatpush2.bf16.msra.mxu1 %v1668_v15  ;;  %v1672_v19 = vld [vmem:[%s2310_s0] ss:$8 sps:$4 sm:$0xff]   ;;  %v1680_v22 = vld [vmem:[%s2310_s0 + $0xd4] ss:$8 sps:$4 sm:$0xff]   ;;  %v1683_v24 = vld [vmem:[%s2310_s0 + $0xd0] ss:$8 sps:$4 sm:$0xff]   ;;  %p1749_p1 = scmp.lt.s32.totalorder %s1301_s21, %s1301_s21 }
  0x33   :  { %565 = vmatprep.subr.bf16.mxu0 %v1766_v1  ;;  %1633 = vmatprep.subr.bf16.mxu1 %v1766_v1  ;;  %v1675_v20 = vld [vmem:[%s2310_s0 + $0xc0] ss:$8 sps:$4 sm:$0xff]   ;;  %v1684_v25 = vld [vmem:[%s2310_s0 + $0x24] ss:$8 sps:$4 sm:$0xff]   ;;  %v1690_v29 = vld [vmem:[%s2310_s0 + $0x34] ss:$8 sps:$4 sm:$0xff]  }
  0x34   :  { %v1686_v26 = vld [vmem:[%s2310_s0 + $0xe4] ss:$8 sps:$4 sm:$0xff]   ;;  %v1688_v27 = vld [vmem:[%s2310_s0 + $0x20] ss:$8 sps:$4 sm:$0xff]   ;;  %v1692_v30 = vld [vmem:[%s2310_s0 + $0xf4] ss:$8 sps:$4 sm:$0xff]  }
  0x35   :  { %v1689_v28 = vld [vmem:[%s2310_s0 + $0xe0] ss:$8 sps:$4 sm:$0xff]   ;;  %v1694_v31 = vld [vmem:[%s2310_s0 + $0x30] ss:$8 sps:$4 sm:$0xff]   ;;  %v1696_v33 = vld [vmem:[%s2310_s0 + $0x44] ss:$8 sps:$4 sm:$0xff]  }
  0x36   :  { %566 = vmatpush2.bf16.msra.mxu0 %v1669_v16  ;;  %1649 = vmatpush2.bf16.msra.mxu1 %v1669_v16  ;;  %v1695_v32 = vld [vmem:[%s2310_s0 + $0xf0] ss:$8 sps:$4 sm:$0xff]   ;;  %v1698_v34 = vld [vmem:[%s2310_s0 + $0x104] ss:$8 sps:$4 sm:$0xff]   ;;  %v1700_v35 = vld [vmem:[%s2310_s0 + $0x40] ss:$8 sps:$4 sm:$0xff]  }
  0x37   :  { %567 = vmatprep.subr.bf16.mxu0 %v1766_v1  ;;  %1634 = vmatprep.subr.bf16.mxu1 %v1766_v1  ;;  %v1701_v36 = vld [vmem:[%s2310_s0 + $0x100] ss:$8 sps:$4 sm:$0xff]   ;;  %v1702_v37 = vld [vmem:[%s2310_s0 + $0x54] ss:$8 sps:$4 sm:$0xff]   ;;  %v1706_v39 = vld [vmem:[%s2310_s0 + $0x50] ss:$8 sps:$4 sm:$0xff]  }
  0x38   :  { %v1704_v38 = vld [vmem:[%s2310_s0 + $0x114] ss:$8 sps:$4 sm:$0xff]   ;;  %v1707_v40 = vld [vmem:[%s2310_s0 + $0x110] ss:$8 sps:$4 sm:$0xff]   ;;  %v1708_v41 = vld [vmem:[%s2310_s0 + $0x64] ss:$8 sps:$4 sm:$0xff]  }
  0x39   :  { %v1710_v42 = vld [vmem:[%s2310_s0 + $0x124] ss:$8 sps:$4 sm:$0xff]   ;;  %v1712_v43 = vld [vmem:[%s2310_s0 + $0x60] ss:$8 sps:$4 sm:$0xff]   ;;  %v1714_v45 = vld [vmem:[%s2310_s0 + $0x74] ss:$8 sps:$4 sm:$0xff]  }
  0x3a   :  { %568 = vmatpush2.bf16.msra.mxu0 %v1670_v17  ;;  %1650 = vmatpush2.bf16.msra.mxu1 %v1670_v17  ;;  %v1713_v44 = vld [vmem:[%s2310_s0 + $0x120] ss:$8 sps:$4 sm:$0xff]   ;;  %v1716_v46 = vld [vmem:[%s2310_s0 + $0x134] ss:$8 sps:$4 sm:$0xff]   ;;  %v1718_v47 = vld [vmem:[%s2310_s0 + $0x70] ss:$8 sps:$4 sm:$0xff]  }
  0x3b   :  { %569 = vmatprep.subr.bf16.mxu0 %v1766_v1  ;;  %1635 = vmatprep.subr.bf16.mxu1 %v1766_v1  ;;  %v1719_v48 = vld [vmem:[%s2310_s0 + $0x130] ss:$8 sps:$4 sm:$0xff]   ;;  %v1720_v49 = vld [vmem:[%s2310_s0 + $0x84] ss:$8 sps:$4 sm:$0xff]   ;;  %v1724_v51 = vld [vmem:[%s2310_s0 + $0x80] ss:$8 sps:$4 sm:$0xff]  }
  0x3c   :  { %v1722_v50 = vld [vmem:[%s2310_s0 + $0x144] ss:$8 sps:$4 sm:$0xff]   ;;  %v1725_v52 = vld [vmem:[%s2310_s0 + $0x140] ss:$8 sps:$4 sm:$0xff]   ;;  %v1726_v53 = vld [vmem:[%s2310_s0 + $0x94] ss:$8 sps:$4 sm:$0xff]  }
  0x3d   :  { %v1728_v54 = vld [vmem:[%s2310_s0 + $0x154] ss:$8 sps:$4 sm:$0xff]   ;;  %v1730_v55 = vld [vmem:[%s2310_s0 + $0x90] ss:$8 sps:$4 sm:$0xff]   ;;  %v1732_v57 = vld [vmem:[%s2310_s0 + $0xa4] ss:$8 sps:$4 sm:$0xff]  }
  0x3e   :  { %570 = vmatpush2.bf16.msra.mxu0 %v1671_v18  ;;  %1651 = vmatpush2.bf16.msra.mxu1 %v1671_v18  ;;  %v1731_v56 = vld [vmem:[%s2310_s0 + $0x150] ss:$8 sps:$4 sm:$0xff]   ;;  %v1734_v58 = vld [vmem:[%s2310_s0 + $0x164] ss:$8 sps:$4 sm:$0xff]   ;;  %v1736_v59 = vld [vmem:[%s2310_s0 + $0xa0] ss:$8 sps:$4 sm:$0xff]  }
  0x3f   :  { %v1737_v60 = vld [vmem:[%s2310_s0 + $0x160] ss:$8 sps:$4 sm:$0xff]   ;;  %v1738_v61 = vld [vmem:[%s2310_s0 + $0xb4] ss:$8 sps:$4 sm:$0xff]   ;;  %v1742_v63 = vld [vmem:[%s2310_s0 + $0xb0] ss:$8 sps:$4 sm:$0xff]  }
  0x40   :  { %v1740_v62 = vld [vmem:[%s2310_s0 + $0x174] ss:$8 sps:$4 sm:$0xff]   ;;  %v1743_v0 = vld [vmem:[%s2310_s0 + $0x170] ss:$8 sps:$4 sm:$0xff]   ;;  %v1151_v1 = vld [vmem:[%s2312_s2] sm:$0xff]  ;;  %s1744_s6 = scalar_lea.vmem %s1301_s21, 3072 }
  0x41   :  { %572 = vmatmul.mubr.bf16.vlgmr.msra.gmra.mxu0 %v1672_v19  ;;  %668 = vmatmul.mubr.bf16.vlgmr.msra.gmra.mxu1 %v1675_v20  ;;  %v1175_v2 = vld [vmem:[%s2312_s2 + $0xc0] sm:$0xff]  ;;  %v1152_v9 = vld [vmem:[%s2312_s2 + $0x8] sm:$0xff]  ;;  %p1745_p0 = scmp.ne.s32.totalorder %s1301_s21, %s1744_s6  ;;  %p1750_p2 = scmp.lt.s32.totalorder %s1744_s6, %s1744_s6 }
  0x42   :  { %579 = vmatprep.mubr.bf16.mxu0 %v1678_v21  ;;  %675 = vmatprep.mubr.bf16.mxu1 %v1680_v22  ;;  %v1176_v10 = vld [vmem:[%s2312_s2 + $0xc8] sm:$0xff] }
  0x43   :  { %p1751_p3 = por %p1750_p2, %p1749_p1 }
  0x45   :  { %p1752_p4 = pnand %p1751_p3, %p1745_p0 }
  0x49   :  { %580 = vmatmul.mubr.bf16.gmra.mxu0 %v1682_v23  ;;  %676 = vmatmul.mubr.bf16.gmra.mxu1 %v1683_v24 }
  0x4a   :  { %587 = vmatprep.mubr.bf16.mxu0 %v1684_v25  ;;  %683 = vmatprep.mubr.bf16.mxu1 %v1686_v26 }
  0x51   :  { %588 = vmatmul.mubr.bf16.gmra.mxu0 %v1688_v27  ;;  %684 = vmatmul.mubr.bf16.gmra.mxu1 %v1689_v28 }
  0x52   :  { %595 = vmatprep.mubr.bf16.mxu0 %v1690_v29  ;;  %691 = vmatprep.mubr.bf16.mxu1 %v1692_v30 }
  0x59   :  { %596 = vmatmul.mubr.bf16.gmra.mxu0 %v1694_v31  ;;  %692 = vmatmul.mubr.bf16.gmra.mxu1 %v1695_v32 }
  0x5a   :  { %603 = vmatprep.mubr.bf16.mxu0 %v1696_v33  ;;  %699 = vmatprep.mubr.bf16.mxu1 %v1698_v34 }
  0x61   :  { %604 = vmatmul.mubr.bf16.gmra.mxu0 %v1700_v35  ;;  %700 = vmatmul.mubr.bf16.gmra.mxu1 %v1701_v36 }
  0x62   :  { %611 = vmatprep.mubr.bf16.mxu0 %v1702_v37  ;;  %707 = vmatprep.mubr.bf16.mxu1 %v1704_v38 }
  0x69   :  { %612 = vmatmul.mubr.bf16.gmra.mxu0 %v1706_v39  ;;  %708 = vmatmul.mubr.bf16.gmra.mxu1 %v1707_v40 }
  0x6a   :  { %619 = vmatprep.mubr.bf16.mxu0 %v1708_v41  ;;  %715 = vmatprep.mubr.bf16.mxu1 %v1710_v42 }
  0x71   :  { %620 = vmatmul.mubr.bf16.gmra.mxu0 %v1712_v43  ;;  %716 = vmatmul.mubr.bf16.gmra.mxu1 %v1713_v44 }
  0x72   :  { %627 = vmatprep.mubr.bf16.mxu0 %v1714_v45  ;;  %723 = vmatprep.mubr.bf16.mxu1 %v1716_v46 }
  0x79   :  { %628 = vmatmul.mubr.bf16.gmra.mxu0 %v1718_v47  ;;  %724 = vmatmul.mubr.bf16.gmra.mxu1 %v1719_v48 }
  0x7a   :  { %635 = vmatprep.mubr.bf16.mxu0 %v1720_v49  ;;  %731 = vmatprep.mubr.bf16.mxu1 %v1722_v50 }
  0x81   :  { %636 = vmatmul.mubr.bf16.gmra.mxu0 %v1724_v51  ;;  %732 = vmatmul.mubr.bf16.gmra.mxu1 %v1725_v52 }
  0x82   :  { %643 = vmatprep.mubr.bf16.mxu0 %v1726_v53  ;;  %739 = vmatprep.mubr.bf16.mxu1 %v1728_v54 }
  0x89   :  { %644 = vmatmul.mubr.bf16.gmra.mxu0 %v1730_v55  ;;  %740 = vmatmul.mubr.bf16.gmra.mxu1 %v1731_v56 }
  0x8a   :  { %651 = vmatprep.mubr.bf16.mxu0 %v1732_v57  ;;  %747 = vmatprep.mubr.bf16.mxu1 %v1734_v58 }
  0x91   :  { %652 = vmatmul.mubr.bf16.gmra.mxu0 %v1736_v59  ;;  %748 = vmatmul.mubr.bf16.gmra.mxu1 %v1737_v60 }
  0x92   :  { %659 = vmatprep.mubr.bf16.mxu0 %v1738_v61  ;;  %755 = vmatprep.mubr.bf16.mxu1 %v1740_v62 }
  0x99   :  { %660 = vmatmul.mubr.bf16.gmra.mxu0 %v1742_v63  ;;  %756 = vmatmul.mubr.bf16.gmra.mxu1 %v1743_v0 }
 0x101   :  { %v573_v3 = vpop.f32.mrf.mxu0  ;;  %v669_v4 = vpop.f32.mrf.mxu1 }
 0x102   :  { %v1199_v5 = vadd.f32 %v1151_v1, %v573_v3  ;;  %v1223_v6 = vadd.f32 %v1175_v2, %v669_v4 }
 0x103   :  { %v575_v7 = vpop.f32.mrf.mxu0  ;;  %v671_v8 = vpop.f32.mrf.mxu1 }
 0x104   :  { %1247 = vst [vmem:[%s2314_s4] sm:$0xff] %v1199_v5  ;;  %1271 = vst [vmem:[%s2314_s4 + $0xc0] sm:$0xff] %v1223_v6 }
 0x105   :  { %v576_v11 = vpop.f32.mrf.mxu0  ;;  %v672_v12 = vpop.f32.mrf.mxu1 }
 0x106   :  { %v1480_v13 = vpack.c.bf16 %v576_v11, %v573_v3  ;;  %v1200_v14 = vadd.f32 %v1152_v9, %v576_v11  ;;  %v1540_v15 = vpack.c.bf16 %v672_v12, %v669_v4  ;;  %v1224_v16 = vadd.f32 %v1176_v10, %v672_v12 }
 0x107   :  { %v578_v17 = vpop.f32.mrf.mxu0  ;;  %v674_v18 = vpop.f32.mrf.mxu1 }
 0x108   :  { %1481 = vst [vmem:[#allocation3] sm:$0xff] %v1480_v13   ;;  %1608 = vst [vmem:[#allocation3 + $0x60] sm:$0xff] %v1540_v15  }
 0x109   :  { %v581_v21 = vpop.f32.mrf.mxu0  ;;  %v677_v22 = vpop.f32.mrf.mxu1 }
 0x10b   :  { %v1153_v19 = vld [vmem:[%s2312_s2 + $0x10] sm:$0xff]  ;;  %v583_v25 = vpop.f32.mrf.mxu0  ;;  %v679_v26 = vpop.f32.mrf.mxu1 }
 0x10c   :  { %v1177_v20 = vld [vmem:[%s2312_s2 + $0xd0] sm:$0xff]  ;;  %v1201_v23 = vadd.f32 %v1153_v19, %v581_v21 }
 0x10d   :  { %1248 = vst [vmem:[%s2314_s4 + $0x8] sm:$0xff] %v1200_v14  ;;  %1272 = vst [vmem:[%s2314_s4 + $0xc8] sm:$0xff] %v1224_v16  ;;  %v1225_v24 = vadd.f32 %v1177_v20, %v677_v22  ;;  %v584_v29 = vpop.f32.mrf.mxu0  ;;  %v680_v30 = vpop.f32.mrf.mxu1 }
 0x10e   :  { %v1485_v31 = vpack.c.bf16 %v584_v29, %v581_v21  ;;  %v1545_v33 = vpack.c.bf16 %v680_v30, %v677_v22 }
 0x10f   :  { %v586_v35 = vpop.f32.mrf.mxu0  ;;  %v682_v36 = vpop.f32.mrf.mxu1 }
 0x110   :  { %1597 = vst [vmem:[#allocation3 + $0x8] sm:$0xff] %v1485_v31   ;;  %1609 = vst [vmem:[#allocation3 + $0x68] sm:$0xff] %v1545_v33  }
 0x111   :  { %v589_v39 = vpop.f32.mrf.mxu0  ;;  %v685_v40 = vpop.f32.mrf.mxu1 }
 0x113   :  { %v591_v43 = vpop.f32.mrf.mxu0  ;;  %v687_v44 = vpop.f32.mrf.mxu1 }
 0x114   :  { %v1154_v27 = vld [vmem:[%s2312_s2 + $0x18] sm:$0xff] }
 0x115   :  { %v1178_v28 = vld [vmem:[%s2312_s2 + $0xd8] sm:$0xff]  ;;  %v1202_v32 = vadd.f32 %v1154_v27, %v584_v29  ;;  %v592_v47 = vpop.f32.mrf.mxu0  ;;  %v688_v48 = vpop.f32.mrf.mxu1 }
 0x116   :  { %1249 = vst [vmem:[%s2314_s4 + $0x10] sm:$0xff] %v1201_v23  ;;  %1273 = vst [vmem:[%s2314_s4 + $0xd0] sm:$0xff] %v1225_v24  ;;  %v1226_v34 = vadd.f32 %v1178_v28, %v680_v30  ;;  %v1490_v49 = vpack.c.bf16 %v592_v47, %v589_v39  ;;  %v1550_v51 = vpack.c.bf16 %v688_v48, %v685_v40 }
 0x117   :  { %v594_v53 = vpop.f32.mrf.mxu0  ;;  %v690_v54 = vpop.f32.mrf.mxu1 }
 0x118   :  { %1598 = vst [vmem:[#allocation3 + $0x10] sm:$0xff] %v1490_v49   ;;  %1610 = vst [vmem:[#allocation3 + $0x70] sm:$0xff] %v1550_v51  }
 0x119   :  { %v597_v57 = vpop.f32.mrf.mxu0  ;;  %v693_v58 = vpop.f32.mrf.mxu1 }
 0x11b   :  { %v599_v61 = vpop.f32.mrf.mxu0  ;;  %v695_v62 = vpop.f32.mrf.mxu1 }
 0x11d   :  { %v1155_v37 = vld [vmem:[%s2312_s2 + $0x20] sm:$0xff]  ;;  %v600_v1 = vpop.f32.mrf.mxu0  ;;  %v696_v2 = vpop.f32.mrf.mxu1 }
 0x11e   :  { %v1179_v38 = vld [vmem:[%s2312_s2 + $0xe0] sm:$0xff]  ;;  %v1203_v41 = vadd.f32 %v1155_v37, %v589_v39  ;;  %v1495_v3 = vpack.c.bf16 %v600_v1, %v597_v57  ;;  %v1555_v5 = vpack.c.bf16 %v696_v2, %v693_v58 }
 0x11f   :  { %1250 = vst [vmem:[%s2314_s4 + $0x18] sm:$0xff] %v1202_v32  ;;  %1274 = vst [vmem:[%s2314_s4 + $0xd8] sm:$0xff] %v1226_v34  ;;  %v1227_v42 = vadd.f32 %v1179_v38, %v685_v40  ;;  %v602_v7 = vpop.f32.mrf.mxu0  ;;  %v698_v8 = vpop.f32.mrf.mxu1 }
 0x120   :  { %1599 = vst [vmem:[#allocation3 + $0x18] sm:$0xff] %v1495_v3   ;;  %1611 = vst [vmem:[#allocation3 + $0x78] sm:$0xff] %v1555_v5  }
 0x121   :  { %v605_v11 = vpop.f32.mrf.mxu0  ;;  %v701_v12 = vpop.f32.mrf.mxu1 }
 0x123   :  { %v607_v15 = vpop.f32.mrf.mxu0  ;;  %v703_v16 = vpop.f32.mrf.mxu1 }
 0x125   :  { %v608_v19 = vpop.f32.mrf.mxu0  ;;  %v704_v20 = vpop.f32.mrf.mxu1 }
 0x126   :  { %v1156_v45 = vld [vmem:[%s2312_s2 + $0x28] sm:$0xff]  ;;  %v1500_v21 = vpack.c.bf16 %v608_v19, %v605_v11  ;;  %v1560_v23 = vpack.c.bf16 %v704_v20, %v701_v12 }
 0x127   :  { %v1180_v46 = vld [vmem:[%s2312_s2 + $0xe8] sm:$0xff]  ;;  %v1204_v50 = vadd.f32 %v1156_v45, %v592_v47  ;;  %v610_v25 = vpop.f32.mrf.mxu0  ;;  %v706_v26 = vpop.f32.mrf.mxu1 }
 0x128   :  { %1251 = vst [vmem:[%s2314_s4 + $0x20] sm:$0xff] %v1203_v41  ;;  %1275 = vst [vmem:[%s2314_s4 + $0xe0] sm:$0xff] %v1227_v42  ;;  %v1228_v52 = vadd.f32 %v1180_v46, %v688_v48 }
 0x129   :  { %1600 = vst [vmem:[#allocation3 + $0x20] sm:$0xff] %v1500_v21   ;;  %1612 = vst [vmem:[#allocation3 + $0x80] sm:$0xff] %v1560_v23   ;;  %v613_v29 = vpop.f32.mrf.mxu0  ;;  %v709_v30 = vpop.f32.mrf.mxu1 }
 0x12b   :  { %v615_v33 = vpop.f32.mrf.mxu0  ;;  %v711_v34 = vpop.f32.mrf.mxu1 }
 0x12d   :  { %v616_v37 = vpop.f32.mrf.mxu0  ;;  %v712_v38 = vpop.f32.mrf.mxu1 }
 0x12e   :  { %v1505_v39 = vpack.c.bf16 %v616_v37, %v613_v29  ;;  %v1565_v41 = vpack.c.bf16 %v712_v38, %v709_v30 }
 0x12f   :  { %v1157_v55 = vld [vmem:[%s2312_s2 + $0x30] sm:$0xff]  ;;  %v618_v43 = vpop.f32.mrf.mxu0  ;;  %v714_v44 = vpop.f32.mrf.mxu1 }
 0x130   :  { %v1181_v56 = vld [vmem:[%s2312_s2 + $0xf0] sm:$0xff]  ;;  %v1205_v59 = vadd.f32 %v1157_v55, %v597_v57  ;;  %1601 = vst [vmem:[#allocation3 + $0x28] sm:$0xff] %v1505_v39   ;;  %1613 = vst [vmem:[#allocation3 + $0x88] sm:$0xff] %v1565_v41  }
 0x131   :  { %1252 = vst [vmem:[%s2314_s4 + $0x28] sm:$0xff] %v1204_v50  ;;  %1276 = vst [vmem:[%s2314_s4 + $0xe8] sm:$0xff] %v1228_v52  ;;  %v1229_v60 = vadd.f32 %v1181_v56, %v693_v58  ;;  %v621_v47 = vpop.f32.mrf.mxu0  ;;  %v717_v48 = vpop.f32.mrf.mxu1 }
 0x133   :  { %v623_v51 = vpop.f32.mrf.mxu0  ;;  %v719_v52 = vpop.f32.mrf.mxu1 }
 0x135   :  { %v624_v55 = vpop.f32.mrf.mxu0  ;;  %v720_v56 = vpop.f32.mrf.mxu1 }
 0x136   :  { %v1510_v57 = vpack.c.bf16 %v624_v55, %v621_v47 }
 0x137   :  { %v626_v61 = vpop.f32.mrf.mxu0  ;;  %v722_v62 = vpop.f32.mrf.mxu1 }
 0x138   :  { %v1158_v63 = vld [vmem:[%s2312_s2 + $0x38] sm:$0xff]  ;;  %1602 = vst [vmem:[#allocation3 + $0x30] sm:$0xff] %v1510_v57  }
 0x139   :  { %v1182_v0 = vld [vmem:[%s2312_s2 + $0xf8] sm:$0xff]  ;;  %v1206_v4 = vadd.f32 %v1158_v63, %v600_v1  ;;  %v629_v1 = vpop.f32.mrf.mxu0 }
 0x13a   :  { %1253 = vst [vmem:[%s2314_s4 + $0x30] sm:$0xff] %v1205_v59  ;;  %1277 = vst [vmem:[%s2314_s4 + $0xf0] sm:$0xff] %v1229_v60  ;;  %v1230_v6 = vadd.f32 %v1182_v0, %v696_v2  ;;  %v1570_v59 = vpack.c.bf16 %v720_v56, %v717_v48  ;;  %v725_v2 = vpop.f32.mrf.mxu1 }
 0x13b   :  { %v631_v5 = vpop.f32.mrf.mxu0 }
 0x13c   :  { %1614 = vst [vmem:[#allocation3 + $0x90] sm:$0xff] %v1570_v59  }
 0x141   :  { %v1159_v9 = vld [vmem:[%s2312_s2 + $0x40] sm:$0xff] }
 0x142   :  { %v1183_v10 = vld [vmem:[%s2312_s2 + $0x100] sm:$0xff]  ;;  %v1207_v13 = vadd.f32 %v1159_v9, %v605_v11  ;;  %v632_v9 = vpop.f32.mrf.mxu0 }
 0x143   :  { %1254 = vst [vmem:[%s2314_s4 + $0x38] sm:$0xff] %v1206_v4  ;;  %1278 = vst [vmem:[%s2314_s4 + $0xf8] sm:$0xff] %v1230_v6  ;;  %v1231_v14 = vadd.f32 %v1183_v10, %v701_v12  ;;  %v727_v6 = vpop.f32.mrf.mxu1  ;;  %v1515_v11 = vpack.c.bf16 %v632_v9, %v629_v1 }
 0x144   :  { %v634_v15 = vpop.f32.mrf.mxu0 }
 0x145   :  { %v728_v10 = vpop.f32.mrf.mxu1  ;;  %1603 = vst [vmem:[#allocation3 + $0x38] sm:$0xff] %v1515_v11  }
 0x147   :  { %v730_v16 = vpop.f32.mrf.mxu1 }
 0x14a   :  { %v1160_v17 = vld [vmem:[%s2312_s2 + $0x48] sm:$0xff] }
 0x14b   :  { %v1184_v18 = vld [vmem:[%s2312_s2 + $0x108] sm:$0xff]  ;;  %v1208_v22 = vadd.f32 %v1160_v17, %v608_v19  ;;  %v637_v19 = vpop.f32.mrf.mxu0 }
 0x14c   :  { %1255 = vst [vmem:[%s2314_s4 + $0x40] sm:$0xff] %v1207_v13  ;;  %1279 = vst [vmem:[%s2314_s4 + $0x100] sm:$0xff] %v1231_v14  ;;  %v1232_v24 = vadd.f32 %v1184_v18, %v704_v20  ;;  %v1575_v13 = vpack.c.bf16 %v728_v10, %v725_v2  ;;  %v733_v20 = vpop.f32.mrf.mxu1 }
 0x14d   :  { %v639_v23 = vpop.f32.mrf.mxu0 }
 0x14e   :  { %1615 = vst [vmem:[#allocation3 + $0x98] sm:$0xff] %v1575_v13  }
 0x153   :  { %v1161_v27 = vld [vmem:[%s2312_s2 + $0x50] sm:$0xff] }
 0x154   :  { %v1185_v28 = vld [vmem:[%s2312_s2 + $0x110] sm:$0xff]  ;;  %v1209_v31 = vadd.f32 %v1161_v27, %v613_v29  ;;  %v640_v27 = vpop.f32.mrf.mxu0 }
 0x155   :  { %1256 = vst [vmem:[%s2314_s4 + $0x48] sm:$0xff] %v1208_v22  ;;  %1280 = vst [vmem:[%s2314_s4 + $0x108] sm:$0xff] %v1232_v24  ;;  %v1233_v32 = vadd.f32 %v1185_v28, %v709_v30  ;;  %v735_v24 = vpop.f32.mrf.mxu1  ;;  %v1520_v29 = vpack.c.bf16 %v640_v27, %v637_v19 }
 0x156   :  { %v642_v33 = vpop.f32.mrf.mxu0 }
 0x157   :  { %v736_v28 = vpop.f32.mrf.mxu1  ;;  %1604 = vst [vmem:[#allocation3 + $0x40] sm:$0xff] %v1520_v29  }
 0x159   :  { %v738_v34 = vpop.f32.mrf.mxu1 }
 0x15c   :  { %v1162_v35 = vld [vmem:[%s2312_s2 + $0x58] sm:$0xff] }
 0x15d   :  { %v1186_v36 = vld [vmem:[%s2312_s2 + $0x118] sm:$0xff]  ;;  %v1210_v40 = vadd.f32 %v1162_v35, %v616_v37  ;;  %v645_v37 = vpop.f32.mrf.mxu0 }
 0x15e   :  { %1257 = vst [vmem:[%s2314_s4 + $0x50] sm:$0xff] %v1209_v31  ;;  %1281 = vst [vmem:[%s2314_s4 + $0x110] sm:$0xff] %v1233_v32  ;;  %v1234_v42 = vadd.f32 %v1186_v36, %v712_v38  ;;  %v1580_v31 = vpack.c.bf16 %v736_v28, %v733_v20  ;;  %v741_v38 = vpop.f32.mrf.mxu1 }
 0x15f   :  { %v647_v41 = vpop.f32.mrf.mxu0 }
 0x160   :  { %1616 = vst [vmem:[#allocation3 + $0xa0] sm:$0xff] %v1580_v31  }
 0x165   :  { %v1163_v45 = vld [vmem:[%s2312_s2 + $0x60] sm:$0xff] }
 0x166   :  { %v1187_v46 = vld [vmem:[%s2312_s2 + $0x120] sm:$0xff]  ;;  %v1211_v49 = vadd.f32 %v1163_v45, %v621_v47  ;;  %v648_v45 = vpop.f32.mrf.mxu0 }
 0x167   :  { %1258 = vst [vmem:[%s2314_s4 + $0x58] sm:$0xff] %v1210_v40  ;;  %1282 = vst [vmem:[%s2314_s4 + $0x118] sm:$0xff] %v1234_v42  ;;  %v1235_v50 = vadd.f32 %v1187_v46, %v717_v48  ;;  %v743_v42 = vpop.f32.mrf.mxu1  ;;  %v1525_v47 = vpack.c.bf16 %v648_v45, %v645_v37 }
 0x168   :  { %v650_v51 = vpop.f32.mrf.mxu0 }
 0x169   :  { %v744_v46 = vpop.f32.mrf.mxu1  ;;  %1605 = vst [vmem:[#allocation3 + $0x48] sm:$0xff] %v1525_v47  }
 0x16b   :  { %v746_v52 = vpop.f32.mrf.mxu1 }
 0x16e   :  { %v1164_v53 = vld [vmem:[%s2312_s2 + $0x68] sm:$0xff] }
 0x16f   :  { %v1188_v54 = vld [vmem:[%s2312_s2 + $0x128] sm:$0xff]  ;;  %v1212_v58 = vadd.f32 %v1164_v53, %v624_v55  ;;  %v653_v55 = vpop.f32.mrf.mxu0 }
 0x170   :  { %1259 = vst [vmem:[%s2314_s4 + $0x60] sm:$0xff] %v1211_v49  ;;  %1283 = vst [vmem:[%s2314_s4 + $0x120] sm:$0xff] %v1235_v50  ;;  %v1236_v60 = vadd.f32 %v1188_v54, %v720_v56  ;;  %v1585_v49 = vpack.c.bf16 %v744_v46, %v741_v38  ;;  %v749_v56 = vpop.f32.mrf.mxu1 }
 0x171   :  { %v655_v59 = vpop.f32.mrf.mxu0 }
 0x172   :  { %1617 = vst [vmem:[#allocation3 + $0xa8] sm:$0xff] %v1585_v49  }
 0x177   :  { %v1165_v63 = vld [vmem:[%s2312_s2 + $0x70] sm:$0xff] }
 0x178   :  { %v1189_v0 = vld [vmem:[%s2312_s2 + $0x130] sm:$0xff]  ;;  %v1213_v3 = vadd.f32 %v1165_v63, %v629_v1  ;;  %v656_v63 = vpop.f32.mrf.mxu0 }
 0x179   :  { %1260 = vst [vmem:[%s2314_s4 + $0x68] sm:$0xff] %v1212_v58  ;;  %1284 = vst [vmem:[%s2314_s4 + $0x128] sm:$0xff] %v1236_v60  ;;  %v1237_v4 = vadd.f32 %v1189_v0, %v725_v2  ;;  %v751_v60 = vpop.f32.mrf.mxu1  ;;  %v1530_v1 = vpack.c.bf16 %v656_v63, %v653_v55 }
 0x17a   :  { %v658_v5 = vpop.f32.mrf.mxu0 }
 0x17b   :  { %v752_v0 = vpop.f32.mrf.mxu1  ;;  %1606 = vst [vmem:[#allocation3 + $0x50] sm:$0xff] %v1530_v1  }
 0x17d   :  { %v754_v6 = vpop.f32.mrf.mxu1 }
 0x180   :  { %v1166_v7 = vld [vmem:[%s2312_s2 + $0x78] sm:$0xff] }
 0x181   :  { %v1190_v8 = vld [vmem:[%s2312_s2 + $0x138] sm:$0xff]  ;;  %v1214_v12 = vadd.f32 %v1166_v7, %v632_v9  ;;  %v661_v9 = vpop.f32.mrf.mxu0 }
 0x182   :  { %1261 = vst [vmem:[%s2314_s4 + $0x70] sm:$0xff] %v1213_v3  ;;  %1285 = vst [vmem:[%s2314_s4 + $0x130] sm:$0xff] %v1237_v4  ;;  %v1238_v14 = vadd.f32 %v1190_v8, %v728_v10  ;;  %v1590_v3 = vpack.c.bf16 %v752_v0, %v749_v56  ;;  %v757_v10 = vpop.f32.mrf.mxu1 }
 0x183   :  { %v663_v13 = vpop.f32.mrf.mxu0 }
 0x184   :  { %1618 = vst [vmem:[#allocation3 + $0xb0] sm:$0xff] %v1590_v3  }
 0x189   :  { %v1167_v17 = vld [vmem:[%s2312_s2 + $0x80] sm:$0xff] }
 0x18a   :  { %v1191_v18 = vld [vmem:[%s2312_s2 + $0x140] sm:$0xff]  ;;  %v1215_v21 = vadd.f32 %v1167_v17, %v637_v19  ;;  %v664_v17 = vpop.f32.mrf.mxu0 }
 0x18b   :  { %1262 = vst [vmem:[%s2314_s4 + $0x78] sm:$0xff] %v1214_v12  ;;  %1286 = vst [vmem:[%s2314_s4 + $0x138] sm:$0xff] %v1238_v14  ;;  %v1239_v22 = vadd.f32 %v1191_v18, %v733_v20  ;;  %v759_v14 = vpop.f32.mrf.mxu1  ;;  %v1535_v19 = vpack.c.bf16 %v664_v17, %v661_v9 }
 0x18c   :  { %v666_v23 = vpop.f32.mrf.mxu0 }
 0x18d   :  { %v760_v18 = vpop.f32.mrf.mxu1  ;;  %1607 = vst [vmem:[#allocation3 + $0x58] sm:$0xff] %v1535_v19  }
 0x18f   :  { %v762_v24 = vpop.f32.mrf.mxu1 }
 0x192   :  { %v1168_v25 = vld [vmem:[%s2312_s2 + $0x88] sm:$0xff] }
 0x193   :  { %v1192_v26 = vld [vmem:[%s2312_s2 + $0x148] sm:$0xff]  ;;  %v1216_v30 = vadd.f32 %v1168_v25, %v640_v27 }
 0x194   :  { %1263 = vst [vmem:[%s2314_s4 + $0x80] sm:$0xff] %v1215_v21  ;;  %1287 = vst [vmem:[%s2314_s4 + $0x140] sm:$0xff] %v1239_v22  ;;  %v1240_v32 = vadd.f32 %v1192_v26, %v736_v28  ;;  %v1595_v21 = vpack.c.bf16 %v760_v18, %v757_v10 }
 0x196   :  { %1619 = vst [vmem:[#allocation3 + $0xb8] sm:$0xff] %v1595_v21  }
 0x19b   :  { %v1169_v35 = vld [vmem:[%s2312_s2 + $0x90] sm:$0xff] }
 0x19c   :  { %v1193_v36 = vld [vmem:[%s2312_s2 + $0x150] sm:$0xff]  ;;  %v1217_v39 = vadd.f32 %v1169_v35, %v645_v37 }
 0x19d   :  { %1264 = vst [vmem:[%s2314_s4 + $0x88] sm:$0xff] %v1216_v30  ;;  %1288 = vst [vmem:[%s2314_s4 + $0x148] sm:$0xff] %v1240_v32  ;;  %v1241_v40 = vadd.f32 %v1193_v36, %v741_v38 }
 0x1a4   :  { %v1170_v43 = vld [vmem:[%s2312_s2 + $0x98] sm:$0xff] }
 0x1a5   :  { %v1194_v44 = vld [vmem:[%s2312_s2 + $0x158] sm:$0xff]  ;;  %v1218_v48 = vadd.f32 %v1170_v43, %v648_v45 }
 0x1a6   :  { %1265 = vst [vmem:[%s2314_s4 + $0x90] sm:$0xff] %v1217_v39  ;;  %1289 = vst [vmem:[%s2314_s4 + $0x150] sm:$0xff] %v1241_v40  ;;  %v1242_v50 = vadd.f32 %v1194_v44, %v744_v46 }
 0x1ad   :  { %v1171_v53 = vld [vmem:[%s2312_s2 + $0xa0] sm:$0xff] }
 0x1ae   :  { %v1195_v54 = vld [vmem:[%s2312_s2 + $0x160] sm:$0xff]  ;;  %v1219_v57 = vadd.f32 %v1171_v53, %v653_v55 }
 0x1af   :  { %1266 = vst [vmem:[%s2314_s4 + $0x98] sm:$0xff] %v1218_v48  ;;  %1290 = vst [vmem:[%s2314_s4 + $0x158] sm:$0xff] %v1242_v50  ;;  %v1243_v58 = vadd.f32 %v1195_v54, %v749_v56 }
 0x1b6   :  { %v1172_v61 = vld [vmem:[%s2312_s2 + $0xa8] sm:$0xff] }
 0x1b7   :  { %v1196_v62 = vld [vmem:[%s2312_s2 + $0x168] sm:$0xff]  ;;  %v1220_v2 = vadd.f32 %v1172_v61, %v656_v63 }
 0x1b8   :  { %1267 = vst [vmem:[%s2314_s4 + $0xa0] sm:$0xff] %v1219_v57  ;;  %1291 = vst [vmem:[%s2314_s4 + $0x160] sm:$0xff] %v1243_v58  ;;  %v1244_v4 = vadd.f32 %v1196_v62, %v752_v0 }
 0x1bf   :  { %v1173_v7 = vld [vmem:[%s2312_s2 + $0xb0] sm:$0xff] }
 0x1c0   :  { %v1197_v8 = vld [vmem:[%s2312_s2 + $0x170] sm:$0xff]  ;;  %v1221_v11 = vadd.f32 %v1173_v7, %v661_v9 }
 0x1c1   :  { %1268 = vst [vmem:[%s2314_s4 + $0xa8] sm:$0xff] %v1220_v2  ;;  %1292 = vst [vmem:[%s2314_s4 + $0x168] sm:$0xff] %v1244_v4  ;;  %v1245_v12 = vadd.f32 %v1197_v8, %v757_v10 }
 0x1c8   :  { %v1174_v15 = vld [vmem:[%s2312_s2 + $0xb8] sm:$0xff] }
 0x1c9   :  { %v1198_v16 = vld [vmem:[%s2312_s2 + $0x178] sm:$0xff]  ;;  %v1222_v20 = vadd.f32 %v1174_v15, %v664_v17 }
 0x1ca   :  { %1269 = vst [vmem:[%s2314_s4 + $0xb0] sm:$0xff] %v1221_v11  ;;  %1293 = vst [vmem:[%s2314_s4 + $0x170] sm:$0xff] %v1245_v12  ;;  %v1246_v22 = vadd.f32 %v1198_v16, %v760_v18 }
 0x1cb   :  { %1270 = vst [vmem:[%s2314_s4 + $0xb8] sm:$0xff] %v1222_v20 }
 0x1cc   :  { %1294 = vst [vmem:[%s2314_s4 + $0x178] sm:$0xff] %v1246_v22 }
 0x1cd   :  { %1755 = shalt.err (!%p1752_p4)
}
 0x1ce   :  { %s1768_s7 = smov 64   ;;  %s1769_s8 = smov 4  }
 0x1cf   :  { %1306 = dma.vmem_to_hbm [thread:$0]  %s1301_s21, 3072, %s2313_s3, [#allocation4], %s1768_s7, %s1768_s7, %s1769_s8  }
 0x1d0   :  { %1764 = dma.done.wait [#allocation4], 3072  }
 0x1d1   :  { %1765 = vsyncadd [#allocation4], 4294964224 }
 0x1d2   :  { %1314 = vsyncpa [#allocation4], 1 }

// kernel: fwd.6
= control target key start
LH: loop header
LB: loop body
LE: loop exit
PB: predicated region body
PF: predicated region fallthrough
CT: control target
= control target key end

     0   :  { %v1728_v0 = vmov 0   ;;  %s2338_s1 = inlined_call_operand.vmem [shape: bf16[256,128], index: 1, kind: input, shape index: {}]   ;;  %s2339_s0 = inlined_call_operand.vmem [shape: bf16[384,256], index: 0, kind: input, shape index: {}]   ;;  %s2340_s2 = inlined_call_operand.vmem [shape: f32[384,128], index: 2, kind: input, shape index: {}, may-alias: {2,4}]   ;;  %s2341_s4 = inlined_call_operand.vmem [shape: f32[384,128], index: 4, kind: output, shape index: {1}, may-alias: {2,4}]   ;;  %s2342_s3 = inlined_call_operand.vmem [shape: bf16[384,128], index: 3, kind: output, shape index: {0}]  }
   0x1   :  { %538 = vmatprep.subr.bf16.mxu0 %v1728_v0  ;;  %1607 = vmatprep.subr.bf16.mxu1 %v1728_v0  ;;  %v1640_v1 = vld [vmem:[%s2338_s1 + $0x38] sm:$0xff]   ;;  %v1641_v2 = vld [vmem:[%s2338_s1 + $0x30] sm:$0xff]   ;;  %v1642_v3 = vld [vmem:[%s2338_s1 + $0x28] sm:$0xff]  }
   0x2   :  { %539 = vmatpush1.bf16.msra.mxu0 %v1640_v1  ;;  %1623 = vmatpush1.bf16.msra.mxu1 %v1640_v1  ;;  %v1643_v4 = vld [vmem:[%s2338_s1 + $0x20] sm:$0xff]   ;;  %v1644_v5 = vld [vmem:[%s2338_s1 + $0x18] sm:$0xff]   ;;  %v1645_v7 = vld [vmem:[%s2338_s1 + $0x10] sm:$0xff]  }
   0x3   :  { %540 = vmatprep.subr.bf16.mxu0 %v1728_v0  ;;  %1608 = vmatprep.subr.bf16.mxu1 %v1728_v0  ;;  %v1658_v6 = vld [vmem:[%s2339_s0 + $0x4] ss:$8 sps:$4 sm:$0xff]   ;;  %v1648_v11 = vld [vmem:[%s2338_s1 + $0x78] sm:$0xff]   ;;  %v1649_v12 = vld [vmem:[%s2338_s1 + $0x70] sm:$0xff]  }
   0x4   :  { %v1661_v8 = vld [vmem:[%s2339_s0 + $0xc4] ss:$8 sps:$4 sm:$0xff]   ;;  %570 = vmatprep.mubr.bf16.mxu0 %v1658_v6  ;;  %v1652_v15 = vld [vmem:[%s2338_s1 + $0x58] sm:$0xff]   ;;  %v1653_v16 = vld [vmem:[%s2338_s1 + $0x50] sm:$0xff]  }
   0x5   :  { %666 = vmatprep.mubr.bf16.mxu1 %v1661_v8  ;;  %v1646_v9 = vld [vmem:[%s2338_s1 + $0x8] sm:$0xff]   ;;  %v1647_v10 = vld [vmem:[%s2338_s1] sm:$0xff]   ;;  %v1662_v21 = vld [vmem:[%s2339_s0 + $0x14] ss:$8 sps:$4 sm:$0xff]  }
   0x6   :  { %541 = vmatpush1.bf16.msra.mxu0 %v1641_v2  ;;  %1624 = vmatpush1.bf16.msra.mxu1 %v1641_v2  ;;  %v1650_v13 = vld [vmem:[%s2338_s1 + $0x68] sm:$0xff]   ;;  %v1651_v14 = vld [vmem:[%s2338_s1 + $0x60] sm:$0xff]   ;;  %v1664_v22 = vld [vmem:[%s2339_s0 + $0xd4] ss:$8 sps:$4 sm:$0xff]  }
   0x7   :  { %542 = vmatprep.subr.bf16.mxu0 %v1728_v0  ;;  %1609 = vmatprep.subr.bf16.mxu1 %v1728_v0  ;;  %v1654_v17 = vld [vmem:[%s2338_s1 + $0x48] sm:$0xff]   ;;  %v1655_v18 = vld [vmem:[%s2338_s1 + $0x40] sm:$0xff]   ;;  %v1666_v23 = vld [vmem:[%s2339_s0 + $0x10] ss:$8 sps:$4 sm:$0xff]  }
   0x8   :  { %v1656_v19 = vld [vmem:[%s2339_s0] ss:$8 sps:$4 sm:$0xff]   ;;  %v1667_v24 = vld [vmem:[%s2339_s0 + $0xd0] ss:$8 sps:$4 sm:$0xff]   ;;  %v1668_v25 = vld [vmem:[%s2339_s0 + $0x24] ss:$8 sps:$4 sm:$0xff]  }
   0x9   :  { %v1659_v20 = vld [vmem:[%s2339_s0 + $0xc0] ss:$8 sps:$4 sm:$0xff]   ;;  %v1670_v26 = vld [vmem:[%s2339_s0 + $0xe4] ss:$8 sps:$4 sm:$0xff]   ;;  %v1674_v29 = vld [vmem:[%s2339_s0 + $0x34] ss:$8 sps:$4 sm:$0xff]  }
   0xa   :  { %543 = vmatpush1.bf16.msra.mxu0 %v1642_v3  ;;  %1625 = vmatpush1.bf16.msra.mxu1 %v1642_v3  ;;  %v1672_v27 = vld [vmem:[%s2339_s0 + $0x20] ss:$8 sps:$4 sm:$0xff]   ;;  %v1676_v30 = vld [vmem:[%s2339_s0 + $0xf4] ss:$8 sps:$4 sm:$0xff]   ;;  %v1678_v31 = vld [vmem:[%s2339_s0 + $0x30] ss:$8 sps:$4 sm:$0xff]  }
   0xb   :  { %544 = vmatprep.subr.bf16.mxu0 %v1728_v0  ;;  %1610 = vmatprep.subr.bf16.mxu1 %v1728_v0  ;;  %v1673_v28 = vld [vmem:[%s2339_s0 + $0xe0] ss:$8 sps:$4 sm:$0xff]   ;;  %v1679_v32 = vld [vmem:[%s2339_s0 + $0xf0] ss:$8 sps:$4 sm:$0xff]   ;;  %v1680_v33 = vld [vmem:[%s2339_s0 + $0x44] ss:$8 sps:$4 sm:$0xff]  }
   0xc   :  { %v1682_v34 = vld [vmem:[%s2339_s0 + $0x104] ss:$8 sps:$4 sm:$0xff]   ;;  %v1684_v35 = vld [vmem:[%s2339_s0 + $0x40] ss:$8 sps:$4 sm:$0xff]   ;;  %v1686_v37 = vld [vmem:[%s2339_s0 + $0x54] ss:$8 sps:$4 sm:$0xff]  }
   0xd   :  { %v1685_v36 = vld [vmem:[%s2339_s0 + $0x100] ss:$8 sps:$4 sm:$0xff]   ;;  %v1688_v38 = vld [vmem:[%s2339_s0 + $0x114] ss:$8 sps:$4 sm:$0xff]   ;;  %v1690_v39 = vld [vmem:[%s2339_s0 + $0x50] ss:$8 sps:$4 sm:$0xff]  }
   0xe   :  { %545 = vmatpush1.bf16.msra.mxu0 %v1643_v4  ;;  %1626 = vmatpush1.bf16.msra.mxu1 %v1643_v4  ;;  %v1691_v40 = vld [vmem:[%s2339_s0 + $0x110] ss:$8 sps:$4 sm:$0xff]   ;;  %v1692_v41 = vld [vmem:[%s2339_s0 + $0x64] ss:$8 sps:$4 sm:$0xff]   ;;  %v1696_v43 = vld [vmem:[%s2339_s0 + $0x60] ss:$8 sps:$4 sm:$0xff]  }
   0xf   :  { %546 = vmatprep.subr.bf16.mxu0 %v1728_v0  ;;  %1611 = vmatprep.subr.bf16.mxu1 %v1728_v0  ;;  %v1694_v42 = vld [vmem:[%s2339_s0 + $0x124] ss:$8 sps:$4 sm:$0xff]   ;;  %v1697_v44 = vld [vmem:[%s2339_s0 + $0x120] ss:$8 sps:$4 sm:$0xff]   ;;  %v1698_v45 = vld [vmem:[%s2339_s0 + $0x74] ss:$8 sps:$4 sm:$0xff]  }
  0x10   :  { %v1700_v46 = vld [vmem:[%s2339_s0 + $0x134] ss:$8 sps:$4 sm:$0xff]   ;;  %v1702_v47 = vld [vmem:[%s2339_s0 + $0x70] ss:$8 sps:$4 sm:$0xff]   ;;  %v1704_v49 = vld [vmem:[%s2339_s0 + $0x84] ss:$8 sps:$4 sm:$0xff]  }
  0x11   :  { %v1703_v48 = vld [vmem:[%s2339_s0 + $0x130] ss:$8 sps:$4 sm:$0xff]   ;;  %v1706_v50 = vld [vmem:[%s2339_s0 + $0x144] ss:$8 sps:$4 sm:$0xff]   ;;  %v1708_v51 = vld [vmem:[%s2339_s0 + $0x80] ss:$8 sps:$4 sm:$0xff]  }
  0x12   :  { %547 = vmatpush1.bf16.msra.mxu0 %v1644_v5  ;;  %1627 = vmatpush1.bf16.msra.mxu1 %v1644_v5  ;;  %v1709_v52 = vld [vmem:[%s2339_s0 + $0x140] ss:$8 sps:$4 sm:$0xff]   ;;  %v1710_v53 = vld [vmem:[%s2339_s0 + $0x94] ss:$8 sps:$4 sm:$0xff]   ;;  %v1714_v55 = vld [vmem:[%s2339_s0 + $0x90] ss:$8 sps:$4 sm:$0xff]  }
  0x13   :  { %548 = vmatprep.subr.bf16.mxu0 %v1728_v0  ;;  %1612 = vmatprep.subr.bf16.mxu1 %v1728_v0  ;;  %v1712_v54 = vld [vmem:[%s2339_s0 + $0x154] ss:$8 sps:$4 sm:$0xff]   ;;  %v1715_v56 = vld [vmem:[%s2339_s0 + $0x150] ss:$8 sps:$4 sm:$0xff]   ;;  %v1716_v57 = vld [vmem:[%s2339_s0 + $0xa4] ss:$8 sps:$4 sm:$0xff]  }
  0x14   :  { %v1718_v58 = vld [vmem:[%s2339_s0 + $0x164] ss:$8 sps:$4 sm:$0xff]   ;;  %v1720_v59 = vld [vmem:[%s2339_s0 + $0xa0] ss:$8 sps:$4 sm:$0xff]   ;;  %v1722_v61 = vld [vmem:[%s2339_s0 + $0xb4] ss:$8 sps:$4 sm:$0xff]  }
  0x15   :  { %v1721_v60 = vld [vmem:[%s2339_s0 + $0x160] ss:$8 sps:$4 sm:$0xff]   ;;  %v1724_v62 = vld [vmem:[%s2339_s0 + $0x174] ss:$8 sps:$4 sm:$0xff]   ;;  %v1726_v63 = vld [vmem:[%s2339_s0 + $0xb0] ss:$8 sps:$4 sm:$0xff]  }
  0x16   :  { %549 = vmatpush1.bf16.msra.mxu0 %v1645_v7  ;;  %1628 = vmatpush1.bf16.msra.mxu1 %v1645_v7  ;;  %v1150_v1 = vld [vmem:[%s2340_s2] sm:$0xff] }
  0x17   :  { %550 = vmatprep.subr.bf16.mxu0 %v1728_v0  ;;  %1613 = vmatprep.subr.bf16.mxu1 %v1728_v0  ;;  %v1174_v2 = vld [vmem:[%s2340_s2 + $0xc0] sm:$0xff] }
  0x1a   :  { %551 = vmatpush1.bf16.msra.mxu0 %v1646_v9  ;;  %1629 = vmatpush1.bf16.msra.mxu1 %v1646_v9  ;;  %v1151_v9 = vld [vmem:[%s2340_s2 + $0x8] sm:$0xff] }
  0x1b   :  { %552 = vmatprep.subr.bf16.mxu0 %v1728_v0  ;;  %1614 = vmatprep.subr.bf16.mxu1 %v1728_v0 }
  0x1e   :  { %553 = vmatpush1.bf16.msra.mxu0 %v1647_v10  ;;  %1630 = vmatpush1.bf16.msra.mxu1 %v1647_v10  ;;  %v1175_v10 = vld [vmem:[%s2340_s2 + $0xc8] sm:$0xff] }
  0x1f   :  { %554 = vmatprep.subr.bf16.mxu0 %v1728_v0  ;;  %1615 = vmatprep.subr.bf16.mxu1 %v1728_v0 }
  0x22   :  { %555 = vmatpush2.bf16.msra.mxu0 %v1648_v11  ;;  %1631 = vmatpush2.bf16.msra.mxu1 %v1648_v11 }
  0x23   :  { %556 = vmatprep.subr.bf16.mxu0 %v1728_v0  ;;  %1616 = vmatprep.subr.bf16.mxu1 %v1728_v0 }
  0x26   :  { %557 = vmatpush2.bf16.msra.mxu0 %v1649_v12  ;;  %1632 = vmatpush2.bf16.msra.mxu1 %v1649_v12 }
  0x27   :  { %558 = vmatprep.subr.bf16.mxu0 %v1728_v0  ;;  %1617 = vmatprep.subr.bf16.mxu1 %v1728_v0 }
  0x2a   :  { %559 = vmatpush2.bf16.msra.mxu0 %v1650_v13  ;;  %1633 = vmatpush2.bf16.msra.mxu1 %v1650_v13 }
  0x2b   :  { %560 = vmatprep.subr.bf16.mxu0 %v1728_v0  ;;  %1618 = vmatprep.subr.bf16.mxu1 %v1728_v0 }
  0x2e   :  { %561 = vmatpush2.bf16.msra.mxu0 %v1651_v14  ;;  %1634 = vmatpush2.bf16.msra.mxu1 %v1651_v14 }
  0x2f   :  { %562 = vmatprep.subr.bf16.mxu0 %v1728_v0  ;;  %1619 = vmatprep.subr.bf16.mxu1 %v1728_v0 }
  0x32   :  { %563 = vmatpush2.bf16.msra.mxu0 %v1652_v15  ;;  %1635 = vmatpush2.bf16.msra.mxu1 %v1652_v15 }
  0x33   :  { %564 = vmatprep.subr.bf16.mxu0 %v1728_v0  ;;  %1620 = vmatprep.subr.bf16.mxu1 %v1728_v0 }
  0x36   :  { %565 = vmatpush2.bf16.msra.mxu0 %v1653_v16  ;;  %1636 = vmatpush2.bf16.msra.mxu1 %v1653_v16 }
  0x37   :  { %566 = vmatprep.subr.bf16.mxu0 %v1728_v0  ;;  %1621 = vmatprep.subr.bf16.mxu1 %v1728_v0 }
  0x3a   :  { %567 = vmatpush2.bf16.msra.mxu0 %v1654_v17  ;;  %1637 = vmatpush2.bf16.msra.mxu1 %v1654_v17 }
  0x3b   :  { %568 = vmatprep.subr.bf16.mxu0 %v1728_v0  ;;  %1622 = vmatprep.subr.bf16.mxu1 %v1728_v0  ;;  %v1727_v0 = vld [vmem:[%s2339_s0 + $0x170] ss:$8 sps:$4 sm:$0xff]  }
  0x3e   :  { %569 = vmatpush2.bf16.msra.mxu0 %v1655_v18  ;;  %1638 = vmatpush2.bf16.msra.mxu1 %v1655_v18 }
  0x41   :  { %571 = vmatmul.mubr.bf16.vlgmr.msra.gmra.mxu0 %v1656_v19  ;;  %667 = vmatmul.mubr.bf16.vlgmr.msra.gmra.mxu1 %v1659_v20 }
  0x42   :  { %578 = vmatprep.mubr.bf16.mxu0 %v1662_v21  ;;  %674 = vmatprep.mubr.bf16.mxu1 %v1664_v22 }
  0x49   :  { %579 = vmatmul.mubr.bf16.gmra.mxu0 %v1666_v23  ;;  %675 = vmatmul.mubr.bf16.gmra.mxu1 %v1667_v24 }
  0x4a   :  { %586 = vmatprep.mubr.bf16.mxu0 %v1668_v25  ;;  %682 = vmatprep.mubr.bf16.mxu1 %v1670_v26 }
  0x51   :  { %587 = vmatmul.mubr.bf16.gmra.mxu0 %v1672_v27  ;;  %683 = vmatmul.mubr.bf16.gmra.mxu1 %v1673_v28 }
  0x52   :  { %594 = vmatprep.mubr.bf16.mxu0 %v1674_v29  ;;  %690 = vmatprep.mubr.bf16.mxu1 %v1676_v30 }
  0x59   :  { %595 = vmatmul.mubr.bf16.gmra.mxu0 %v1678_v31  ;;  %691 = vmatmul.mubr.bf16.gmra.mxu1 %v1679_v32 }
  0x5a   :  { %602 = vmatprep.mubr.bf16.mxu0 %v1680_v33  ;;  %698 = vmatprep.mubr.bf16.mxu1 %v1682_v34 }
  0x61   :  { %603 = vmatmul.mubr.bf16.gmra.mxu0 %v1684_v35  ;;  %699 = vmatmul.mubr.bf16.gmra.mxu1 %v1685_v36 }
  0x62   :  { %610 = vmatprep.mubr.bf16.mxu0 %v1686_v37  ;;  %706 = vmatprep.mubr.bf16.mxu1 %v1688_v38 }
  0x69   :  { %611 = vmatmul.mubr.bf16.gmra.mxu0 %v1690_v39  ;;  %707 = vmatmul.mubr.bf16.gmra.mxu1 %v1691_v40 }
  0x6a   :  { %618 = vmatprep.mubr.bf16.mxu0 %v1692_v41  ;;  %714 = vmatprep.mubr.bf16.mxu1 %v1694_v42 }
  0x71   :  { %619 = vmatmul.mubr.bf16.gmra.mxu0 %v1696_v43  ;;  %715 = vmatmul.mubr.bf16.gmra.mxu1 %v1697_v44 }
  0x72   :  { %626 = vmatprep.mubr.bf16.mxu0 %v1698_v45  ;;  %722 = vmatprep.mubr.bf16.mxu1 %v1700_v46 }
  0x79   :  { %627 = vmatmul.mubr.bf16.gmra.mxu0 %v1702_v47  ;;  %723 = vmatmul.mubr.bf16.gmra.mxu1 %v1703_v48 }
  0x7a   :  { %634 = vmatprep.mubr.bf16.mxu0 %v1704_v49  ;;  %730 = vmatprep.mubr.bf16.mxu1 %v1706_v50 }
  0x81   :  { %635 = vmatmul.mubr.bf16.gmra.mxu0 %v1708_v51  ;;  %731 = vmatmul.mubr.bf16.gmra.mxu1 %v1709_v52 }
  0x82   :  { %642 = vmatprep.mubr.bf16.mxu0 %v1710_v53  ;;  %738 = vmatprep.mubr.bf16.mxu1 %v1712_v54 }
  0x89   :  { %643 = vmatmul.mubr.bf16.gmra.mxu0 %v1714_v55  ;;  %739 = vmatmul.mubr.bf16.gmra.mxu1 %v1715_v56 }
  0x8a   :  { %650 = vmatprep.mubr.bf16.mxu0 %v1716_v57  ;;  %746 = vmatprep.mubr.bf16.mxu1 %v1718_v58 }
  0x91   :  { %651 = vmatmul.mubr.bf16.gmra.mxu0 %v1720_v59  ;;  %747 = vmatmul.mubr.bf16.gmra.mxu1 %v1721_v60 }
  0x92   :  { %658 = vmatprep.mubr.bf16.mxu0 %v1722_v61  ;;  %754 = vmatprep.mubr.bf16.mxu1 %v1724_v62 }
  0x99   :  { %659 = vmatmul.mubr.bf16.gmra.mxu0 %v1726_v63  ;;  %755 = vmatmul.mubr.bf16.gmra.mxu1 %v1727_v0 }
 0x101   :  { %v572_v3 = vpop.f32.mrf.mxu0  ;;  %v668_v4 = vpop.f32.mrf.mxu1 }
 0x102   :  { %v1198_v5 = vadd.f32 %v1150_v1, %v572_v3  ;;  %v1222_v6 = vadd.f32 %v1174_v2, %v668_v4 }
 0x103   :  { %v574_v7 = vpop.f32.mrf.mxu0  ;;  %v670_v8 = vpop.f32.mrf.mxu1 }
 0x104   :  { %1246 = vst [vmem:[%s2341_s4] sm:$0xff] %v1198_v5  ;;  %1270 = vst [vmem:[%s2341_s4 + $0xc0] sm:$0xff] %v1222_v6 }
 0x105   :  { %v575_v11 = vpop.f32.mrf.mxu0  ;;  %v671_v12 = vpop.f32.mrf.mxu1 }
 0x106   :  { %v1467_v13 = vpack.c.bf16 %v575_v11, %v572_v3  ;;  %v1199_v14 = vadd.f32 %v1151_v9, %v575_v11  ;;  %v1527_v15 = vpack.c.bf16 %v671_v12, %v668_v4  ;;  %v1223_v16 = vadd.f32 %v1175_v10, %v671_v12 }
 0x107   :  { %v577_v17 = vpop.f32.mrf.mxu0  ;;  %v673_v18 = vpop.f32.mrf.mxu1 }
 0x108   :  { %1468 = vst [vmem:[%s2342_s3] sm:$0xff] %v1467_v13   ;;  %1595 = vst [vmem:[%s2342_s3 + $0x60] sm:$0xff] %v1527_v15  }
 0x109   :  { %v580_v21 = vpop.f32.mrf.mxu0  ;;  %v676_v22 = vpop.f32.mrf.mxu1 }
 0x10b   :  { %v1152_v19 = vld [vmem:[%s2340_s2 + $0x10] sm:$0xff]  ;;  %v582_v25 = vpop.f32.mrf.mxu0  ;;  %v678_v26 = vpop.f32.mrf.mxu1 }
 0x10c   :  { %v1176_v20 = vld [vmem:[%s2340_s2 + $0xd0] sm:$0xff]  ;;  %v1200_v23 = vadd.f32 %v1152_v19, %v580_v21 }
 0x10d   :  { %1247 = vst [vmem:[%s2341_s4 + $0x8] sm:$0xff] %v1199_v14  ;;  %1271 = vst [vmem:[%s2341_s4 + $0xc8] sm:$0xff] %v1223_v16  ;;  %v1224_v24 = vadd.f32 %v1176_v20, %v676_v22  ;;  %v583_v29 = vpop.f32.mrf.mxu0  ;;  %v679_v30 = vpop.f32.mrf.mxu1 }
 0x10e   :  { %v1472_v31 = vpack.c.bf16 %v583_v29, %v580_v21  ;;  %v1532_v33 = vpack.c.bf16 %v679_v30, %v676_v22 }
 0x10f   :  { %v585_v35 = vpop.f32.mrf.mxu0  ;;  %v681_v36 = vpop.f32.mrf.mxu1 }
 0x110   :  { %1584 = vst [vmem:[%s2342_s3 + $0x8] sm:$0xff] %v1472_v31   ;;  %1596 = vst [vmem:[%s2342_s3 + $0x68] sm:$0xff] %v1532_v33  }
 0x111   :  { %v588_v39 = vpop.f32.mrf.mxu0  ;;  %v684_v40 = vpop.f32.mrf.mxu1 }
 0x113   :  { %v590_v43 = vpop.f32.mrf.mxu0  ;;  %v686_v44 = vpop.f32.mrf.mxu1 }
 0x114   :  { %v1153_v27 = vld [vmem:[%s2340_s2 + $0x18] sm:$0xff] }
 0x115   :  { %v1177_v28 = vld [vmem:[%s2340_s2 + $0xd8] sm:$0xff]  ;;  %v1201_v32 = vadd.f32 %v1153_v27, %v583_v29  ;;  %v591_v47 = vpop.f32.mrf.mxu0  ;;  %v687_v48 = vpop.f32.mrf.mxu1 }
 0x116   :  { %1248 = vst [vmem:[%s2341_s4 + $0x10] sm:$0xff] %v1200_v23  ;;  %1272 = vst [vmem:[%s2341_s4 + $0xd0] sm:$0xff] %v1224_v24  ;;  %v1225_v34 = vadd.f32 %v1177_v28, %v679_v30  ;;  %v1477_v49 = vpack.c.bf16 %v591_v47, %v588_v39  ;;  %v1537_v51 = vpack.c.bf16 %v687_v48, %v684_v40 }
 0x117   :  { %v593_v53 = vpop.f32.mrf.mxu0  ;;  %v689_v54 = vpop.f32.mrf.mxu1 }
 0x118   :  { %1585 = vst [vmem:[%s2342_s3 + $0x10] sm:$0xff] %v1477_v49   ;;  %1597 = vst [vmem:[%s2342_s3 + $0x70] sm:$0xff] %v1537_v51  }
 0x119   :  { %v596_v57 = vpop.f32.mrf.mxu0  ;;  %v692_v58 = vpop.f32.mrf.mxu1 }
 0x11b   :  { %v598_v61 = vpop.f32.mrf.mxu0  ;;  %v694_v62 = vpop.f32.mrf.mxu1 }
 0x11d   :  { %v1154_v37 = vld [vmem:[%s2340_s2 + $0x20] sm:$0xff]  ;;  %v599_v1 = vpop.f32.mrf.mxu0  ;;  %v695_v2 = vpop.f32.mrf.mxu1 }
 0x11e   :  { %v1178_v38 = vld [vmem:[%s2340_s2 + $0xe0] sm:$0xff]  ;;  %v1202_v41 = vadd.f32 %v1154_v37, %v588_v39  ;;  %v1482_v3 = vpack.c.bf16 %v599_v1, %v596_v57  ;;  %v1542_v5 = vpack.c.bf16 %v695_v2, %v692_v58 }
 0x11f   :  { %1249 = vst [vmem:[%s2341_s4 + $0x18] sm:$0xff] %v1201_v32  ;;  %1273 = vst [vmem:[%s2341_s4 + $0xd8] sm:$0xff] %v1225_v34  ;;  %v1226_v42 = vadd.f32 %v1178_v38, %v684_v40  ;;  %v601_v7 = vpop.f32.mrf.mxu0  ;;  %v697_v8 = vpop.f32.mrf.mxu1 }
 0x120   :  { %1586 = vst [vmem:[%s2342_s3 + $0x18] sm:$0xff] %v1482_v3   ;;  %1598 = vst [vmem:[%s2342_s3 + $0x78] sm:$0xff] %v1542_v5  }
 0x121   :  { %v604_v11 = vpop.f32.mrf.mxu0  ;;  %v700_v12 = vpop.f32.mrf.mxu1 }
 0x123   :  { %v606_v15 = vpop.f32.mrf.mxu0  ;;  %v702_v16 = vpop.f32.mrf.mxu1 }
 0x125   :  { %v607_v19 = vpop.f32.mrf.mxu0  ;;  %v703_v20 = vpop.f32.mrf.mxu1 }
 0x126   :  { %v1155_v45 = vld [vmem:[%s2340_s2 + $0x28] sm:$0xff]  ;;  %v1487_v21 = vpack.c.bf16 %v607_v19, %v604_v11  ;;  %v1547_v23 = vpack.c.bf16 %v703_v20, %v700_v12 }
 0x127   :  { %v1179_v46 = vld [vmem:[%s2340_s2 + $0xe8] sm:$0xff]  ;;  %v1203_v50 = vadd.f32 %v1155_v45, %v591_v47  ;;  %v609_v25 = vpop.f32.mrf.mxu0  ;;  %v705_v26 = vpop.f32.mrf.mxu1 }
 0x128   :  { %1250 = vst [vmem:[%s2341_s4 + $0x20] sm:$0xff] %v1202_v41  ;;  %1274 = vst [vmem:[%s2341_s4 + $0xe0] sm:$0xff] %v1226_v42  ;;  %v1227_v52 = vadd.f32 %v1179_v46, %v687_v48 }
 0x129   :  { %1587 = vst [vmem:[%s2342_s3 + $0x20] sm:$0xff] %v1487_v21   ;;  %1599 = vst [vmem:[%s2342_s3 + $0x80] sm:$0xff] %v1547_v23   ;;  %v612_v29 = vpop.f32.mrf.mxu0  ;;  %v708_v30 = vpop.f32.mrf.mxu1 }
 0x12b   :  { %v614_v33 = vpop.f32.mrf.mxu0  ;;  %v710_v34 = vpop.f32.mrf.mxu1 }
 0x12d   :  { %v615_v37 = vpop.f32.mrf.mxu0  ;;  %v711_v38 = vpop.f32.mrf.mxu1 }
 0x12e   :  { %v1492_v39 = vpack.c.bf16 %v615_v37, %v612_v29  ;;  %v1552_v41 = vpack.c.bf16 %v711_v38, %v708_v30 }
 0x12f   :  { %v1156_v55 = vld [vmem:[%s2340_s2 + $0x30] sm:$0xff]  ;;  %v617_v43 = vpop.f32.mrf.mxu0  ;;  %v713_v44 = vpop.f32.mrf.mxu1 }
 0x130   :  { %v1180_v56 = vld [vmem:[%s2340_s2 + $0xf0] sm:$0xff]  ;;  %v1204_v59 = vadd.f32 %v1156_v55, %v596_v57  ;;  %1588 = vst [vmem:[%s2342_s3 + $0x28] sm:$0xff] %v1492_v39   ;;  %1600 = vst [vmem:[%s2342_s3 + $0x88] sm:$0xff] %v1552_v41  }
 0x131   :  { %1251 = vst [vmem:[%s2341_s4 + $0x28] sm:$0xff] %v1203_v50  ;;  %1275 = vst [vmem:[%s2341_s4 + $0xe8] sm:$0xff] %v1227_v52  ;;  %v1228_v60 = vadd.f32 %v1180_v56, %v692_v58  ;;  %v620_v47 = vpop.f32.mrf.mxu0  ;;  %v716_v48 = vpop.f32.mrf.mxu1 }
 0x133   :  { %v622_v51 = vpop.f32.mrf.mxu0  ;;  %v718_v52 = vpop.f32.mrf.mxu1 }
 0x135   :  { %v623_v55 = vpop.f32.mrf.mxu0  ;;  %v719_v56 = vpop.f32.mrf.mxu1 }
 0x136   :  { %v1497_v57 = vpack.c.bf16 %v623_v55, %v620_v47 }
 0x137   :  { %v625_v61 = vpop.f32.mrf.mxu0  ;;  %v721_v62 = vpop.f32.mrf.mxu1 }
 0x138   :  { %v1157_v63 = vld [vmem:[%s2340_s2 + $0x38] sm:$0xff]  ;;  %1589 = vst [vmem:[%s2342_s3 + $0x30] sm:$0xff] %v1497_v57  }
 0x139   :  { %v1181_v0 = vld [vmem:[%s2340_s2 + $0xf8] sm:$0xff]  ;;  %v1205_v4 = vadd.f32 %v1157_v63, %v599_v1  ;;  %v628_v1 = vpop.f32.mrf.mxu0 }
 0x13a   :  { %1252 = vst [vmem:[%s2341_s4 + $0x30] sm:$0xff] %v1204_v59  ;;  %1276 = vst [vmem:[%s2341_s4 + $0xf0] sm:$0xff] %v1228_v60  ;;  %v1229_v6 = vadd.f32 %v1181_v0, %v695_v2  ;;  %v1557_v59 = vpack.c.bf16 %v719_v56, %v716_v48  ;;  %v724_v2 = vpop.f32.mrf.mxu1 }
 0x13b   :  { %v630_v5 = vpop.f32.mrf.mxu0 }
 0x13c   :  { %1601 = vst [vmem:[%s2342_s3 + $0x90] sm:$0xff] %v1557_v59  }
 0x141   :  { %v1158_v9 = vld [vmem:[%s2340_s2 + $0x40] sm:$0xff] }
 0x142   :  { %v1182_v10 = vld [vmem:[%s2340_s2 + $0x100] sm:$0xff]  ;;  %v1206_v13 = vadd.f32 %v1158_v9, %v604_v11  ;;  %v631_v9 = vpop.f32.mrf.mxu0 }
 0x143   :  { %1253 = vst [vmem:[%s2341_s4 + $0x38] sm:$0xff] %v1205_v4  ;;  %1277 = vst [vmem:[%s2341_s4 + $0xf8] sm:$0xff] %v1229_v6  ;;  %v1230_v14 = vadd.f32 %v1182_v10, %v700_v12  ;;  %v726_v6 = vpop.f32.mrf.mxu1  ;;  %v1502_v11 = vpack.c.bf16 %v631_v9, %v628_v1 }
 0x144   :  { %v633_v15 = vpop.f32.mrf.mxu0 }
 0x145   :  { %v727_v10 = vpop.f32.mrf.mxu1  ;;  %1590 = vst [vmem:[%s2342_s3 + $0x38] sm:$0xff] %v1502_v11  }
 0x147   :  { %v729_v16 = vpop.f32.mrf.mxu1 }
 0x14a   :  { %v1159_v17 = vld [vmem:[%s2340_s2 + $0x48] sm:$0xff] }
 0x14b   :  { %v1183_v18 = vld [vmem:[%s2340_s2 + $0x108] sm:$0xff]  ;;  %v1207_v22 = vadd.f32 %v1159_v17, %v607_v19  ;;  %v636_v19 = vpop.f32.mrf.mxu0 }
 0x14c   :  { %1254 = vst [vmem:[%s2341_s4 + $0x40] sm:$0xff] %v1206_v13  ;;  %1278 = vst [vmem:[%s2341_s4 + $0x100] sm:$0xff] %v1230_v14  ;;  %v1231_v24 = vadd.f32 %v1183_v18, %v703_v20  ;;  %v1562_v13 = vpack.c.bf16 %v727_v10, %v724_v2  ;;  %v732_v20 = vpop.f32.mrf.mxu1 }
 0x14d   :  { %v638_v23 = vpop.f32.mrf.mxu0 }
 0x14e   :  { %1602 = vst [vmem:[%s2342_s3 + $0x98] sm:$0xff] %v1562_v13  }
 0x153   :  { %v1160_v27 = vld [vmem:[%s2340_s2 + $0x50] sm:$0xff] }
 0x154   :  { %v1184_v28 = vld [vmem:[%s2340_s2 + $0x110] sm:$0xff]  ;;  %v1208_v31 = vadd.f32 %v1160_v27, %v612_v29  ;;  %v639_v27 = vpop.f32.mrf.mxu0 }
 0x155   :  { %1255 = vst [vmem:[%s2341_s4 + $0x48] sm:$0xff] %v1207_v22  ;;  %1279 = vst [vmem:[%s2341_s4 + $0x108] sm:$0xff] %v1231_v24  ;;  %v1232_v32 = vadd.f32 %v1184_v28, %v708_v30  ;;  %v734_v24 = vpop.f32.mrf.mxu1  ;;  %v1507_v29 = vpack.c.bf16 %v639_v27, %v636_v19 }
 0x156   :  { %v641_v33 = vpop.f32.mrf.mxu0 }
 0x157   :  { %v735_v28 = vpop.f32.mrf.mxu1  ;;  %1591 = vst [vmem:[%s2342_s3 + $0x40] sm:$0xff] %v1507_v29  }
 0x159   :  { %v737_v34 = vpop.f32.mrf.mxu1 }
 0x15c   :  { %v1161_v35 = vld [vmem:[%s2340_s2 + $0x58] sm:$0xff] }
 0x15d   :  { %v1185_v36 = vld [vmem:[%s2340_s2 + $0x118] sm:$0xff]  ;;  %v1209_v40 = vadd.f32 %v1161_v35, %v615_v37  ;;  %v644_v37 = vpop.f32.mrf.mxu0 }
 0x15e   :  { %1256 = vst [vmem:[%s2341_s4 + $0x50] sm:$0xff] %v1208_v31  ;;  %1280 = vst [vmem:[%s2341_s4 + $0x110] sm:$0xff] %v1232_v32  ;;  %v1233_v42 = vadd.f32 %v1185_v36, %v711_v38  ;;  %v1567_v31 = vpack.c.bf16 %v735_v28, %v732_v20  ;;  %v740_v38 = vpop.f32.mrf.mxu1 }
 0x15f   :  { %v646_v41 = vpop.f32.mrf.mxu0 }
 0x160   :  { %1603 = vst [vmem:[%s2342_s3 + $0xa0] sm:$0xff] %v1567_v31  }
 0x165   :  { %v1162_v45 = vld [vmem:[%s2340_s2 + $0x60] sm:$0xff] }
 0x166   :  { %v1186_v46 = vld [vmem:[%s2340_s2 + $0x120] sm:$0xff]  ;;  %v1210_v49 = vadd.f32 %v1162_v45, %v620_v47  ;;  %v647_v45 = vpop.f32.mrf.mxu0 }
 0x167   :  { %1257 = vst [vmem:[%s2341_s4 + $0x58] sm:$0xff] %v1209_v40  ;;  %1281 = vst [vmem:[%s2341_s4 + $0x118] sm:$0xff] %v1233_v42  ;;  %v1234_v50 = vadd.f32 %v1186_v46, %v716_v48  ;;  %v742_v42 = vpop.f32.mrf.mxu1  ;;  %v1512_v47 = vpack.c.bf16 %v647_v45, %v644_v37 }
 0x168   :  { %v649_v51 = vpop.f32.mrf.mxu0 }
 0x169   :  { %v743_v46 = vpop.f32.mrf.mxu1  ;;  %1592 = vst [vmem:[%s2342_s3 + $0x48] sm:$0xff] %v1512_v47  }
 0x16b   :  { %v745_v52 = vpop.f32.mrf.mxu1 }
 0x16e   :  { %v1163_v53 = vld [vmem:[%s2340_s2 + $0x68] sm:$0xff] }
 0x16f   :  { %v1187_v54 = vld [vmem:[%s2340_s2 + $0x128] sm:$0xff]  ;;  %v1211_v58 = vadd.f32 %v1163_v53, %v623_v55  ;;  %v652_v55 = vpop.f32.mrf.mxu0 }
 0x170   :  { %1258 = vst [vmem:[%s2341_s4 + $0x60] sm:$0xff] %v1210_v49  ;;  %1282 = vst [vmem:[%s2341_s4 + $0x120] sm:$0xff] %v1234_v50  ;;  %v1235_v60 = vadd.f32 %v1187_v54, %v719_v56  ;;  %v1572_v49 = vpack.c.bf16 %v743_v46, %v740_v38  ;;  %v748_v56 = vpop.f32.mrf.mxu1 }
 0x171   :  { %v654_v59 = vpop.f32.mrf.mxu0 }
 0x172   :  { %1604 = vst [vmem:[%s2342_s3 + $0xa8] sm:$0xff] %v1572_v49  }
 0x177   :  { %v1164_v63 = vld [vmem:[%s2340_s2 + $0x70] sm:$0xff] }
 0x178   :  { %v1188_v0 = vld [vmem:[%s2340_s2 + $0x130] sm:$0xff]  ;;  %v1212_v3 = vadd.f32 %v1164_v63, %v628_v1  ;;  %v655_v63 = vpop.f32.mrf.mxu0 }
 0x179   :  { %1259 = vst [vmem:[%s2341_s4 + $0x68] sm:$0xff] %v1211_v58  ;;  %1283 = vst [vmem:[%s2341_s4 + $0x128] sm:$0xff] %v1235_v60  ;;  %v1236_v4 = vadd.f32 %v1188_v0, %v724_v2  ;;  %v750_v60 = vpop.f32.mrf.mxu1  ;;  %v1517_v1 = vpack.c.bf16 %v655_v63, %v652_v55 }
 0x17a   :  { %v657_v5 = vpop.f32.mrf.mxu0 }
 0x17b   :  { %v751_v0 = vpop.f32.mrf.mxu1  ;;  %1593 = vst [vmem:[%s2342_s3 + $0x50] sm:$0xff] %v1517_v1  }
 0x17d   :  { %v753_v6 = vpop.f32.mrf.mxu1 }
 0x180   :  { %v1165_v7 = vld [vmem:[%s2340_s2 + $0x78] sm:$0xff] }
 0x181   :  { %v1189_v8 = vld [vmem:[%s2340_s2 + $0x138] sm:$0xff]  ;;  %v1213_v12 = vadd.f32 %v1165_v7, %v631_v9  ;;  %v660_v9 = vpop.f32.mrf.mxu0 }
 0x182   :  { %1260 = vst [vmem:[%s2341_s4 + $0x70] sm:$0xff] %v1212_v3  ;;  %1284 = vst [vmem:[%s2341_s4 + $0x130] sm:$0xff] %v1236_v4  ;;  %v1237_v14 = vadd.f32 %v1189_v8, %v727_v10  ;;  %v1577_v3 = vpack.c.bf16 %v751_v0, %v748_v56  ;;  %v756_v10 = vpop.f32.mrf.mxu1 }
 0x183   :  { %v662_v13 = vpop.f32.mrf.mxu0 }
 0x184   :  { %1605 = vst [vmem:[%s2342_s3 + $0xb0] sm:$0xff] %v1577_v3  }
 0x189   :  { %v1166_v17 = vld [vmem:[%s2340_s2 + $0x80] sm:$0xff] }
 0x18a   :  { %v1190_v18 = vld [vmem:[%s2340_s2 + $0x140] sm:$0xff]  ;;  %v1214_v21 = vadd.f32 %v1166_v17, %v636_v19  ;;  %v663_v17 = vpop.f32.mrf.mxu0 }
 0x18b   :  { %1261 = vst [vmem:[%s2341_s4 + $0x78] sm:$0xff] %v1213_v12  ;;  %1285 = vst [vmem:[%s2341_s4 + $0x138] sm:$0xff] %v1237_v14  ;;  %v1238_v22 = vadd.f32 %v1190_v18, %v732_v20  ;;  %v758_v14 = vpop.f32.mrf.mxu1  ;;  %v1522_v19 = vpack.c.bf16 %v663_v17, %v660_v9 }
 0x18c   :  { %v665_v23 = vpop.f32.mrf.mxu0 }
 0x18d   :  { %v759_v18 = vpop.f32.mrf.mxu1  ;;  %1594 = vst [vmem:[%s2342_s3 + $0x58] sm:$0xff] %v1522_v19  }
 0x18f   :  { %v761_v24 = vpop.f32.mrf.mxu1 }
 0x192   :  { %v1167_v25 = vld [vmem:[%s2340_s2 + $0x88] sm:$0xff] }
 0x193   :  { %v1191_v26 = vld [vmem:[%s2340_s2 + $0x148] sm:$0xff]  ;;  %v1215_v30 = vadd.f32 %v1167_v25, %v639_v27 }
 0x194   :  { %1262 = vst [vmem:[%s2341_s4 + $0x80] sm:$0xff] %v1214_v21  ;;  %1286 = vst [vmem:[%s2341_s4 + $0x140] sm:$0xff] %v1238_v22  ;;  %v1239_v32 = vadd.f32 %v1191_v26, %v735_v28  ;;  %v1582_v21 = vpack.c.bf16 %v759_v18, %v756_v10 }
 0x196   :  { %1606 = vst [vmem:[%s2342_s3 + $0xb8] sm:$0xff] %v1582_v21  }
 0x19b   :  { %v1168_v35 = vld [vmem:[%s2340_s2 + $0x90] sm:$0xff] }
 0x19c   :  { %v1192_v36 = vld [vmem:[%s2340_s2 + $0x150] sm:$0xff]  ;;  %v1216_v39 = vadd.f32 %v1168_v35, %v644_v37 }
 0x19d   :  { %1263 = vst [vmem:[%s2341_s4 + $0x88] sm:$0xff] %v1215_v30  ;;  %1287 = vst [vmem:[%s2341_s4 + $0x148] sm:$0xff] %v1239_v32  ;;  %v1240_v40 = vadd.f32 %v1192_v36, %v740_v38 }
 0x1a4   :  { %v1169_v43 = vld [vmem:[%s2340_s2 + $0x98] sm:$0xff] }
 0x1a5   :  { %v1193_v44 = vld [vmem:[%s2340_s2 + $0x158] sm:$0xff]  ;;  %v1217_v48 = vadd.f32 %v1169_v43, %v647_v45 }
 0x1a6   :  { %1264 = vst [vmem:[%s2341_s4 + $0x90] sm:$0xff] %v1216_v39  ;;  %1288 = vst [vmem:[%s2341_s4 + $0x150] sm:$0xff] %v1240_v40  ;;  %v1241_v50 = vadd.f32 %v1193_v44, %v743_v46 }
 0x1ad   :  { %v1170_v53 = vld [vmem:[%s2340_s2 + $0xa0] sm:$0xff] }
 0x1ae   :  { %v1194_v54 = vld [vmem:[%s2340_s2 + $0x160] sm:$0xff]  ;;  %v1218_v57 = vadd.f32 %v1170_v53, %v652_v55 }
 0x1af   :  { %1265 = vst [vmem:[%s2341_s4 + $0x98] sm:$0xff] %v1217_v48  ;;  %1289 = vst [vmem:[%s2341_s4 + $0x158] sm:$0xff] %v1241_v50  ;;  %v1242_v58 = vadd.f32 %v1194_v54, %v748_v56 }
 0x1b6   :  { %v1171_v61 = vld [vmem:[%s2340_s2 + $0xa8] sm:$0xff] }
 0x1b7   :  { %v1195_v62 = vld [vmem:[%s2340_s2 + $0x168] sm:$0xff]  ;;  %v1219_v2 = vadd.f32 %v1171_v61, %v655_v63 }
 0x1b8   :  { %1266 = vst [vmem:[%s2341_s4 + $0xa0] sm:$0xff] %v1218_v57  ;;  %1290 = vst [vmem:[%s2341_s4 + $0x160] sm:$0xff] %v1242_v58  ;;  %v1243_v4 = vadd.f32 %v1195_v62, %v751_v0 }
 0x1bf   :  { %v1172_v7 = vld [vmem:[%s2340_s2 + $0xb0] sm:$0xff] }
 0x1c0   :  { %v1196_v8 = vld [vmem:[%s2340_s2 + $0x170] sm:$0xff]  ;;  %v1220_v11 = vadd.f32 %v1172_v7, %v660_v9 }
 0x1c1   :  { %1267 = vst [vmem:[%s2341_s4 + $0xa8] sm:$0xff] %v1219_v2  ;;  %1291 = vst [vmem:[%s2341_s4 + $0x168] sm:$0xff] %v1243_v4  ;;  %v1244_v12 = vadd.f32 %v1196_v8, %v756_v10 }
 0x1c8   :  { %v1173_v15 = vld [vmem:[%s2340_s2 + $0xb8] sm:$0xff] }
 0x1c9   :  { %v1197_v16 = vld [vmem:[%s2340_s2 + $0x178] sm:$0xff]  ;;  %v1221_v20 = vadd.f32 %v1173_v15, %v663_v17 }
 0x1ca   :  { %1268 = vst [vmem:[%s2341_s4 + $0xb0] sm:$0xff] %v1220_v11  ;;  %1292 = vst [vmem:[%s2341_s4 + $0x170] sm:$0xff] %v1244_v12  ;;  %v1245_v22 = vadd.f32 %v1197_v16, %v759_v18 }
 0x1cb   :  { %1269 = vst [vmem:[%s2341_s4 + $0xb8] sm:$0xff] %v1221_v20 }
 0x1cc   :  { %1293 = vst [vmem:[%s2341_s4 + $0x178] sm:$0xff] %v1245_v22 }

// kernel: fwd.5
= control target key start
LH: loop header
LB: loop body
LE: loop exit
PB: predicated region body
PF: predicated region fallthrough
CT: control target
= control target key end

     0   :  { %s2334_s1 = inlined_call_operand.vmem [shape: bf16[384,128], index: 1, kind: input, shape index: {}]   ;;  %s2335_s0 = inlined_call_operand.vmem [shape: bf16[256,384], index: 0, kind: input, shape index: {}]   ;;  %s2336_s2 = inlined_call_operand.vmem [shape: f32[256,128], index: 2, kind: input, shape index: {}, may-alias: {2,4}]   ;;  %s2337_s4 = inlined_call_operand.vmem [shape: f32[256,128], index: 4, kind: output, shape index: {1}, may-alias: {2,4}]   ;;  %s2338_s3 = inlined_call_operand.vmem [shape: bf16[256,128], index: 3, kind: output, shape index: {0}]  }
   0x1   :  { %v1720_v0 = vld [vmem:[%s2334_s1 + $0x78] sm:$0xff]   ;;  %v1722_v2 = vld [vmem:[%s2334_s1 + $0x70] sm:$0xff]   ;;  %v1724_v4 = vld [vmem:[%s2334_s1 + $0x68] sm:$0xff]  }
   0x2   :  { %v1721_v1 = vld [vmem:[%s2334_s1 + $0x38] sm:$0xff]   ;;  %1520 = vmatprep.subr.bf16.mxu0 %v1720_v0  ;;  %1704 = vmatprep.subr.bf16.mxu1 %v1720_v0  ;;  %v1723_v3 = vld [vmem:[%s2334_s1 + $0x30] sm:$0xff]   ;;  %v1725_v5 = vld [vmem:[%s2334_s1 + $0x28] sm:$0xff]  }
   0x3   :  { %1521 = vmatpush3.bf16.msra.mxu0 %v1721_v1  ;;  %1712 = vmatpush3.bf16.msra.mxu1 %v1721_v1  ;;  %v1726_v6 = vld [vmem:[%s2334_s1 + $0x60] sm:$0xff]   ;;  %v1728_v8 = vld [vmem:[%s2334_s1 + $0x58] sm:$0xff]   ;;  %v1730_v10 = vld [vmem:[%s2334_s1 + $0x50] sm:$0xff]  }
   0x4   :  { %1522 = vmatprep.subr.bf16.mxu0 %v1722_v2  ;;  %1705 = vmatprep.subr.bf16.mxu1 %v1722_v2  ;;  %v1727_v7 = vld [vmem:[%s2334_s1 + $0x20] sm:$0xff]   ;;  %v1729_v9 = vld [vmem:[%s2334_s1 + $0x18] sm:$0xff]   ;;  %v1731_v13 = vld [vmem:[%s2334_s1 + $0x10] sm:$0xff]  }
   0x5   :  { %v1738_v11 = vld [vmem:[%s2335_s0 + $0x4] ss:$12 sps:$4 sm:$0xff]   ;;  %v1732_v14 = vld [vmem:[%s2334_s1 + $0x48] sm:$0xff]   ;;  %v1742_v18 = vld [vmem:[%s2334_s1 + $0xb8] sm:$0xff]  }
   0x6   :  { %v1741_v12 = vld [vmem:[%s2335_s0 + $0x124] ss:$12 sps:$4 sm:$0xff]   ;;  %634 = vmatprep.mubr.bf16.mxu0 %v1738_v11  ;;  %v1733_v15 = vld [vmem:[%s2334_s1 + $0x8] sm:$0xff]   ;;  %v1752_v28 = vld [vmem:[%s2335_s0 + $0x34] ss:$12 sps:$4 sm:$0xff]  }
   0x7   :  { %1523 = vmatpush3.bf16.msra.mxu0 %v1723_v3  ;;  %1713 = vmatpush3.bf16.msra.mxu1 %v1723_v3  ;;  %v1734_v16 = vld [vmem:[%s2334_s1 + $0x40] sm:$0xff]   ;;  %v1744_v21 = vld [vmem:[%s2335_s0 + $0x1c] ss:$12 sps:$4 sm:$0xff]   ;;  %v1743_v22 = vld [vmem:[%s2334_s1 + $0xb0] sm:$0xff]  }
   0x8   :  { %1524 = vmatprep.subr.bf16.mxu0 %v1724_v4  ;;  %1706 = vmatprep.subr.bf16.mxu1 %v1724_v4  ;;  %v1735_v17 = vld [vmem:[%s2334_s1] sm:$0xff]   ;;  %v1746_v23 = vld [vmem:[%s2335_s0 + $0x13c] ss:$12 sps:$4 sm:$0xff]   ;;  %v1759_v33 = vld [vmem:[%s2334_s1 + $0x90] sm:$0xff]  }
   0x9   :  { %730 = vmatprep.mubr.bf16.mxu1 %v1741_v12  ;;  %v1736_v19 = vld [vmem:[%s2335_s0] ss:$12 sps:$4 sm:$0xff]   ;;  %v1748_v24 = vld [vmem:[%s2335_s0 + $0x18] ss:$12 sps:$4 sm:$0xff]   ;;  %v1756_v31 = vld [vmem:[%s2335_s0 + $0x30] ss:$12 sps:$4 sm:$0xff]  }
   0xa   :  { %v1739_v20 = vld [vmem:[%s2335_s0 + $0x120] ss:$12 sps:$4 sm:$0xff]   ;;  %v1749_v26 = vld [vmem:[%s2335_s0 + $0x138] ss:$12 sps:$4 sm:$0xff]   ;;  %v1757_v32 = vld [vmem:[%s2335_s0 + $0x150] ss:$12 sps:$4 sm:$0xff]  }
   0xb   :  { %1525 = vmatpush3.bf16.msra.mxu0 %v1725_v5  ;;  %1714 = vmatpush3.bf16.msra.mxu1 %v1725_v5  ;;  %v1750_v25 = vld [vmem:[%s2334_s1 + $0xa8] sm:$0xff]   ;;  %v1751_v27 = vld [vmem:[%s2334_s1 + $0xa0] sm:$0xff]   ;;  %v1758_v30 = vld [vmem:[%s2334_s1 + $0x98] sm:$0xff]  }
   0xc   :  { %1526 = vmatprep.subr.bf16.mxu0 %v1726_v6  ;;  %1707 = vmatprep.subr.bf16.mxu1 %v1726_v6  ;;  %v1754_v29 = vld [vmem:[%s2335_s0 + $0x154] ss:$12 sps:$4 sm:$0xff]   ;;  %v1760_v34 = vld [vmem:[%s2335_s0 + $0x4c] ss:$12 sps:$4 sm:$0xff]   ;;  %v1768_v39 = vld [vmem:[%s2335_s0 + $0x64] ss:$12 sps:$4 sm:$0xff]  }
   0xd   :  { %v1762_v35 = vld [vmem:[%s2335_s0 + $0x16c] ss:$12 sps:$4 sm:$0xff]   ;;  %v1764_v37 = vld [vmem:[%s2335_s0 + $0x48] ss:$12 sps:$4 sm:$0xff]   ;;  %v1767_v40 = vld [vmem:[%s2334_s1 + $0x80] sm:$0xff]  }
   0xe   :  { %v1766_v36 = vld [vmem:[%s2334_s1 + $0x88] sm:$0xff]   ;;  %v1775_v45 = vld [vmem:[%s2335_s0 + $0x38] ss:$12 sps:$4 sm:$0xff]   ;;  %v1777_v47 = vld [vmem:[%s2335_s0 + $0x50] ss:$12 sps:$4 sm:$0xff]  }
   0xf   :  { %1527 = vmatpush3.bf16.msra.mxu0 %v1727_v7  ;;  %1715 = vmatpush3.bf16.msra.mxu1 %v1727_v7  ;;  %v1765_v38 = vld [vmem:[%s2335_s0 + $0x168] ss:$12 sps:$4 sm:$0xff]   ;;  %v1771_v42 = vld [vmem:[%s2335_s0 + $0x60] ss:$12 sps:$4 sm:$0xff]   ;;  %v1776_v46 = vld [vmem:[%s2335_s0 + $0x78] ss:$12 sps:$4 sm:$0xff]  }
  0x10   :  { %1528 = vmatprep.subr.bf16.mxu0 %v1728_v8  ;;  %1708 = vmatprep.subr.bf16.mxu1 %v1728_v8  ;;  %v1770_v41 = vld [vmem:[%s2335_s0 + $0x8] ss:$12 sps:$4 sm:$0xff]   ;;  %v1772_v43 = vld [vmem:[%s2335_s0 + $0x20] ss:$12 sps:$4 sm:$0xff]   ;;  %v1781_v50 = vld [vmem:[%s2335_s0 + $0x90] ss:$12 sps:$4 sm:$0xff]  }
  0x11   :  { %v1773_v44 = vld [vmem:[%s2335_s0 + $0x7c] ss:$12 sps:$4 sm:$0xff]   ;;  %v1778_v48 = vld [vmem:[%s2335_s0 + $0x94] ss:$12 sps:$4 sm:$0xff]   ;;  %v1783_v52 = vld [vmem:[%s2335_s0 + $0xac] ss:$12 sps:$4 sm:$0xff]  }
  0x12   :  { %v1780_v49 = vld [vmem:[%s2335_s0 + $0x68] ss:$12 sps:$4 sm:$0xff]   ;;  %v1782_v51 = vld [vmem:[%s2335_s0 + $0x80] ss:$12 sps:$4 sm:$0xff]   ;;  %v1785_v53 = vld [vmem:[%s2335_s0 + $0x98] ss:$12 sps:$4 sm:$0xff]  }
  0x13   :  { %1529 = vmatpush3.bf16.msra.mxu0 %v1729_v9  ;;  %1716 = vmatpush3.bf16.msra.mxu1 %v1729_v9  ;;  %v1786_v54 = vld [vmem:[%s2335_s0 + $0xa8] ss:$12 sps:$4 sm:$0xff]   ;;  %v1787_v55 = vld [vmem:[%s2335_s0 + $0xb0] ss:$12 sps:$4 sm:$0xff]   ;;  %v1791_v58 = vld [vmem:[%s2335_s0 + $0xc0] ss:$12 sps:$4 sm:$0xff]  }
  0x14   :  { %1530 = vmatprep.subr.bf16.mxu0 %v1730_v10  ;;  %1709 = vmatprep.subr.bf16.mxu1 %v1730_v10  ;;  %v1788_v56 = vld [vmem:[%s2335_s0 + $0xc4] ss:$12 sps:$4 sm:$0xff]   ;;  %v1790_v57 = vld [vmem:[%s2335_s0 + $0xc8] ss:$12 sps:$4 sm:$0xff]   ;;  %v1792_v59 = vld [vmem:[%s2335_s0 + $0xe0] ss:$12 sps:$4 sm:$0xff]  }
  0x15   :  { %v1793_v60 = vld [vmem:[%s2335_s0 + $0xdc] ss:$12 sps:$4 sm:$0xff]   ;;  %v1795_v61 = vld [vmem:[%s2335_s0 + $0xf8] ss:$12 sps:$4 sm:$0xff]   ;;  %v1798_v0 = vld [vmem:[%s2335_s0 + $0xf4] ss:$12 sps:$4 sm:$0xff]  }
  0x16   :  { %v1796_v62 = vld [vmem:[%s2335_s0 + $0xd8] ss:$12 sps:$4 sm:$0xff]   ;;  %v1797_v63 = vld [vmem:[%s2335_s0 + $0x110] ss:$12 sps:$4 sm:$0xff]   ;;  %v1800_v1 = vld [vmem:[%s2335_s0 + $0x128] ss:$12 sps:$4 sm:$0xff]  }
  0x17   :  { %1531 = vmatpush3.bf16.msra.mxu0 %v1731_v13  ;;  %1717 = vmatpush3.bf16.msra.mxu1 %v1731_v13  ;;  %v1801_v2 = vld [vmem:[%s2335_s0 + $0xf0] ss:$12 sps:$4 sm:$0xff]   ;;  %v1802_v3 = vld [vmem:[%s2335_s0 + $0x140] ss:$12 sps:$4 sm:$0xff]   ;;  %v1805_v5 = vld [vmem:[%s2335_s0 + $0x158] ss:$12 sps:$4 sm:$0xff]  }
  0x18   :  { %1532 = vmatprep.subr.bf16.mxu0 %v1732_v14  ;;  %1710 = vmatprep.subr.bf16.mxu1 %v1732_v14  ;;  %v1803_v4 = vld [vmem:[%s2335_s0 + $0x10c] ss:$12 sps:$4 sm:$0xff]   ;;  %v1806_v6 = vld [vmem:[%s2335_s0 + $0x108] ss:$12 sps:$4 sm:$0xff]   ;;  %v1807_v7 = vld [vmem:[%s2335_s0 + $0x170] ss:$12 sps:$4 sm:$0xff]  }
  0x1b   :  { %1533 = vmatpush3.bf16.msra.mxu0 %v1733_v15  ;;  %1718 = vmatpush3.bf16.msra.mxu1 %v1733_v15 }
  0x1c   :  { %1534 = vmatprep.subr.bf16.mxu0 %v1734_v16  ;;  %1711 = vmatprep.subr.bf16.mxu1 %v1734_v16 }
  0x1f   :  { %1535 = vmatpush3.bf16.msra.mxu0 %v1735_v17  ;;  %1719 = vmatpush3.bf16.msra.mxu1 %v1735_v17 }
  0x20   :  { %1656 = vmatprep.subr.bf16.mxu1 %v1742_v18 }
  0x22   :  { %635 = vmatmul.mubr.bf16.vlgmr.msra.gmra.mxu0 %v1736_v19  ;;  %731 = vmatmul.mubr.bf16.vlgmr.msra.gmra.mxu1 %v1739_v20 }
  0x23   :  { %1657 = vmatpush3.bf16.msra.mxu1 %v1742_v18  ;;  %642 = vmatprep.mubr.bf16.mxu0 %v1744_v21 }
  0x24   :  { %1658 = vmatprep.subr.bf16.mxu1 %v1743_v22  ;;  %738 = vmatprep.mubr.bf16.mxu1 %v1746_v23 }
  0x27   :  { %1659 = vmatpush3.bf16.msra.mxu1 %v1743_v22 }
  0x28   :  { %1660 = vmatprep.subr.bf16.mxu1 %v1750_v25 }
  0x2a   :  { %643 = vmatmul.mubr.bf16.gmra.mxu0 %v1748_v24  ;;  %739 = vmatmul.mubr.bf16.gmra.mxu1 %v1749_v26 }
  0x2b   :  { %1661 = vmatpush3.bf16.msra.mxu1 %v1750_v25  ;;  %650 = vmatprep.mubr.bf16.mxu0 %v1752_v28 }
  0x2c   :  { %1662 = vmatprep.subr.bf16.mxu1 %v1751_v27  ;;  %746 = vmatprep.mubr.bf16.mxu1 %v1754_v29 }
  0x2f   :  { %1663 = vmatpush3.bf16.msra.mxu1 %v1751_v27 }
  0x30   :  { %1664 = vmatprep.subr.bf16.mxu1 %v1758_v30 }
  0x32   :  { %651 = vmatmul.mubr.bf16.gmra.mxu0 %v1756_v31  ;;  %747 = vmatmul.mubr.bf16.gmra.mxu1 %v1757_v32 }
  0x33   :  { %1665 = vmatpush3.bf16.msra.mxu1 %v1758_v30  ;;  %658 = vmatprep.mubr.bf16.mxu0 %v1760_v34 }
  0x34   :  { %1666 = vmatprep.subr.bf16.mxu1 %v1759_v33  ;;  %754 = vmatprep.mubr.bf16.mxu1 %v1762_v35 }
  0x37   :  { %1667 = vmatpush3.bf16.msra.mxu1 %v1759_v33 }
  0x38   :  { %1668 = vmatprep.subr.bf16.mxu1 %v1766_v36 }
  0x3a   :  { %659 = vmatmul.mubr.bf16.gmra.mxu0 %v1764_v37  ;;  %755 = vmatmul.mubr.bf16.gmra.mxu1 %v1765_v38 }
  0x3b   :  { %1669 = vmatpush3.bf16.msra.mxu1 %v1766_v36  ;;  %666 = vmatprep.mubr.bf16.mxu0 %v1768_v39 }
  0x3c   :  { %1670 = vmatprep.subr.bf16.mxu1 %v1767_v40  ;;  %1672 = vmatprep.mubr.bf16.mxu1 %v1770_v41 }
  0x3f   :  { %1671 = vmatpush3.bf16.msra.mxu1 %v1767_v40 }
  0x42   :  { %667 = vmatmul.mubr.bf16.gmra.mxu0 %v1771_v42  ;;  %1673 = vmatmul.mubr.bf16.vlgmr.msra.gmra.mxu1 %v1772_v43 }
  0x43   :  { %674 = vmatprep.mubr.bf16.mxu0 %v1773_v44  ;;  %1676 = vmatprep.mubr.bf16.mxu1 %v1775_v45 }
  0x4a   :  { %675 = vmatmul.mubr.bf16.gmra.mxu0 %v1776_v46  ;;  %1677 = vmatmul.mubr.bf16.gmra.mxu1 %v1777_v47 }
  0x4b   :  { %682 = vmatprep.mubr.bf16.mxu0 %v1778_v48  ;;  %1680 = vmatprep.mubr.bf16.mxu1 %v1780_v49  ;;  %v1185_v49 = vld [vmem:[%s2336_s2 + $0x10] sm:$0xff] }
  0x52   :  { %683 = vmatmul.mubr.bf16.gmra.mxu0 %v1781_v50  ;;  %1681 = vmatmul.mubr.bf16.gmra.mxu1 %v1782_v51 }
  0x53   :  { %690 = vmatprep.mubr.bf16.mxu0 %v1783_v52  ;;  %1684 = vmatprep.mubr.bf16.mxu1 %v1785_v53 }
  0x5a   :  { %691 = vmatmul.mubr.bf16.gmra.mxu0 %v1786_v54  ;;  %1685 = vmatmul.mubr.bf16.gmra.mxu1 %v1787_v55  ;;  %v1183_v54 = vld [vmem:[%s2336_s2] sm:$0xff] }
  0x5b   :  { %698 = vmatprep.mubr.bf16.mxu0 %v1788_v56  ;;  %1688 = vmatprep.mubr.bf16.mxu1 %v1790_v57 }
  0x62   :  { %699 = vmatmul.mubr.bf16.gmra.mxu0 %v1791_v58  ;;  %1689 = vmatmul.mubr.bf16.gmra.mxu1 %v1792_v59 }
  0x63   :  { %706 = vmatprep.mubr.bf16.mxu0 %v1793_v60  ;;  %1692 = vmatprep.mubr.bf16.mxu1 %v1795_v61  ;;  %v1186_v60 = vld [vmem:[%s2336_s2 + $0x18] sm:$0xff] }
  0x6a   :  { %707 = vmatmul.mubr.bf16.gmra.mxu0 %v1796_v62  ;;  %1693 = vmatmul.mubr.bf16.gmra.mxu1 %v1797_v63 }
  0x6b   :  { %714 = vmatprep.mubr.bf16.mxu0 %v1798_v0  ;;  %1696 = vmatprep.mubr.bf16.mxu1 %v1800_v1 }
  0x72   :  { %715 = vmatmul.mubr.bf16.gmra.mxu0 %v1801_v2  ;;  %1697 = vmatmul.mubr.bf16.gmra.mxu1 %v1802_v3 }
  0x73   :  { %722 = vmatprep.mubr.bf16.mxu0 %v1803_v4  ;;  %1700 = vmatprep.mubr.bf16.mxu1 %v1805_v5 }
  0x7a   :  { %723 = vmatmul.mubr.bf16.gmra.mxu0 %v1806_v6  ;;  %1701 = vmatmul.mubr.bf16.gmra.mxu1 %v1807_v7 }
  0xe2   :  { %v1536_v8 = vpop.f32.mrf.mxu0  ;;  %v1608_v9 = vpop.f32.mrf.mxu1 }
  0xe4   :  { %v1537_v10 = vpop.f32.mrf.mxu0  ;;  %v1609_v11 = vpop.f32.mrf.mxu1 }
  0xe5   :  { %v2049_v12 = vadd.f32 %v1609_v11, %v1608_v9  ;;  %v1538_v50 = vadd.f32 %v1537_v10, %v1536_v8 }
  0xe6   :  { %v1539_v13 = vpop.f32.mrf.mxu0  ;;  %v1611_v14 = vpop.f32.mrf.mxu1 }
  0xe8   :  { %v1540_v15 = vpop.f32.mrf.mxu0  ;;  %v1612_v16 = vpop.f32.mrf.mxu1 }
  0xe9   :  { %v2051_v17 = vadd.f32 %v1612_v16, %v1611_v14  ;;  %v1541_v61 = vadd.f32 %v1540_v15, %v1539_v13 }
  0xea   :  { %v1542_v18 = vpop.f32.mrf.mxu0  ;;  %v1614_v19 = vpop.f32.mrf.mxu1 }
  0xec   :  { %v1543_v20 = vpop.f32.mrf.mxu0  ;;  %v1615_v21 = vpop.f32.mrf.mxu1 }
  0xed   :  { %v2053_v22 = vadd.f32 %v1615_v21, %v1614_v19  ;;  %v1544_v46 = vadd.f32 %v1543_v20, %v1542_v18 }
  0xee   :  { %v1545_v23 = vpop.f32.mrf.mxu0  ;;  %v1617_v24 = vpop.f32.mrf.mxu1 }
  0xf0   :  { %v1546_v25 = vpop.f32.mrf.mxu0  ;;  %v1618_v26 = vpop.f32.mrf.mxu1 }
  0xf1   :  { %v2055_v27 = vadd.f32 %v1618_v26, %v1617_v24  ;;  %v1547_v55 = vadd.f32 %v1546_v25, %v1545_v23 }
  0xf2   :  { %v1548_v28 = vpop.f32.mrf.mxu0  ;;  %v1620_v29 = vpop.f32.mrf.mxu1 }
  0xf4   :  { %v1549_v30 = vpop.f32.mrf.mxu0  ;;  %v1621_v31 = vpop.f32.mrf.mxu1 }
  0xf5   :  { %v2057_v32 = vadd.f32 %v1621_v31, %v1620_v29  ;;  %v1550_v10 = vadd.f32 %v1549_v30, %v1548_v28 }
  0xf6   :  { %v2059_v33 = vpop.f32.mrf.mxu0  ;;  %v1623_v34 = vpop.f32.mrf.mxu1 }
  0xf8   :  { %v1552_v35 = vpop.f32.mrf.mxu0  ;;  %v1624_v36 = vpop.f32.mrf.mxu1 }
  0xf9   :  { %v2061_v37 = vadd.f32 %v1624_v36, %v1623_v34  ;;  %v1553_v26 = vadd.f32 %v1552_v35, %v2059_v33 }
  0xfa   :  { %v1554_v38 = vpop.f32.mrf.mxu0  ;;  %v2063_v39 = vpop.f32.mrf.mxu1 }
  0xfc   :  { %v1555_v40 = vpop.f32.mrf.mxu0  ;;  %v2065_v41 = vpop.f32.mrf.mxu1 }
  0xfd   :  { %v1556_v3 = vadd.f32 %v1555_v40, %v1554_v38 }
  0xfe   :  { %v1557_v42 = vpop.f32.mrf.mxu0  ;;  %v2067_v43 = vpop.f32.mrf.mxu1 }
 0x100   :  { %v1558_v44 = vpop.f32.mrf.mxu0  ;;  %v2069_v45 = vpop.f32.mrf.mxu1 }
 0x101   :  { %v1559_v19 = vadd.f32 %v1558_v44, %v1557_v42 }
 0x102   :  { %v2071_v47 = vpop.f32.mrf.mxu0  ;;  %v1674_v48 = vpop.f32.mrf.mxu1 }
 0x103   :  { %v806_v51 = vadd.f32 %v1674_v48, %v1544_v46 }
 0x104   :  { %v1561_v52 = vpop.f32.mrf.mxu0  ;;  %v797_v53 = vpop.f32.mrf.mxu1 }
 0x105   :  { %v1217_v56 = vadd.f32 %v1185_v49, %v806_v51  ;;  %v798_v57 = vadd.f32 %v1538_v50, %v797_v53  ;;  %v1562_v46 = vadd.f32 %v1561_v52, %v2071_v47 }
 0x106   :  { %v2079_v58 = vpop.f32.mrf.mxu0  ;;  %v1675_v59 = vpop.f32.mrf.mxu1 }
 0x107   :  { %1249 = vst [vmem:[%s2337_s4 + $0x10] sm:$0xff] %v1217_v56  ;;  %v1215_v62 = vadd.f32 %v1183_v54, %v798_v57  ;;  %v809_v63 = vadd.f32 %v1675_v59, %v1547_v55 }
 0x108   :  { %v1564_v0 = vpop.f32.mrf.mxu0  ;;  %v800_v1 = vpop.f32.mrf.mxu1 }
 0x109   :  { %v1433_v4 = vpack.c.bf16 %v809_v63, %v806_v51  ;;  %v1218_v5 = vadd.f32 %v1186_v60, %v809_v63  ;;  %v801_v6 = vadd.f32 %v1541_v61, %v800_v1  ;;  %v1565_v60 = vadd.f32 %v1564_v0, %v2079_v58 }
 0x10a   :  { %v1566_v7 = vpop.f32.mrf.mxu0  ;;  %v1678_v8 = vpop.f32.mrf.mxu1 }
 0x10b   :  { %1505 = vst [vmem:[%s2338_s3 + $0x8] sm:$0xff] %v1433_v4   ;;  %v1428_v11 = vpack.c.bf16 %v801_v6, %v798_v57  ;;  %v822_v14 = vadd.f32 %v1678_v8, %v1556_v3 }
 0x10c   :  { %v1567_v15 = vpop.f32.mrf.mxu0  ;;  %v813_v16 = vpop.f32.mrf.mxu1 }
 0x10d   :  { %1429 = vst [vmem:[%s2338_s3] sm:$0xff] %v1428_v11   ;;  %v814_v21 = vadd.f32 %v1550_v10, %v813_v16  ;;  %v1568_v36 = vadd.f32 %v1567_v15, %v1566_v7 }
 0x10e   :  { %v1184_v2 = vld [vmem:[%s2336_s2 + $0x8] sm:$0xff]  ;;  %v1569_v23 = vpop.f32.mrf.mxu0  ;;  %v1679_v24 = vpop.f32.mrf.mxu1 }
 0x10f   :  { %1247 = vst [vmem:[%s2337_s4] sm:$0xff] %v1215_v62  ;;  %v1216_v13 = vadd.f32 %v1184_v2, %v801_v6  ;;  %v825_v29 = vadd.f32 %v1679_v24, %v1559_v19 }
 0x110   :  { %v1570_v30 = vpop.f32.mrf.mxu0  ;;  %v816_v31 = vpop.f32.mrf.mxu1 }
 0x111   :  { %v1443_v38 = vpack.c.bf16 %v825_v29, %v822_v14  ;;  %v817_v33 = vadd.f32 %v1553_v26, %v816_v31  ;;  %v1571_v55 = vadd.f32 %v1570_v30, %v1569_v23 }
 0x112   :  { %v1572_v35 = vpop.f32.mrf.mxu0  ;;  %v1682_v42 = vpop.f32.mrf.mxu1 }
 0x113   :  { %1507 = vst [vmem:[%s2338_s3 + $0x18] sm:$0xff] %v1443_v38   ;;  %v1438_v48 = vpack.c.bf16 %v817_v33, %v814_v21  ;;  %v838_v50 = vadd.f32 %v1682_v42, %v1568_v36 }
 0x114   :  { %v1573_v51 = vpop.f32.mrf.mxu0  ;;  %v829_v53 = vpop.f32.mrf.mxu1 }
 0x115   :  { %1506 = vst [vmem:[%s2338_s3 + $0x10] sm:$0xff] %v1438_v48   ;;  %v830_v52 = vadd.f32 %v1562_v46, %v829_v53  ;;  %v1574_v6 = vadd.f32 %v1573_v51, %v1572_v35 }
 0x116   :  { %v1189_v9 = vld [vmem:[%s2336_s2 + $0x30] sm:$0xff]  ;;  %v1575_v56 = vpop.f32.mrf.mxu0  ;;  %v1683_v57 = vpop.f32.mrf.mxu1 }
 0x117   :  { %1250 = vst [vmem:[%s2337_s4 + $0x18] sm:$0xff] %v1218_v5  ;;  %v1221_v20 = vadd.f32 %v1189_v9, %v822_v14  ;;  %v841_v62 = vadd.f32 %v1683_v57, %v1571_v55 }
 0x118   :  { %v1576_v63 = vpop.f32.mrf.mxu0  ;;  %v832_v1 = vpop.f32.mrf.mxu1 }
 0x119   :  { %v1453_v3 = vpack.c.bf16 %v841_v62, %v838_v50  ;;  %v833_v5 = vadd.f32 %v1565_v60, %v832_v1  ;;  %v1577_v19 = vadd.f32 %v1576_v63, %v1575_v56 }
 0x11a   :  { %v1578_v58 = vpop.f32.mrf.mxu0  ;;  %v1686_v0 = vpop.f32.mrf.mxu1 }
 0x11b   :  { %1509 = vst [vmem:[%s2338_s3 + $0x28] sm:$0xff] %v1453_v3   ;;  %v1448_v7 = vpack.c.bf16 %v833_v5, %v830_v52 }
 0x11c   :  { %v1579_v9 = vpop.f32.mrf.mxu0  ;;  %v845_v10 = vpop.f32.mrf.mxu1 }
 0x11d   :  { %1508 = vst [vmem:[%s2338_s3 + $0x20] sm:$0xff] %v1448_v7   ;;  %v846_v14 = vadd.f32 %v1574_v6, %v845_v10 }
 0x11e   :  { %v1187_v18 = vld [vmem:[%s2336_s2 + $0x20] sm:$0xff]  ;;  %v1581_v16 = vpop.f32.mrf.mxu0 }
 0x11f   :  { %1248 = vst [vmem:[%s2337_s4 + $0x8] sm:$0xff] %v1216_v13  ;;  %v1219_v28 = vadd.f32 %v1187_v18, %v814_v21  ;;  %v1580_v13 = vadd.f32 %v1579_v9, %v1578_v58  ;;  %v1687_v18 = vpop.f32.mrf.mxu1 }
 0x120   :  { %v1582_v23 = vpop.f32.mrf.mxu0 }
 0x121   :  { %v848_v24 = vpop.f32.mrf.mxu1 }
 0x122   :  { %v1584_v31 = vpop.f32.mrf.mxu0 }
 0x126   :  { %v1190_v25 = vld [vmem:[%s2336_s2 + $0x38] sm:$0xff] }
 0x127   :  { %1253 = vst [vmem:[%s2337_s4 + $0x30] sm:$0xff] %v1221_v20  ;;  %v1222_v40 = vadd.f32 %v1190_v25, %v825_v29  ;;  %v854_v20 = vadd.f32 %v1686_v0, %v1580_v13  ;;  %v849_v29 = vadd.f32 %v1577_v19, %v848_v24 }
 0x129   :  { %v1458_v38 = vpack.c.bf16 %v849_v29, %v846_v14 }
 0x12b   :  { %1510 = vst [vmem:[%s2338_s3 + $0x30] sm:$0xff] %v1458_v38  }
 0x12e   :  { %v1188_v34 = vld [vmem:[%s2336_s2 + $0x28] sm:$0xff] }
 0x12f   :  { %1251 = vst [vmem:[%s2337_s4 + $0x20] sm:$0xff] %v1219_v28  ;;  %v1220_v49 = vadd.f32 %v1188_v34, %v817_v33  ;;  %v1583_v28 = vadd.f32 %v1582_v23, %v1581_v16  ;;  %v1690_v34 = vpop.f32.mrf.mxu1  ;;  %v1585_v33 = vpop.f32.mrf.mxu0 }
 0x130   :  { %v1586_v46 = vadd.f32 %v1585_v33, %v1584_v31 }
 0x131   :  { %v857_v36 = vadd.f32 %v1687_v18, %v1583_v28  ;;  %v861_v35 = vpop.f32.mrf.mxu1 }
 0x132   :  { %v862_v51 = vadd.f32 %v1586_v46, %v861_v35 }
 0x133   :  { %v1463_v42 = vpack.c.bf16 %v857_v36, %v854_v20 }
 0x135   :  { %1511 = vst [vmem:[%s2338_s3 + $0x38] sm:$0xff] %v1463_v42  }
 0x136   :  { %v1193_v44 = vld [vmem:[%s2336_s2 + $0x50] sm:$0xff] }
 0x137   :  { %1254 = vst [vmem:[%s2337_s4 + $0x38] sm:$0xff] %v1222_v40  ;;  %v1225_v47 = vadd.f32 %v1193_v44, %v838_v50  ;;  %v1691_v50 = vpop.f32.mrf.mxu1 }
 0x13e   :  { %v1191_v54 = vld [vmem:[%s2336_s2 + $0x40] sm:$0xff] }
 0x13f   :  { %1252 = vst [vmem:[%s2337_s4 + $0x28] sm:$0xff] %v1220_v49  ;;  %v1223_v61 = vadd.f32 %v1191_v54, %v830_v52  ;;  %v1587_v49 = vpop.f32.mrf.mxu0  ;;  %v864_v54 = vpop.f32.mrf.mxu1 }
 0x141   :  { %v1588_v53 = vpop.f32.mrf.mxu0  ;;  %v2204_v57 = vpop.f32.mrf.mxu1 }
 0x143   :  { %v1590_v56 = vpop.f32.mrf.mxu0 }
 0x145   :  { %v1591_v60 = vpop.f32.mrf.mxu0 }
 0x146   :  { %v1194_v59 = vld [vmem:[%s2336_s2 + $0x58] sm:$0xff]  ;;  %v1592_v1 = vadd.f32 %v1591_v60, %v1590_v56 }
 0x147   :  { %1257 = vst [vmem:[%s2337_s4 + $0x50] sm:$0xff] %v1225_v47  ;;  %v1226_v4 = vadd.f32 %v1194_v59, %v841_v62  ;;  %v1589_v47 = vadd.f32 %v1588_v53, %v1587_v49  ;;  %v1593_v3 = vpop.f32.mrf.mxu0  ;;  %v1631_v49 = vadd.f32 %v2069_v45, %v2067_v43 }
 0x149   :  { %v865_v59 = vadd.f32 %v1589_v47, %v864_v54  ;;  %v1594_v58 = vpop.f32.mrf.mxu0 }
 0x14a   :  { %v1595_v7 = vadd.f32 %v1594_v58, %v1593_v3 }
 0x14b   :  { %v1468_v62 = vpack.c.bf16 %v865_v59, %v862_v51  ;;  %v1596_v9 = vpop.f32.mrf.mxu0 }
 0x14c   :  { %v873_v13 = vadd.f32 %v1691_v50, %v1595_v7 }
 0x14d   :  { %1512 = vst [vmem:[%s2338_s3 + $0x40] sm:$0xff] %v1468_v62  }
 0x14e   :  { %v1192_v2 = vld [vmem:[%s2336_s2 + $0x48] sm:$0xff] }
 0x14f   :  { %1255 = vst [vmem:[%s2337_s4 + $0x40] sm:$0xff] %v1223_v61  ;;  %1258 = vst [vmem:[%s2337_s4 + $0x58] sm:$0xff] %v1226_v4  ;;  %v1224_v8 = vadd.f32 %v1192_v2, %v833_v5  ;;  %v877_v61 = vpop.f32.mrf.mxu1  ;;  %v870_v5 = vadd.f32 %v1690_v34, %v1592_v1 }
 0x151   :  { %v2212_v4 = vpop.f32.mrf.mxu1  ;;  %v1473_v18 = vpack.c.bf16 %v873_v13, %v870_v5 }
 0x153   :  { %v880_v0 = vpop.f32.mrf.mxu1  ;;  %1513 = vst [vmem:[%s2338_s3 + $0x48] sm:$0xff] %v1473_v18  }
 0x155   :  { %v1698_v10 = vpop.f32.mrf.mxu1 }
 0x156   :  { %v1195_v11 = vld [vmem:[%s2336_s2 + $0x60] sm:$0xff] }
 0x157   :  { %1256 = vst [vmem:[%s2337_s4 + $0x48] sm:$0xff] %v1224_v8  ;;  %v1227_v21 = vadd.f32 %v1195_v11, %v846_v14  ;;  %v902_v14 = vadd.f32 %v1698_v10, %v2053_v22  ;;  %v893_v16 = vpop.f32.mrf.mxu1 }
 0x159   :  { %v1699_v28 = vpop.f32.mrf.mxu1 }
 0x15e   :  { %v1197_v15 = vld [vmem:[%s2336_s2 + $0x70] sm:$0xff]  ;;  %v1196_v25 = vld [vmem:[%s2336_s2 + $0x68] sm:$0xff] }
 0x15f   :  { %v1229_v26 = vadd.f32 %v1197_v15, %v854_v20  ;;  %1259 = vst [vmem:[%s2337_s4 + $0x60] sm:$0xff] %v1227_v21  ;;  %v1228_v40 = vadd.f32 %v1196_v25, %v849_v29  ;;  %v1597_v15 = vpop.f32.mrf.mxu0  ;;  %v894_v25 = vadd.f32 %v2049_v12, %v893_v16  ;;  %v905_v12 = vadd.f32 %v1699_v28, %v2055_v27 }
 0x160   :  { %v1598_v21 = vadd.f32 %v1597_v15, %v1596_v9 }
 0x162   :  { %v878_v29 = vadd.f32 %v1598_v21, %v877_v61 }
 0x166   :  { %v1198_v30 = vld [vmem:[%s2336_s2 + $0x78] sm:$0xff] }
 0x167   :  { %1261 = vst [vmem:[%s2337_s4 + $0x70] sm:$0xff] %v1229_v26  ;;  %v1230_v44 = vadd.f32 %v1198_v30, %v857_v36  ;;  %1260 = vst [vmem:[%s2337_s4 + $0x68] sm:$0xff] %v1228_v40  ;;  %v1599_v26 = vpop.f32.mrf.mxu0  ;;  %v1628_v30 = vadd.f32 %v2065_v41, %v2063_v39  ;;  %v896_v36 = vpop.f32.mrf.mxu1  ;;  %v1493_v40 = vpack.c.bf16 %v905_v12, %v902_v14 }
 0x168   :  { %v897_v39 = vadd.f32 %v2051_v17, %v896_v36 }
 0x169   :  { %v1600_v34 = vpop.f32.mrf.mxu0  ;;  %1517 = vst [vmem:[%s2338_s3 + $0x68] sm:$0xff] %v1493_v40  }
 0x16a   :  { %v1601_v35 = vadd.f32 %v1600_v34, %v1599_v26  ;;  %v1488_v50 = vpack.c.bf16 %v897_v39, %v894_v25 }
 0x16b   :  { %v1602_v41 = vpop.f32.mrf.mxu0 }
 0x16c   :  { %1516 = vst [vmem:[%s2338_s3 + $0x60] sm:$0xff] %v1488_v50  }
 0x16d   :  { %v1603_v53 = vpop.f32.mrf.mxu0 }
 0x16e   :  { %v1199_v48 = vld [vmem:[%s2336_s2 + $0x80] sm:$0xff]  ;;  %v1604_v56 = vadd.f32 %v1603_v53, %v1602_v41 }
 0x16f   :  { %1262 = vst [vmem:[%s2337_s4 + $0x78] sm:$0xff] %v1230_v44  ;;  %v1231_v55 = vadd.f32 %v1199_v48, %v862_v51  ;;  %v1702_v44 = vpop.f32.mrf.mxu1  ;;  %v881_v48 = vadd.f32 %v1601_v35, %v880_v0  ;;  %v1605_v60 = vpop.f32.mrf.mxu0 }
 0x170   :  { %v918_v17 = vadd.f32 %v1702_v44, %v1628_v30 }
 0x171   :  { %v909_v54 = vpop.f32.mrf.mxu1 }
 0x172   :  { %v910_v45 = vadd.f32 %v2057_v32, %v909_v54  ;;  %v886_v32 = vadd.f32 %v2204_v57, %v1604_v56 }
 0x173   :  { %v1703_v61 = vpop.f32.mrf.mxu1 }
 0x175   :  { %v912_v3 = vpop.f32.mrf.mxu1 }
 0x176   :  { %v1200_v52 = vld [vmem:[%s2336_s2 + $0x88] sm:$0xff] }
 0x177   :  { %1263 = vst [vmem:[%s2337_s4 + $0x80] sm:$0xff] %v1231_v55  ;;  %v1232_v63 = vadd.f32 %v1200_v52, %v865_v59  ;;  %v1478_v55 = vpack.c.bf16 %v881_v48, %v878_v29 }
 0x179   :  { %1514 = vst [vmem:[%s2338_s3 + $0x50] sm:$0xff] %v1478_v55  }
 0x17e   :  { %v1201_v2 = vld [vmem:[%s2336_s2 + $0x90] sm:$0xff] }
 0x17f   :  { %1264 = vst [vmem:[%s2337_s4 + $0x88] sm:$0xff] %v1232_v63  ;;  %v1233_v6 = vadd.f32 %v1201_v2, %v870_v5  ;;  %v921_v63 = vadd.f32 %v1703_v61, %v1631_v49  ;;  %v1606_v2 = vpop.f32.mrf.mxu0 }
 0x181   :  { %v1503_v58 = vpack.c.bf16 %v921_v63, %v918_v17 }
 0x183   :  { %1519 = vst [vmem:[%s2338_s3 + $0x78] sm:$0xff] %v1503_v58  }
 0x186   :  { %v1202_v8 = vld [vmem:[%s2336_s2 + $0x98] sm:$0xff]  ;;  %v1209_v11 = vld [vmem:[%s2336_s2 + $0xd0] sm:$0xff] }
 0x187   :  { %1265 = vst [vmem:[%s2337_s4 + $0x90] sm:$0xff] %v1233_v6  ;;  %v1234_v19 = vadd.f32 %v1202_v8, %v873_v13  ;;  %v1241_v20 = vadd.f32 %v1209_v11, %v902_v14  ;;  %v1607_v6 = vadd.f32 %v1606_v2, %v1605_v60  ;;  %v913_v8 = vadd.f32 %v2061_v37, %v912_v3 }
 0x189   :  { %v889_v9 = vadd.f32 %v2212_v4, %v1607_v6  ;;  %v1498_v10 = vpack.c.bf16 %v913_v8, %v910_v45 }
 0x18b   :  { %v1483_v13 = vpack.c.bf16 %v889_v9, %v886_v32  ;;  %1518 = vst [vmem:[%s2338_s3 + $0x70] sm:$0xff] %v1498_v10  }
 0x18d   :  { %1515 = vst [vmem:[%s2338_s3 + $0x58] sm:$0xff] %v1483_v13  }
 0x18e   :  { %v1207_v23 = vld [vmem:[%s2336_s2 + $0xc0] sm:$0xff]  ;;  %v1210_v22 = vld [vmem:[%s2336_s2 + $0xd8] sm:$0xff] }
 0x18f   :  { %v1203_v24 = vld [vmem:[%s2336_s2 + $0xa0] sm:$0xff]  ;;  %v1239_v31 = vadd.f32 %v1207_v23, %v894_v25  ;;  %v1242_v33 = vadd.f32 %v1210_v22, %v905_v12 }
 0x190   :  { %1266 = vst [vmem:[%s2337_s4 + $0x98] sm:$0xff] %v1234_v19  ;;  %1273 = vst [vmem:[%s2337_s4 + $0xd0] sm:$0xff] %v1241_v20  ;;  %v1235_v38 = vadd.f32 %v1203_v24, %v878_v29 }
 0x197   :  { %v1208_v42 = vld [vmem:[%s2336_s2 + $0xc8] sm:$0xff] }
 0x198   :  { %1271 = vst [vmem:[%s2337_s4 + $0xc0] sm:$0xff] %v1239_v31  ;;  %v1240_v51 = vadd.f32 %v1208_v42, %v897_v39 }
 0x19f   :  { %v1204_v27 = vld [vmem:[%s2336_s2 + $0xa8] sm:$0xff]  ;;  %v1213_v46 = vld [vmem:[%s2336_s2 + $0xf0] sm:$0xff] }
 0x1a0   :  { %1267 = vst [vmem:[%s2337_s4 + $0xa0] sm:$0xff] %v1235_v38  ;;  %1274 = vst [vmem:[%s2337_s4 + $0xd8] sm:$0xff] %v1242_v33  ;;  %v1236_v47 = vadd.f32 %v1204_v27, %v881_v48  ;;  %v1245_v52 = vadd.f32 %v1213_v46, %v918_v17 }
 0x1a7   :  { %v1211_v59 = vld [vmem:[%s2336_s2 + $0xe0] sm:$0xff] }
 0x1a8   :  { %1272 = vst [vmem:[%s2337_s4 + $0xc8] sm:$0xff] %v1240_v51  ;;  %v1243_v1 = vadd.f32 %v1211_v59, %v910_v45 }
 0x1af   :  { %v1205_v43 = vld [vmem:[%s2336_s2 + $0xb0] sm:$0xff]  ;;  %v1214_v62 = vld [vmem:[%s2336_s2 + $0xf8] sm:$0xff] }
 0x1b0   :  { %1268 = vst [vmem:[%s2337_s4 + $0xa8] sm:$0xff] %v1236_v47  ;;  %1277 = vst [vmem:[%s2337_s4 + $0xf0] sm:$0xff] %v1245_v52  ;;  %v1237_v5 = vadd.f32 %v1205_v43, %v886_v32  ;;  %v1246_v0 = vadd.f32 %v1214_v62, %v921_v63 }
 0x1b7   :  { %v1212_v7 = vld [vmem:[%s2336_s2 + $0xe8] sm:$0xff] }
 0x1b8   :  { %1275 = vst [vmem:[%s2337_s4 + $0xe0] sm:$0xff] %v1243_v1  ;;  %v1244_v11 = vadd.f32 %v1212_v7, %v913_v8 }
 0x1bf   :  { %v1206_v57 = vld [vmem:[%s2336_s2 + $0xb8] sm:$0xff] }
 0x1c0   :  { %1269 = vst [vmem:[%s2337_s4 + $0xb0] sm:$0xff] %v1237_v5  ;;  %1278 = vst [vmem:[%s2337_s4 + $0xf8] sm:$0xff] %v1246_v0  ;;  %v1238_v14 = vadd.f32 %v1206_v57, %v889_v9 }
 0x1c1   :  { %1276 = vst [vmem:[%s2337_s4 + $0xe8] sm:$0xff] %v1244_v11 }
 0x1c2   :  { %1270 = vst [vmem:[%s2337_s4 + $0xb8] sm:$0xff] %v1238_v14 }

// kernel: fwd.9
= control target key start
LH: loop header
LB: loop body
LE: loop exit
PB: predicated region body
PF: predicated region fallthrough
CT: control target
= control target key end

     0   :  { %vm123_vm0 = vcmask 130112   ;;  %vm130_vm1 = vcmask 195712   ;;  %vm137_vm2 = vcmask 261312   ;;  %vm144_vm3 = vcmask 326912   ;;  %s699_s0 = inlined_call_operand.vmem [shape: f32[128,128], index: 0, kind: input, shape index: {}]   ;;  %s700_s2 = inlined_call_operand.vmem [shape: f32[128,128], index: 2, kind: input, shape index: {}]   ;;  %s701_s1 = inlined_call_operand.vmem [shape: f32[128,128], index: 1, kind: input, shape index: {}]   ;;  %s702_s4 = inlined_call_operand.vmem [shape: f32[1,128], index: 4, kind: output, shape index: {1}]   ;;  %s703_s3 = inlined_call_operand.vmem [shape: f32[1,128], index: 3, kind: output, shape index: {0}]  }
   0x1   :  { %v16_v0 = vld [vmem:[%s699_s0] sm:$0xff]  ;;  %v17_v5 = vld [vmem:[%s699_s0 + $0x8] sm:$0xff]  ;;  %v18_v10 = vld [vmem:[%s699_s0 + $0x10] sm:$0xff]  ;;  %vm151_vm4 = vcmask 392512   ;;  %vm158_vm5 = vcmask 458112   ;;  %vm165_vm6 = vcmask 523712  }
   0x2   :  { %v225_v1 = vld [vmem:[%s700_s2] sm:$0xff]  ;;  %v226_v6 = vld [vmem:[%s700_s2 + $0x8] sm:$0xff]  ;;  %v227_v11 = vld [vmem:[%s700_s2 + $0x10] sm:$0xff]  ;;  %vm172_vm7 = vcmask 589312   ;;  %vm179_vm8 = vcmask 654912   ;;  %vm186_vm9 = vcmask 720512  }
   0x3   :  { %v32_v2 = vld [vmem:[%s701_s1] sm:$0xff]  ;;  %v241_v3 = vmul.f32 %v225_v1, %v16_v0  ;;  %v33_v7 = vld [vmem:[%s701_s1 + $0x8] sm:$0xff]  ;;  %v242_v8 = vmul.f32 %v226_v6, %v17_v5  ;;  %v34_v12 = vld [vmem:[%s701_s1 + $0x10] sm:$0xff]  ;;  %v243_v13 = vmul.f32 %v227_v11, %v18_v10  ;;  %vm193_vm10 = vcmask 786112  }
   0x4   :  { %v48_v4 = vmul.f32 %v32_v2, %v16_v0  ;;  %v49_v9 = vmul.f32 %v33_v7, %v17_v5  ;;  %v50_v14 = vmul.f32 %v34_v12, %v18_v10  ;;  %v19_v15 = vld [vmem:[%s699_s0 + $0x18] sm:$0xff]  ;;  %v20_v20 = vld [vmem:[%s699_s0 + $0x20] sm:$0xff]  ;;  %v21_v25 = vld [vmem:[%s699_s0 + $0x28] sm:$0xff]  ;;  %vm200_vm11 = vcmask 851712  }
   0x5   :  { %257 = vadd.xlane.f32.xlu1 %v241_v3  ;;  %v228_v16 = vld [vmem:[%s700_s2 + $0x18] sm:$0xff]  ;;  %v229_v21 = vld [vmem:[%s700_s2 + $0x20] sm:$0xff]  ;;  %v230_v26 = vld [vmem:[%s700_s2 + $0x28] sm:$0xff]  ;;  %vm207_vm12 = vcmask 917312   ;;  %vm214_vm13 = vcmask 982912   ;;  %vm221_vm14 = vcmask 1048512  }
   0x6   :  { %64 = vadd.xlane.f32.xlu0 %v48_v4  ;;  %v35_v17 = vld [vmem:[%s701_s1 + $0x18] sm:$0xff]  ;;  %v244_v18 = vmul.f32 %v228_v16, %v19_v15  ;;  %v36_v22 = vld [vmem:[%s701_s1 + $0x20] sm:$0xff]  ;;  %v245_v23 = vmul.f32 %v229_v21, %v20_v20  ;;  %v37_v27 = vld [vmem:[%s701_s1 + $0x28] sm:$0xff]  ;;  %v246_v28 = vmul.f32 %v230_v26, %v21_v25 }
   0x7   :  { %v51_v19 = vmul.f32 %v35_v17, %v19_v15  ;;  %v52_v24 = vmul.f32 %v36_v22, %v20_v20  ;;  %v53_v29 = vmul.f32 %v37_v27, %v21_v25  ;;  %v22_v30 = vld [vmem:[%s699_s0 + $0x30] sm:$0xff]  ;;  %v23_v35 = vld [vmem:[%s699_s0 + $0x38] sm:$0xff]  ;;  %v24_v40 = vld [vmem:[%s699_s0 + $0x40] sm:$0xff] }
   0x8   :  { %v231_v31 = vld [vmem:[%s700_s2 + $0x30] sm:$0xff]  ;;  %v232_v36 = vld [vmem:[%s700_s2 + $0x38] sm:$0xff]  ;;  %v233_v41 = vld [vmem:[%s700_s2 + $0x40] sm:$0xff] }
   0x9   :  { %259 = vadd.xlane.f32.xlu1 %v242_v8  ;;  %v38_v32 = vld [vmem:[%s701_s1 + $0x30] sm:$0xff]  ;;  %v247_v33 = vmul.f32 %v231_v31, %v22_v30  ;;  %v39_v37 = vld [vmem:[%s701_s1 + $0x38] sm:$0xff]  ;;  %v248_v38 = vmul.f32 %v232_v36, %v23_v35  ;;  %v40_v42 = vld [vmem:[%s701_s1 + $0x40] sm:$0xff]  ;;  %v249_v43 = vmul.f32 %v233_v41, %v24_v40 }
   0xa   :  { %66 = vadd.xlane.f32.xlu0 %v49_v9  ;;  %v54_v34 = vmul.f32 %v38_v32, %v22_v30  ;;  %v55_v39 = vmul.f32 %v39_v37, %v23_v35  ;;  %v56_v44 = vmul.f32 %v40_v42, %v24_v40  ;;  %v25_v45 = vld [vmem:[%s699_s0 + $0x48] sm:$0xff]  ;;  %v26_v50 = vld [vmem:[%s699_s0 + $0x50] sm:$0xff]  ;;  %v27_v55 = vld [vmem:[%s699_s0 + $0x58] sm:$0xff]  ;;  %v112_v32 = vlaneseq }
   0xb   :  { %v234_v46 = vld [vmem:[%s700_s2 + $0x48] sm:$0xff]  ;;  %v235_v51 = vld [vmem:[%s700_s2 + $0x50] sm:$0xff]  ;;  %v236_v56 = vld [vmem:[%s700_s2 + $0x58] sm:$0xff] }
   0xc   :  { %v41_v47 = vld [vmem:[%s701_s1 + $0x48] sm:$0xff]  ;;  %v250_v48 = vmul.f32 %v234_v46, %v25_v45  ;;  %v42_v52 = vld [vmem:[%s701_s1 + $0x50] sm:$0xff]  ;;  %v251_v53 = vmul.f32 %v235_v51, %v26_v50  ;;  %v43_v57 = vld [vmem:[%s701_s1 + $0x58] sm:$0xff]  ;;  %v252_v58 = vmul.f32 %v236_v56, %v27_v55  ;;  %v113_v35 = vand.u32 127, %v112_v32 }
   0xd   :  { %261 = vadd.xlane.f32.xlu1 %v243_v13  ;;  %v57_v49 = vmul.f32 %v41_v47, %v25_v45  ;;  %v58_v54 = vmul.f32 %v42_v52, %v26_v50  ;;  %v59_v59 = vmul.f32 %v43_v57, %v27_v55  ;;  %v28_v60 = vld [vmem:[%s699_s0 + $0x60] sm:$0xff]  ;;  %v29_v1 = vld [vmem:[%s699_s0 + $0x68] sm:$0xff]  ;;  %v30_v6 = vld [vmem:[%s699_s0 + $0x70] sm:$0xff]  ;;  %v115_v36 = vshrl.u32 %v112_v32, 7 }
   0xe   :  { %68 = vadd.xlane.f32.xlu0 %v50_v14  ;;  %v237_v61 = vld [vmem:[%s700_s2 + $0x60] sm:$0xff]  ;;  %v238_v2 = vld [vmem:[%s700_s2 + $0x68] sm:$0xff]  ;;  %v239_v7 = vld [vmem:[%s700_s2 + $0x70] sm:$0xff]  ;;  %v118_v37 = vadd.s32 4294967288, %v113_v35  ;;  %v139_v42 = vadd.s32 4294967264, %v113_v35  ;;  %v153_v47 = vadd.s32 4294967248, %v113_v35 }
   0xf   :  { %v44_v62 = vld [vmem:[%s701_s1 + $0x60] sm:$0xff]  ;;  %v253_v63 = vmul.f32 %v237_v61, %v28_v60  ;;  %v45_v3 = vld [vmem:[%s701_s1 + $0x68] sm:$0xff]  ;;  %v254_v4 = vmul.f32 %v238_v2, %v29_v1  ;;  %v46_v8 = vld [vmem:[%s701_s1 + $0x70] sm:$0xff]  ;;  %v255_v9 = vmul.f32 %v239_v7, %v30_v6  ;;  %v167_v50 = vadd.s32 4294967232, %v113_v35 }
  0x10   :  { %v60_v0 = vmul.f32 %v44_v62, %v28_v60  ;;  %v61_v5 = vmul.f32 %v45_v3, %v29_v1  ;;  %v62_v10 = vmul.f32 %v46_v8, %v30_v6  ;;  %v31_v11 = vld [vmem:[%s699_s0 + $0x78] sm:$0xff]  ;;  %v121_v45 = vsub.s32 %v118_v37, %v115_v36 }
  0x11   :  { %263 = vadd.xlane.f32.xlu1 %v244_v18  ;;  %v240_v12 = vld [vmem:[%s700_s2 + $0x78] sm:$0xff]  ;;  %v174_v51 = vadd.s32 4294967224, %v113_v35  ;;  %v181_v55 = vadd.s32 4294967216, %v113_v35  ;;  %v188_v56 = vadd.s32 4294967208, %v113_v35  ;;  %v156_v60 = vsub.s32 %v153_v47, %v115_v36 }
  0x12   :  { %70 = vadd.xlane.f32.xlu0 %v51_v19  ;;  %v47_v13 = vld [vmem:[%s701_s1 + $0x78] sm:$0xff]  ;;  %v256_v14 = vmul.f32 %v240_v12, %v31_v11  ;;  %v607_v62 = vsub.s32 %v167_v50, %v115_v36  ;;  %v209_v2 = vadd.s32 4294967184, %v113_v35  ;;  %v216_v3 = vadd.s32 4294967176, %v113_v35 }
  0x13   :  { %v63_v15 = vmul.f32 %v47_v13, %v31_v11  ;;  %v617_v6 = vsub.s32 %v181_v55, %v115_v36  ;;  %v619_v7 = vsub.s32 %v188_v56, %v115_v36 }
  0x14   :  { %v633_v32 = vsub.s32 %v209_v2, %v115_v36 }
  0x15   :  { %265 = vadd.xlane.f32.xlu1 %v245_v23 }
  0x16   :  { %72 = vadd.xlane.f32.xlu0 %v52_v24 }
  0x19   :  { %267 = vadd.xlane.f32.xlu1 %v246_v28 }
  0x1a   :  { %74 = vadd.xlane.f32.xlu0 %v53_v29 }
  0x1d   :  { %269 = vadd.xlane.f32.xlu1 %v247_v33 }
  0x1e   :  { %76 = vadd.xlane.f32.xlu0 %v54_v34 }
  0x21   :  { %271 = vadd.xlane.f32.xlu1 %v248_v38  ;;  %v125_v38 = vadd.s32 4294967280, %v113_v35 }
  0x22   :  { %78 = vadd.xlane.f32.xlu0 %v55_v39  ;;  %v132_v39 = vadd.s32 4294967272, %v113_v35 }
  0x23   :  { %v128_v46 = vsub.s32 %v125_v38, %v115_v36 }
  0x25   :  { %273 = vadd.xlane.f32.xlu1 %v249_v43  ;;  %v116_v43 = vsub.s32 %v113_v35, %v115_v36 }
  0x26   :  { %80 = vadd.xlane.f32.xlu0 %v56_v44  ;;  %v146_v44 = vadd.s32 4294967256, %v113_v35 }
  0x28   :  { %v149_v57 = vsub.s32 %v146_v44, %v115_v36 }
  0x29   :  { %275 = vadd.xlane.f32.xlu1 %v250_v48  ;;  %v160_v48 = vadd.s32 4294967240, %v113_v35 }
  0x2a   :  { %82 = vadd.xlane.f32.xlu0 %v57_v49  ;;  %v135_v49 = vsub.s32 %v132_v39, %v115_v36 }
  0x2b   :  { %v163_v61 = vsub.s32 %v160_v48, %v115_v36 }
  0x2d   :  { %277 = vadd.xlane.f32.xlu1 %v251_v53 }
  0x2e   :  { %84 = vadd.xlane.f32.xlu0 %v58_v54  ;;  %v142_v54 = vsub.s32 %v139_v42, %v115_v36 }
  0x31   :  { %279 = vadd.xlane.f32.xlu1 %v252_v58  ;;  %v195_v58 = vadd.s32 4294967200, %v113_v35 }
  0x32   :  { %86 = vadd.xlane.f32.xlu0 %v59_v59  ;;  %v202_v59 = vadd.s32 4294967192, %v113_v35  ;;  %v635_v35 = vsub.s32 %v216_v3, %v115_v36 }
  0x34   :  { %v625_v11 = vsub.s32 %v202_v59, %v115_v36 }
  0x35   :  { %281 = vadd.xlane.f32.xlu1 %v253_v63  ;;  %v609_v63 = vsub.s32 %v174_v51, %v115_v36 }
  0x36   :  { %88 = vadd.xlane.f32.xlu0 %v60_v0 }
  0x39   :  { %283 = vadd.xlane.f32.xlu1 %v254_v4 }
  0x3a   :  { %90 = vadd.xlane.f32.xlu0 %v61_v5 }
  0x3d   :  { %285 = vadd.xlane.f32.xlu1 %v255_v9 }
  0x3e   :  { %92 = vadd.xlane.f32.xlu0 %v62_v10  ;;  %v623_v10 = vsub.s32 %v195_v58, %v115_v36 }
  0x41   :  { %287 = vadd.xlane.f32.xlu1 %v256_v14 }
  0x42   :  { %94 = vadd.xlane.f32.xlu0 %v63_v15 }
  0x8e   :  { %v563_v16 = vpop.xlane.xlu1 %257 }
  0x8f   :  { %v565_v17 = vpop.xlane.xlu0 %64  ;;  %v308_v12 = vrot.slane %v563_v16, %v116_v43 }
  0x90   :  { %v117_v13 = vrot.slane %v565_v17, %v116_v43 }
  0x92   :  { %v567_v18 = vpop.xlane.xlu1 %259 }
  0x93   :  { %v569_v19 = vpop.xlane.xlu0 %66  ;;  %v312_v4 = vrot.slane %v567_v18, %v121_v45 }
  0x94   :  { %v122_v5 = vrot.slane %v569_v19, %v121_v45 }
  0x95   :  { %v313_v16 = vsel %vm123_vm0, %v312_v4, %v308_v12 }
  0x96   :  { %v571_v20 = vpop.xlane.xlu1 %261  ;;  %v124_v17 = vsel %vm123_vm0, %v122_v5, %v117_v13 }
  0x97   :  { %v573_v21 = vpop.xlane.xlu0 %68  ;;  %v317_v8 = vrot.slane %v571_v20, %v128_v46 }
  0x98   :  { %v129_v9 = vrot.slane %v573_v21, %v128_v46 }
  0x9a   :  { %v575_v22 = vpop.xlane.xlu1 %263 }
  0x9b   :  { %v577_v23 = vpop.xlane.xlu0 %70  ;;  %v322_v14 = vrot.slane %v575_v22, %v135_v49 }
  0x9c   :  { %v136_v15 = vrot.slane %v577_v23, %v135_v49 }
  0x9e   :  { %v579_v24 = vpop.xlane.xlu1 %265 }
  0x9f   :  { %v581_v25 = vpop.xlane.xlu0 %72  ;;  %v327_v18 = vrot.slane %v579_v24, %v142_v54  ;;  %v318_v24 = vsel %vm130_vm1, %v317_v8, %v313_v16 }
  0xa0   :  { %v143_v19 = vrot.slane %v581_v25, %v142_v54  ;;  %v131_v25 = vsel %vm130_vm1, %v129_v9, %v124_v17  ;;  %v323_v36 = vsel %vm137_vm2, %v322_v14, %v318_v24 }
  0xa1   :  { %v138_v39 = vsel %vm137_vm2, %v136_v15, %v131_v25 }
  0xa2   :  { %v583_v26 = vpop.xlane.xlu1 %267  ;;  %v145_v43 = vsel %vm144_vm3, %v143_v19, %v138_v39 }
  0xa3   :  { %v585_v27 = vpop.xlane.xlu0 %74  ;;  %v332_v22 = vrot.slane %v583_v26, %v149_v57 }
  0xa4   :  { %v150_v23 = vrot.slane %v585_v27, %v149_v57  ;;  %v328_v27 = vsel %vm144_vm3, %v327_v18, %v323_v36 }
  0xa5   :  { %v333_v46 = vsel %vm151_vm4, %v332_v22, %v328_v27 }
  0xa6   :  { %v587_v28 = vpop.xlane.xlu1 %269  ;;  %v152_v47 = vsel %vm151_vm4, %v150_v23, %v145_v43 }
  0xa7   :  { %v589_v29 = vpop.xlane.xlu0 %76  ;;  %v337_v37 = vrot.slane %v587_v28, %v156_v60 }
  0xa8   :  { %v157_v38 = vrot.slane %v589_v29, %v156_v60 }
  0xa9   :  { %v338_v48 = vsel %vm158_vm5, %v337_v37, %v333_v46 }
  0xaa   :  { %v591_v30 = vpop.xlane.xlu1 %271  ;;  %v159_v49 = vsel %vm158_vm5, %v157_v38, %v152_v47 }
  0xab   :  { %v593_v31 = vpop.xlane.xlu0 %78  ;;  %v342_v42 = vrot.slane %v591_v30, %v163_v61 }
  0xac   :  { %v164_v26 = vrot.slane %v593_v31, %v163_v61 }
  0xad   :  { %v343_v50 = vsel %vm165_vm6, %v342_v42, %v338_v48 }
  0xae   :  { %v595_v33 = vpop.xlane.xlu1 %273  ;;  %v166_v51 = vsel %vm165_vm6, %v164_v26, %v159_v49 }
  0xaf   :  { %v597_v34 = vpop.xlane.xlu0 %80  ;;  %v347_v44 = vrot.slane %v595_v33, %v607_v62 }
  0xb0   :  { %v171_v28 = vrot.slane %v597_v34, %v607_v62 }
  0xb1   :  { %v348_v54 = vsel %vm172_vm7, %v347_v44, %v343_v50 }
  0xb2   :  { %v599_v40 = vpop.xlane.xlu1 %275  ;;  %v173_v55 = vsel %vm172_vm7, %v171_v28, %v166_v51 }
  0xb3   :  { %v601_v41 = vpop.xlane.xlu0 %82  ;;  %v352_v30 = vrot.slane %v599_v40, %v609_v63 }
  0xb4   :  { %v178_v31 = vrot.slane %v601_v41, %v609_v63 }
  0xb5   :  { %v353_v58 = vsel %vm179_vm8, %v352_v30, %v348_v54 }
  0xb6   :  { %v603_v52 = vpop.xlane.xlu1 %277  ;;  %v180_v59 = vsel %vm179_vm8, %v178_v31, %v173_v55 }
  0xb7   :  { %v605_v53 = vpop.xlane.xlu0 %84  ;;  %v357_v33 = vrot.slane %v603_v52, %v617_v6 }
  0xb8   :  { %v185_v34 = vrot.slane %v605_v53, %v617_v6 }
  0xb9   :  { %v358_v62 = vsel %vm186_vm9, %v357_v33, %v353_v58 }
  0xba   :  { %v611_v0 = vpop.xlane.xlu1 %279  ;;  %v187_v63 = vsel %vm186_vm9, %v185_v34, %v180_v59 }
  0xbb   :  { %v613_v1 = vpop.xlane.xlu0 %86  ;;  %v362_v40 = vrot.slane %v611_v0, %v619_v7 }
  0xbc   :  { %v192_v41 = vrot.slane %v613_v1, %v619_v7 }
  0xbd   :  { %v363_v2 = vsel %vm193_vm10, %v362_v40, %v358_v62 }
  0xbe   :  { %v282_v20 = vpop.xlane.xlu1 %281  ;;  %v194_v3 = vsel %vm193_vm10, %v192_v41, %v187_v63 }
  0xbf   :  { %v89_v21 = vpop.xlane.xlu0 %88  ;;  %v367_v56 = vrot.slane %v282_v20, %v623_v10 }
  0xc0   :  { %v199_v52 = vrot.slane %v89_v21, %v623_v10 }
  0xc1   :  { %v368_v4 = vsel %vm200_vm11, %v367_v56, %v363_v2 }
  0xc2   :  { %v284_v29 = vpop.xlane.xlu1 %283  ;;  %v201_v5 = vsel %vm200_vm11, %v199_v52, %v194_v3 }
  0xc3   :  { %v91_v45 = vpop.xlane.xlu0 %90  ;;  %v372_v60 = vrot.slane %v284_v29, %v625_v11 }
  0xc4   :  { %v206_v61 = vrot.slane %v91_v45, %v625_v11 }
  0xc5   :  { %v373_v8 = vsel %vm207_vm12, %v372_v60, %v368_v4 }
  0xc6   :  { %v286_v57 = vpop.xlane.xlu1 %285  ;;  %v208_v9 = vsel %vm207_vm12, %v206_v61, %v201_v5 }
  0xc7   :  { %v93_v53 = vpop.xlane.xlu0 %92  ;;  %v377_v0 = vrot.slane %v286_v57, %v633_v32 }
  0xc8   :  { %v213_v1 = vrot.slane %v93_v53, %v633_v32 }
  0xc9   :  { %v378_v12 = vsel %vm214_vm13, %v377_v0, %v373_v8 }
  0xca   :  { %v288_v6 = vpop.xlane.xlu1 %287  ;;  %v215_v13 = vsel %vm214_vm13, %v213_v1, %v208_v9 }
  0xcb   :  { %v95_v7 = vpop.xlane.xlu0 %94  ;;  %v382_v10 = vrot.slane %v288_v6, %v635_v35 }
  0xcc   :  { %v220_v11 = vrot.slane %v95_v7, %v635_v35 }
  0xcd   :  { %v383_v14 = vsel %vm221_vm14, %v382_v10, %v378_v12 }
  0xce   :  { %v222_v15 = vsel %vm221_vm14, %v220_v11, %v215_v13  ;;  %385 = vst [vmem:[%s702_s4] sm:$0x1] %v383_v14 }
  0xcf   :  { %224 = vst [vmem:[%s703_s3] sm:$0x1] %v222_v15 }

</bundles_post_ra>
